<compile_context>
chip_gen: v5e
topology: v5e:2x2
jax: 0.10.0
libtpu: 0.0.40
codegen_flags: <defaults>
</compile_context>

<pallas_src>
import functools

import jax
import jax.numpy as jnp
import numpy as np
from jax.experimental import pallas as pl
from jax.experimental.pallas import tpu as pltpu

VMEM_LIMIT = 32 * 1024 * 1024  # safe on v5e/v6e/v7x (<= physical VMEM on all gens)


# ---------------------------------------------------------------------------
# tile-size helpers (lane dim must be a multiple of 128 or the full axis)
# ---------------------------------------------------------------------------
def _pick_s_tile(S, C):
    budget = max(128, (((1 << 21) // (4 * C)) // 128) * 128)  # ~2 MiB f32 per x tile
    if S <= budget:
        return S
    for cand in range(budget, 127, -128):
        if S % cand == 0:
            return cand
    return S


def _pick_q_chunk(HW):
    if HW <= 512:
        return HW
    for cand in range(512, 127, -128):
        if HW % cand == 0:
            return cand
    return HW


# ---------------------------------------------------------------------------
# Kernel 1: per-channel GroupNorm statistics (Welford merge across spatial tiles)
# ---------------------------------------------------------------------------
def _gn_stats_kernel(x_ref, mean_ref, m2_ref, *, tile):
    s_idx = pl.program_id(1)
    x = x_ref[0]                                             # (C, ts) f32
    mean_b = jnp.sum(x, axis=1, keepdims=True) * (1.0 / tile)   # (C, 1)
    m2_b = jnp.sum((x - mean_b) ** 2, axis=1, keepdims=True)    # (C, 1)

    @pl.when(s_idx == 0)
    def _():
        mean_ref[0] = mean_b
        m2_ref[0] = m2_b

    @pl.when(s_idx > 0)
    def _():
        na = (s_idx * tile).astype(jnp.float32)
        mean_a = mean_ref[0]
        delta = mean_b - mean_a
        tot = na + float(tile)
        mean_ref[0] = mean_a + delta * (tile / tot)
        m2_ref[0] = m2_ref[0] + m2_b + delta * delta * (na * tile / tot)


def gn_channel_stats(x_bcs):
    B, C, S = x_bcs.shape
    ts = _pick_s_tile(S, C)
    n_s = S // ts
    kernel = functools.partial(_gn_stats_kernel, tile=ts)
    mean, m2 = pl.pallas_call(
        kernel,
        out_shape=(jax.ShapeDtypeStruct((B, C, 1), jnp.float32),
                   jax.ShapeDtypeStruct((B, C, 1), jnp.float32)),
        grid=(B, n_s),
        in_specs=[pl.BlockSpec((1, C, ts), lambda b, s: (b, 0, s))],
        out_specs=[pl.BlockSpec((1, C, 1), lambda b, s: (b, 0, 0)),
                   pl.BlockSpec((1, C, 1), lambda b, s: (b, 0, 0))],
        compiler_params=pltpu.CompilerParams(
            dimension_semantics=("parallel", "arbitrary"),
            vmem_limit_bytes=VMEM_LIMIT),
    )(x_bcs)
    return mean[:, :, 0], m2[:, :, 0]


# ---------------------------------------------------------------------------
# Kernel 2: fused GroupNorm-apply + q/k/v 1x1 projections (bf16 MXU, f32 acc)
# ---------------------------------------------------------------------------
def _norm_qkv_kernel(x_ref, a_ref, c_ref, w_ref, wb_ref, q_ref, k_ref, v_ref):
    h = x_ref[0] * a_ref[0] + c_ref[0]                       # (C, ts) f32 normalize
    h16 = h.astype(jnp.bfloat16)
    for i, o_ref in enumerate((q_ref, k_ref, v_ref)):
        y = jax.lax.dot_general(w_ref[i], h16, (((1,), (0,)), ((), ())),
                                preferred_element_type=jnp.float32)   # (C, ts)
        o_ref[0] = (y + wb_ref[i]).astype(jnp.bfloat16)


def norm_qkv(x_bcs, a_bc1, c_bc1, w_qkv, b_qkv):
    B, C, S = x_bcs.shape
    ts = _pick_s_tile(S, C)
    n_s = S // ts
    return pl.pallas_call(
        _norm_qkv_kernel,
        out_shape=tuple(jax.ShapeDtypeStruct((B, C, S), jnp.bfloat16) for _ in range(3)),
        grid=(B, n_s),
        in_specs=[
            pl.BlockSpec((1, C, ts), lambda b, s: (b, 0, s)),
            pl.BlockSpec((1, C, 1), lambda b, s: (b, 0, 0)),
            pl.BlockSpec((1, C, 1), lambda b, s: (b, 0, 0)),
            pl.BlockSpec((3, C, C), lambda b, s: (0, 0, 0)),
            pl.BlockSpec((3, C, 1), lambda b, s: (0, 0, 0)),
        ],
        out_specs=[pl.BlockSpec((1, C, ts), lambda b, s: (b, 0, s))] * 3,
        compiler_params=pltpu.CompilerParams(
            dimension_semantics=("parallel", "parallel"),
            vmem_limit_bytes=VMEM_LIMIT),
    )(x_bcs, a_bc1, c_bc1, w_qkv, b_qkv)


# ---------------------------------------------------------------------------
# Kernel 3: attention over one "virtual frame" (exact torch reshape semantics),
#           query-chunked to bound the score matrix.
# ---------------------------------------------------------------------------
def _attn_kernel(q_ref, k_ref, v_ref, o_ref, *, scale, tq):
    q = q_ref[0]                                             # (C, HW) bf16
    k = k_ref[0]
    v = v_ref[0]
    HW = q.shape[1]
    for i0 in range(0, HW, tq):
        qc = q[:, i0:i0 + tq]                                # (C, tq)
        s = jax.lax.dot_general(qc, k, (((0,), (0,)), ((), ())),
                                preferred_element_type=jnp.float32) * scale   # (tq, HW)
        s = s - jnp.max(s, axis=-1, keepdims=True)
        e = jnp.exp(s)
        p = e * pl.reciprocal(jnp.sum(e, axis=-1, keepdims=True), approx=True)
        oc = jax.lax.dot_general(v, p.astype(jnp.bfloat16), (((1,), (1,)), ((), ())),
                                 preferred_element_type=jnp.float32)          # (C, tq)
        o_ref[0, :, i0:i0 + tq] = oc.astype(o_ref.dtype)


def frame_attention(q_bcs, k_bcs, v_bcs, T, HW):
    B, C, S = q_bcs.shape
    N = B * T
    # Row-major reshape (B, C, T*HW) -> (B*T, C, HW): identical to the PyTorch
    # q.reshape(b*t, c, h*w) on a contiguous NCTHW tensor (the legacy quirk).
    qv = q_bcs.reshape(N, C, HW)
    kv = k_bcs.reshape(N, C, HW)
    vv = v_bcs.reshape(N, C, HW)
    tq = _pick_q_chunk(HW)
    kernel = functools.partial(_attn_kernel, scale=float(C) ** -0.5, tq=tq)
    o = pl.pallas_call(
        kernel,
        out_shape=jax.ShapeDtypeStruct((N, C, HW), jnp.bfloat16),
        grid=(N,),
        in_specs=[pl.BlockSpec((1, C, HW), lambda n: (n, 0, 0))] * 3,
        out_specs=pl.BlockSpec((1, C, HW), lambda n: (n, 0, 0)),
        compiler_params=pltpu.CompilerParams(
            dimension_semantics=("parallel",),
            vmem_limit_bytes=VMEM_LIMIT),
    )(qv, kv, vv)
    return o.reshape(B, C, S)


# ---------------------------------------------------------------------------
# Kernel 4: fused proj_out (1x1) + residual add
# ---------------------------------------------------------------------------
def _proj_res_kernel(x_ref, h_ref, w_ref, b_ref, o_ref):
    y = jax.lax.dot_general(w_ref[...], h_ref[0], (((1,), (0,)), ((), ())),
                            preferred_element_type=jnp.float32)   # (C, ts)
    o_ref[0] = x_ref[0] + y + b_ref[...]


def proj_residual(x_bcs, h_bcs, w_p, b_p):
    B, C, S = x_bcs.shape
    ts = _pick_s_tile(S, C)
    n_s = S // ts
    return pl.pallas_call(
        _proj_res_kernel,
        out_shape=jax.ShapeDtypeStruct((B, C, S), jnp.float32),
        grid=(B, n_s),
        in_specs=[
            pl.BlockSpec((1, C, ts), lambda b, s: (b, 0, s)),
            pl.BlockSpec((1, C, ts), lambda b, s: (b, 0, s)),
            pl.BlockSpec((C, C), lambda b, s: (0, 0)),
            pl.BlockSpec((C, 1), lambda b, s: (0, 0)),
        ],
        out_specs=pl.BlockSpec((1, C, ts), lambda b, s: (b, 0, s)),
        compiler_params=pltpu.CompilerParams(
            dimension_semantics=("parallel", "parallel"),
            vmem_limit_bytes=VMEM_LIMIT),
    )(x_bcs, h_bcs, w_p, b_p)


# ---------------------------------------------------------------------------
# Full AttnBlock3D forward
# ---------------------------------------------------------------------------
def attn_block_3d(x_ncthw, params, num_groups=32, eps=1e-6):
    x = x_ncthw.astype(jnp.float32)
    B, C, T, H, W = x.shape
    HW = H * W
    S = T * HW
    x_flat = x.reshape(B, C, S)

    # GroupNorm statistics (per-channel Welford over spatial tiles), tiny glue to
    # fold channels into groups and build per-(batch, channel) affine a*x + c.
    mean_c, m2_c = gn_channel_stats(x_flat)                      # (B, C) each
    gs = C // num_groups
    mean_g = mean_c.reshape(B, num_groups, gs).mean(-1)          # (B, G)
    m2_g = (m2_c.reshape(B, num_groups, gs).sum(-1)
            + S * ((mean_c.reshape(B, num_groups, gs) - mean_g[..., None]) ** 2).sum(-1))
    var_g = m2_g / (S * gs)
    inv_g = jax.lax.rsqrt(var_g + eps)
    inv_cc = jnp.repeat(inv_g, gs, axis=1)                       # (B, C)
    mean_cc = jnp.repeat(mean_g, gs, axis=1)
    a = (inv_cc * params["gamma"][None, :]).reshape(B, C, 1)
    cb = (params["beta"][None, :] - mean_cc * inv_cc * params["gamma"][None, :]
          ).reshape(B, C, 1)

    # 1x1x1 CausalConv3d weights (time kernel 1 -> pointwise linear), bf16 for MXU.
    def w2d(w):
        return w[:, :, 0, 0, 0]                                  # (Cout, Cin)

    w_qkv = jnp.stack([w2d(params["wq"]), w2d(params["wk"]),
                       w2d(params["wv"])]).astype(jnp.bfloat16)  # (3, C, C)
    b_qkv = jnp.stack([params["bq"], params["bk"],
                       params["bv"]]).reshape(3, C, 1).astype(jnp.float32)

    # Fused normalize + q/k/v projections.
    q, k, v = norm_qkv(x_flat, a, cb, w_qkv, b_qkv)              # (B, C, S) bf16

    # Attention per "frame" exactly as the torch reshape defines it.
    h_attn = frame_attention(q, k, v, T, HW)                     # (B, C, S) bf16

    # Fused proj_out + residual.
    w_p = w2d(params["wp"]).astype(jnp.bfloat16)                 # (C, C)
    b_p = params["bp"].reshape(C, 1).astype(jnp.float32)
    out = proj_residual(x_flat, h_attn, w_p, b_p)                # (B, C, S) f32

    return out.reshape(B, C, T, H, W)


# ---------------------------------------------------------------------------
# Pure-JAX reference mirroring the PyTorch module op-for-op (for validation).
# ---------------------------------------------------------------------------
def ref_forward(x, p, num_groups=32, eps=1e-6):
    B, C, T, H, W = x.shape
    gs = C // num_groups
    xr = x.reshape(B, num_groups, gs, T, H, W)
    m = xr.mean(axis=(2, 3, 4, 5), keepdims=True)
    v = ((xr - m) ** 2).mean(axis=(2, 3, 4, 5), keepdims=True)
    h_ = ((xr - m) / jnp.sqrt(v + eps)).reshape(B, C, T, H, W)
    h_ = h_ * p["gamma"].reshape(1, C, 1, 1, 1) + p["beta"].reshape(1, C, 1, 1, 1)

    def conv1x1(h, w, b):
        return (jnp.einsum("oc,bcthw->bothw", w[:, :, 0, 0, 0], h)
                + b.reshape(1, C, 1, 1, 1))

    q = conv1x1(h_, p["wq"], p["bq"])
    k = conv1x1(h_, p["wk"], p["bk"])
    vv = conv1x1(h_, p["wv"], p["bv"])

    q = q.reshape(B * T, C, H * W).transpose(0, 2, 1)            # (BT, HW, C)
    k = k.reshape(B * T, C, H * W)                               # (BT, C, HW)
    w_ = jnp.einsum("nic,ncj->nij", q, k) * (float(C) ** -0.5)
    w_ = jax.nn.softmax(w_, axis=2)
    vv = vv.reshape(B * T, C, H * W)
    hh = jnp.einsum("ncj,nij->nci", vv, w_)                      # (BT, C, HW)
    hh = hh.reshape(B, C, T, H, W)
    hh = conv1x1(hh, p["wp"], p["bp"])
    return x + hh


# ---------------------------------------------------------------------------
if __name__ == "__main__":
    B, C, T, H, W = 2, 32, 4, 16, 16   # C divisible by 32 (GroupNorm groups)

    key = jax.random.PRNGKey(0)
    ks = jax.random.split(key, 12)
    params = {
        "gamma": 1.0 + 0.1 * jax.random.normal(ks[0], (C,), jnp.float32),
        "beta": 0.1 * jax.random.normal(ks[1], (C,), jnp.float32),
        "wq": 0.1 * jax.random.normal(ks[2], (C, C, 1, 1, 1), jnp.float32),
        "bq": 0.05 * jax.random.normal(ks[3], (C,), jnp.float32),
        "wk": 0.1 * jax.random.normal(ks[4], (C, C, 1, 1, 1), jnp.float32),
        "bk": 0.05 * jax.random.normal(ks[5], (C,), jnp.float32),
        "wv": 0.1 * jax.random.normal(ks[6], (C, C, 1, 1, 1), jnp.float32),
        "bv": 0.05 * jax.random.normal(ks[7], (C,), jnp.float32),
        "wp": 0.1 * jax.random.normal(ks[8], (C, C, 1, 1, 1), jnp.float32),
        "bp": 0.05 * jax.random.normal(ks[9], (C,), jnp.float32),
    }
    x = jax.random.normal(ks[10], (B, C, T, H, W), jnp.float32)

    out = jax.block_until_ready(jax.jit(attn_block_3d)(x, params))
    ref = jax.block_until_ready(ref_forward(x, params))

    assert out.shape == (B, C, T, H, W), out.shape
    max_err = float(np.max(np.abs(np.asarray(out) - np.asarray(ref))))
    assert np.allclose(np.asarray(out), np.asarray(ref), atol=2e-2, rtol=2e-2), \
        f"Pallas output mismatch vs reference (max abs err {max_err})"

    print("KERNEL_OK")
</pallas_src>

<mosaic_0001>
module attributes {stable_mosaic.version = 11 : i64} {
  func.func @_gn_stats_kernel(%arg0: i32, %arg1: i32, %arg2: memref<1x32x1024xf32, #tpu.memory_space<vmem>>, %arg3: memref<1x32x1xf32, #tpu.memory_space<vmem>>, %arg4: memref<1x32x1xf32, #tpu.memory_space<vmem>>) attributes {dimension_semantics = [#tpu.dimension_semantics<parallel>, #tpu.dimension_semantics<arbitrary>], iteration_bounds = array<i64: 2, 1>, scalar_prefetch = 0 : i64, scratch_operands = 0 : i64, tpu.core_type = #tpu.core_type<tc>, window_params = [{transform_indices = @transform_0, window_bounds = array<i64: 1, 32, 1024>}, {transform_indices = @transform_1, window_bounds = array<i64: 1, 32, 1>}, {transform_indices = @transform_2, window_bounds = array<i64: 1, 32, 1>}]} {
    %c0 = arith.constant 0 : index
    %c0_0 = arith.constant 0 : index
    %c0_1 = arith.constant 0 : index
    %0 = vector.load %arg2[%c0, %c0_0, %c0_1] : memref<1x32x1024xf32, #tpu.memory_space<vmem>>, vector<1x32x1024xf32>
    %1 = vector.shape_cast %0 : vector<1x32x1024xf32> to vector<32x1024xf32>
    %cst = arith.constant dense<0.000000e+00> : vector<32xf32>
    %2 = vector.multi_reduction <add>, %1, %cst [1] : vector<32x1024xf32> to vector<32xf32>
    %3 = vector.shape_cast %2 : vector<32xf32> to vector<32x1xf32>
    %cst_2 = arith.constant 9.765625E-4 : f32
    %4 = vector.broadcast %cst_2 : f32 to vector<32x1xf32>
    %5 = arith.mulf %3, %4 : vector<32x1xf32>
    %6 = vector.broadcast %5 : vector<32x1xf32> to vector<32x1024xf32>
    %7 = arith.subf %1, %6 : vector<32x1024xf32>
    %8 = arith.mulf %7, %7 : vector<32x1024xf32>
    %cst_3 = arith.constant dense<0.000000e+00> : vector<32xf32>
    %9 = vector.multi_reduction <add>, %8, %cst_3 [1] : vector<32x1024xf32> to vector<32xf32>
    %10 = vector.shape_cast %9 : vector<32xf32> to vector<32x1xf32>
    %c0_i32 = arith.constant 0 : i32
    %11 = arith.cmpi eq, %arg1, %c0_i32 : i32
    %12 = arith.extui %11 : i1 to i32
    %c0_i32_4 = arith.constant 0 : i32
    %13 = arith.cmpi ne, %12, %c0_i32_4 : i32
    scf.if %13 {
      %c0_7 = arith.constant 0 : index
      %c0_8 = arith.constant 0 : index
      %c0_9 = arith.constant 0 : index
      %17 = vector.load %arg3[%c0_7, %c0_8, %c0_9] : memref<1x32x1xf32, #tpu.memory_space<vmem>>, vector<1x32x1xf32>
      %18 = vector.shape_cast %17 : vector<1x32x1xf32> to vector<32x1xf32>
      %19 = vector.shape_cast %5 : vector<32x1xf32> to vector<1x32x1xf32>
      tpu.vector_store %arg3[%c0_7, %c0_8, %c0_9], %19 {strides = array<i32>} : memref<1x32x1xf32, #tpu.memory_space<vmem>>, vector<1x32x1xf32>,
      %c0_10 = arith.constant 0 : index
      %c0_11 = arith.constant 0 : index
      %c0_12 = arith.constant 0 : index
      %20 = vector.load %arg4[%c0_10, %c0_11, %c0_12] : memref<1x32x1xf32, #tpu.memory_space<vmem>>, vector<1x32x1xf32>
      %21 = vector.shape_cast %20 : vector<1x32x1xf32> to vector<32x1xf32>
      %22 = vector.shape_cast %10 : vector<32x1xf32> to vector<1x32x1xf32>
      tpu.vector_store %arg4[%c0_10, %c0_11, %c0_12], %22 {strides = array<i32>} : memref<1x32x1xf32, #tpu.memory_space<vmem>>, vector<1x32x1xf32>,
    } else {
    }
    %c0_i32_5 = arith.constant 0 : i32
    %14 = arith.cmpi sgt, %arg1, %c0_i32_5 : i32
    %15 = arith.extui %14 : i1 to i32
    %c0_i32_6 = arith.constant 0 : i32
    %16 = arith.cmpi ne, %15, %c0_i32_6 : i32
    scf.if %16 {
      %c1024_i32 = arith.constant 1024 : i32
      %17 = arith.muli %arg1, %c1024_i32 : i32
      %18 = arith.sitofp %17 : i32 to f32
      %c0_7 = arith.constant 0 : index
      %c0_8 = arith.constant 0 : index
      %c0_9 = arith.constant 0 : index
      %19 = vector.load %arg3[%c0_7, %c0_8, %c0_9] : memref<1x32x1xf32, #tpu.memory_space<vmem>>, vector<1x32x1xf32>
      %20 = vector.shape_cast %19 : vector<1x32x1xf32> to vector<32x1xf32>
      %21 = arith.subf %5, %20 : vector<32x1xf32>
      %cst_10 = arith.constant 1.024000e+03 : f32
      %22 = arith.addf %18, %cst_10 : f32
      %cst_11 = arith.constant 1.024000e+03 : f32
      %23 = arith.divf %cst_11, %22 : f32
      %24 = vector.broadcast %23 : f32 to vector<32x1xf32>
      %25 = arith.mulf %21, %24 : vector<32x1xf32>
      %26 = arith.addf %20, %25 : vector<32x1xf32>
      %c0_12 = arith.constant 0 : index
      %c0_13 = arith.constant 0 : index
      %c0_14 = arith.constant 0 : index
      %27 = vector.load %arg3[%c0_12, %c0_13, %c0_14] : memref<1x32x1xf32, #tpu.memory_space<vmem>>, vector<1x32x1xf32>
      %28 = vector.shape_cast %27 : vector<1x32x1xf32> to vector<32x1xf32>
      %29 = vector.shape_cast %26 : vector<32x1xf32> to vector<1x32x1xf32>
      tpu.vector_store %arg3[%c0_12, %c0_13, %c0_14], %29 {strides = array<i32>} : memref<1x32x1xf32, #tpu.memory_space<vmem>>, vector<1x32x1xf32>,
      %c0_15 = arith.constant 0 : index
      %c0_16 = arith.constant 0 : index
      %c0_17 = arith.constant 0 : index
      %30 = vector.load %arg4[%c0_15, %c0_16, %c0_17] : memref<1x32x1xf32, #tpu.memory_space<vmem>>, vector<1x32x1xf32>
      %31 = vector.shape_cast %30 : vector<1x32x1xf32> to vector<32x1xf32>
      %32 = arith.addf %31, %10 : vector<32x1xf32>
      %33 = arith.mulf %21, %21 : vector<32x1xf32>
      %cst_18 = arith.constant 1.024000e+03 : f32
      %34 = arith.mulf %18, %cst_18 : f32
      %35 = arith.divf %34, %22 : f32
      %36 = vector.broadcast %35 : f32 to vector<32x1xf32>
      %37 = arith.mulf %33, %36 : vector<32x1xf32>
      %38 = arith.addf %32, %37 : vector<32x1xf32>
      %c0_19 = arith.constant 0 : index
      %c0_20 = arith.constant 0 : index
      %c0_21 = arith.constant 0 : index
      %39 = vector.load %arg4[%c0_19, %c0_20, %c0_21] : memref<1x32x1xf32, #tpu.memory_space<vmem>>, vector<1x32x1xf32>
      %40 = vector.shape_cast %39 : vector<1x32x1xf32> to vector<32x1xf32>
      %41 = vector.shape_cast %38 : vector<32x1xf32> to vector<1x32x1xf32>
      tpu.vector_store %arg4[%c0_19, %c0_20, %c0_21], %41 {strides = array<i32>} : memref<1x32x1xf32, #tpu.memory_space<vmem>>, vector<1x32x1xf32>,
    } else {
    }
    return
  }
  func.func @transform_0(%arg0: i32, %arg1: i32) -> (i32, i32, i32) {
    %c0_i32 = arith.constant 0 : i32
    %c0_i32_0 = arith.constant 0 : i32
    return %arg0, %c0_i32, %arg1 : i32, i32, i32
  }
  func.func @transform_1(%arg0: i32, %arg1: i32) -> (i32, i32, i32) {
    %c0_i32 = arith.constant 0 : i32
    %c0_i32_0 = arith.constant 0 : i32
    %c0_i32_1 = arith.constant 0 : i32
    return %arg0, %c0_i32, %c0_i32_0 : i32, i32, i32
  }
  func.func @transform_2(%arg0: i32, %arg1: i32) -> (i32, i32, i32) {
    %c0_i32 = arith.constant 0 : i32
    %c0_i32_0 = arith.constant 0 : i32
    %c0_i32_1 = arith.constant 0 : i32
    return %arg0, %c0_i32, %c0_i32_0 : i32, i32, i32
  }
}

module attributes {stable_mosaic.version = 11 : i64} {
  func.func @_norm_qkv_kernel(%arg0: i32, %arg1: i32, %arg2: memref<1x32x1024xf32, #tpu.memory_space<vmem>>, %arg3: memref<1x32x1xf32, #tpu.memory_space<vmem>>, %arg4: memref<1x32x1xf32, #tpu.memory_space<vmem>>, %arg5: memref<3x32x32xbf16, #tpu.memory_space<vmem>>, %arg6: memref<3x32x1xf32, #tpu.memory_space<vmem>>, %arg7: memref<1x32x1024xbf16, #tpu.memory_space<vmem>>, %arg8: memref<1x32x1024xbf16, #tpu.memory_space<vmem>>, %arg9: memref<1x32x1024xbf16, #tpu.memory_space<vmem>>) attributes {dimension_semantics = [#tpu.dimension_semantics<parallel>, #tpu.dimension_semantics<parallel>], iteration_bounds = array<i64: 2, 1>, scalar_prefetch = 0 : i64, scratch_operands = 0 : i64, tpu.core_type = #tpu.core_type<tc>, window_params = [{transform_indices = @transform_0, window_bounds = array<i64: 1, 32, 1024>}, {transform_indices = @transform_1, window_bounds = array<i64: 1, 32, 1>}, {transform_indices = @transform_2, window_bounds = array<i64: 1, 32, 1>}, {pipeline_mode = #tpu.pipeline_mode<synchronous>, transform_indices = @transform_3, window_bounds = array<i64: 3, 32, 32>}, {pipeline_mode = #tpu.pipeline_mode<synchronous>, transform_indices = @transform_4, window_bounds = array<i64: 3, 32, 1>}, {transform_indices = @transform_5, window_bounds = array<i64: 1, 32, 1024>}, {transform_indices = @transform_6, window_bounds = array<i64: 1, 32, 1024>}, {transform_indices = @transform_7, window_bounds = array<i64: 1, 32, 1024>}]} {
    %c0 = arith.constant 0 : index
    %c0_0 = arith.constant 0 : index
    %c0_1 = arith.constant 0 : index
    %0 = vector.load %arg2[%c0, %c0_0, %c0_1] : memref<1x32x1024xf32, #tpu.memory_space<vmem>>, vector<1x32x1024xf32>
    %1 = vector.shape_cast %0 : vector<1x32x1024xf32> to vector<32x1024xf32>
    %c0_2 = arith.constant 0 : index
    %c0_3 = arith.constant 0 : index
    %c0_4 = arith.constant 0 : index
    %2 = vector.load %arg3[%c0_2, %c0_3, %c0_4] : memref<1x32x1xf32, #tpu.memory_space<vmem>>, vector<1x32x1xf32>
    %3 = vector.shape_cast %2 : vector<1x32x1xf32> to vector<32x1xf32>
    %4 = vector.broadcast %3 : vector<32x1xf32> to vector<32x1024xf32>
    %5 = arith.mulf %1, %4 : vector<32x1024xf32>
    %c0_5 = arith.constant 0 : index
    %c0_6 = arith.constant 0 : index
    %c0_7 = arith.constant 0 : index
    %6 = vector.load %arg4[%c0_5, %c0_6, %c0_7] : memref<1x32x1xf32, #tpu.memory_space<vmem>>, vector<1x32x1xf32>
    %7 = vector.shape_cast %6 : vector<1x32x1xf32> to vector<32x1xf32>
    %8 = vector.broadcast %7 : vector<32x1xf32> to vector<32x1024xf32>
    %9 = arith.addf %5, %8 : vector<32x1024xf32>
    %10 = arith.truncf %9 : vector<32x1024xf32> to vector<32x1024xbf16>
    %c0_8 = arith.constant 0 : index
    %c0_9 = arith.constant 0 : index
    %c0_10 = arith.constant 0 : index
    %11 = vector.load %arg5[%c0_8, %c0_9, %c0_10] : memref<3x32x32xbf16, #tpu.memory_space<vmem>>, vector<1x32x32xbf16>
    %12 = vector.shape_cast %11 : vector<1x32x32xbf16> to vector<32x32xbf16>
    %cst = arith.constant dense<0.000000e+00> : vector<32x1024xf32>
    %13 = tpu.matmul %12, %10, %cst {dimension_numbers = #tpu.dot_dimension_numbers<[1], [0], [0], [1], [0, 0, 1, 1], [], []>} : vector<32x32xbf16>, vector<32x1024xbf16>, vector<32x1024xf32> -> vector<32x1024xf32>
    %c0_11 = arith.constant 0 : index
    %c0_12 = arith.constant 0 : index
    %c0_13 = arith.constant 0 : index
    %14 = vector.load %arg6[%c0_11, %c0_12, %c0_13] : memref<3x32x1xf32, #tpu.memory_space<vmem>>, vector<1x32x1xf32>
    %15 = vector.shape_cast %14 : vector<1x32x1xf32> to vector<32x1xf32>
    %16 = vector.broadcast %15 : vector<32x1xf32> to vector<32x1024xf32>
    %17 = arith.addf %13, %16 : vector<32x1024xf32>
    %18 = arith.truncf %17 : vector<32x1024xf32> to vector<32x1024xbf16>
    %c0_14 = arith.constant 0 : index
    %c0_15 = arith.constant 0 : index
    %c0_16 = arith.constant 0 : index
    %19 = vector.load %arg7[%c0_14, %c0_15, %c0_16] : memref<1x32x1024xbf16, #tpu.memory_space<vmem>>, vector<1x32x1024xbf16>
    %20 = vector.shape_cast %19 : vector<1x32x1024xbf16> to vector<32x1024xbf16>
    %21 = vector.shape_cast %18 : vector<32x1024xbf16> to vector<1x32x1024xbf16>
    tpu.vector_store %arg7[%c0_14, %c0_15, %c0_16], %21 {strides = array<i32>} : memref<1x32x1024xbf16, #tpu.memory_space<vmem>>, vector<1x32x1024xbf16>,
    %c1 = arith.constant 1 : index
    %c0_17 = arith.constant 0 : index
    %c0_18 = arith.constant 0 : index
    %22 = vector.load %arg5[%c1, %c0_17, %c0_18] : memref<3x32x32xbf16, #tpu.memory_space<vmem>>, vector<1x32x32xbf16>
    %23 = vector.shape_cast %22 : vector<1x32x32xbf16> to vector<32x32xbf16>
    %cst_19 = arith.constant dense<0.000000e+00> : vector<32x1024xf32>
    %24 = tpu.matmul %23, %10, %cst_19 {dimension_numbers = #tpu.dot_dimension_numbers<[1], [0], [0], [1], [0, 0, 1, 1], [], []>} : vector<32x32xbf16>, vector<32x1024xbf16>, vector<32x1024xf32> -> vector<32x1024xf32>
    %c1_20 = arith.constant 1 : index
    %c0_21 = arith.constant 0 : index
    %c0_22 = arith.constant 0 : index
    %25 = vector.load %arg6[%c1_20, %c0_21, %c0_22] : memref<3x32x1xf32, #tpu.memory_space<vmem>>, vector<1x32x1xf32>
    %26 = vector.shape_cast %25 : vector<1x32x1xf32> to vector<32x1xf32>
    %27 = vector.broadcast %26 : vector<32x1xf32> to vector<32x1024xf32>
    %28 = arith.addf %24, %27 : vector<32x1024xf32>
    %29 = arith.truncf %28 : vector<32x1024xf32> to vector<32x1024xbf16>
    %c0_23 = arith.constant 0 : index
    %c0_24 = arith.constant 0 : index
    %c0_25 = arith.constant 0 : index
    %30 = vector.load %arg8[%c0_23, %c0_24, %c0_25] : memref<1x32x1024xbf16, #tpu.memory_space<vmem>>, vector<1x32x1024xbf16>
    %31 = vector.shape_cast %30 : vector<1x32x1024xbf16> to vector<32x1024xbf16>
    %32 = vector.shape_cast %29 : vector<32x1024xbf16> to vector<1x32x1024xbf16>
    tpu.vector_store %arg8[%c0_23, %c0_24, %c0_25], %32 {strides = array<i32>} : memref<1x32x1024xbf16, #tpu.memory_space<vmem>>, vector<1x32x1024xbf16>,
    %c2 = arith.constant 2 : index
    %c0_26 = arith.constant 0 : index
    %c0_27 = arith.constant 0 : index
    %33 = vector.load %arg5[%c2, %c0_26, %c0_27] : memref<3x32x32xbf16, #tpu.memory_space<vmem>>, vector<1x32x32xbf16>
    %34 = vector.shape_cast %33 : vector<1x32x32xbf16> to vector<32x32xbf16>
    %cst_28 = arith.constant dense<0.000000e+00> : vector<32x1024xf32>
    %35 = tpu.matmul %34, %10, %cst_28 {dimension_numbers = #tpu.dot_dimension_numbers<[1], [0], [0], [1], [0, 0, 1, 1], [], []>} : vector<32x32xbf16>, vector<32x1024xbf16>, vector<32x1024xf32> -> vector<32x1024xf32>
    %c2_29 = arith.constant 2 : index
    %c0_30 = arith.constant 0 : index
    %c0_31 = arith.constant 0 : index
    %36 = vector.load %arg6[%c2_29, %c0_30, %c0_31] : memref<3x32x1xf32, #tpu.memory_space<vmem>>, vector<1x32x1xf32>
    %37 = vector.shape_cast %36 : vector<1x32x1xf32> to vector<32x1xf32>
    %38 = vector.broadcast %37 : vector<32x1xf32> to vector<32x1024xf32>
    %39 = arith.addf %35, %38 : vector<32x1024xf32>
    %40 = arith.truncf %39 : vector<32x1024xf32> to vector<32x1024xbf16>
    %c0_32 = arith.constant 0 : index
    %c0_33 = arith.constant 0 : index
    %c0_34 = arith.constant 0 : index
    %41 = vector.load %arg9[%c0_32, %c0_33, %c0_34] : memref<1x32x1024xbf16, #tpu.memory_space<vmem>>, vector<1x32x1024xbf16>
    %42 = vector.shape_cast %41 : vector<1x32x1024xbf16> to vector<32x1024xbf16>
    %43 = vector.shape_cast %40 : vector<32x1024xbf16> to vector<1x32x1024xbf16>
    tpu.vector_store %arg9[%c0_32, %c0_33, %c0_34], %43 {strides = array<i32>} : memref<1x32x1024xbf16, #tpu.memory_space<vmem>>, vector<1x32x1024xbf16>,
    return
  }
  func.func @transform_0(%arg0: i32, %arg1: i32) -> (i32, i32, i32) {
    %c0_i32 = arith.constant 0 : i32
    %c0_i32_0 = arith.constant 0 : i32
    return %arg0, %c0_i32, %arg1 : i32, i32, i32
  }
  func.func @transform_1(%arg0: i32, %arg1: i32) -> (i32, i32, i32) {
    %c0_i32 = arith.constant 0 : i32
    %c0_i32_0 = arith.constant 0 : i32
    %c0_i32_1 = arith.constant 0 : i32
    return %arg0, %c0_i32, %c0_i32_0 : i32, i32, i32
  }
  func.func @transform_2(%arg0: i32, %arg1: i32) -> (i32, i32, i32) {
    %c0_i32 = arith.constant 0 : i32
    %c0_i32_0 = arith.constant 0 : i32
    %c0_i32_1 = arith.constant 0 : i32
    return %arg0, %c0_i32, %c0_i32_0 : i32, i32, i32
  }
  func.func @transform_3(%arg0: i32, %arg1: i32) -> (i32, i32, i32) {
    %c0_i32 = arith.constant 0 : i32
    %c0_i32_0 = arith.constant 0 : i32
    %c0_i32_1 = arith.constant 0 : i32
    %c0_i32_2 = arith.constant 0 : i32
    return %c0_i32, %c0_i32_0, %c0_i32_1 : i32, i32, i32
  }
  func.func @transform_4(%arg0: i32, %arg1: i32) -> (i32, i32, i32) {
    %c0_i32 = arith.constant 0 : i32
    %c0_i32_0 = arith.constant 0 : i32
    %c0_i32_1 = arith.constant 0 : i32
    %c0_i32_2 = arith.constant 0 : i32
    return %c0_i32, %c0_i32_0, %c0_i32_1 : i32, i32, i32
  }
  func.func @transform_5(%arg0: i32, %arg1: i32) -> (i32, i32, i32) {
    %c0_i32 = arith.constant 0 : i32
    %c0_i32_0 = arith.constant 0 : i32
    return %arg0, %c0_i32, %arg1 : i32, i32, i32
  }
  func.func @transform_6(%arg0: i32, %arg1: i32) -> (i32, i32, i32) {
    %c0_i32 = arith.constant 0 : i32
    %c0_i32_0 = arith.constant 0 : i32
    return %arg0, %c0_i32, %arg1 : i32, i32, i32
  }
  func.func @transform_7(%arg0: i32, %arg1: i32) -> (i32, i32, i32) {
    %c0_i32 = arith.constant 0 : i32
    %c0_i32_0 = arith.constant 0 : i32
    return %arg0, %c0_i32, %arg1 : i32, i32, i32
  }
}

module attributes {stable_mosaic.version = 11 : i64} {
  func.func @_attn_kernel(%arg0: i32, %arg1: memref<1x32x256xbf16, #tpu.memory_space<vmem>>, %arg2: memref<1x32x256xbf16, #tpu.memory_space<vmem>>, %arg3: memref<1x32x256xbf16, #tpu.memory_space<vmem>>, %arg4: memref<1x32x256xbf16, #tpu.memory_space<vmem>>) attributes {dimension_semantics = [#tpu.dimension_semantics<parallel>], iteration_bounds = array<i64: 8>, scalar_prefetch = 0 : i64, scratch_operands = 0 : i64, tpu.core_type = #tpu.core_type<tc>, window_params = [{transform_indices = @transform_0, window_bounds = array<i64: 1, 32, 256>}, {transform_indices = @transform_1, window_bounds = array<i64: 1, 32, 256>}, {transform_indices = @transform_2, window_bounds = array<i64: 1, 32, 256>}, {transform_indices = @transform_3, window_bounds = array<i64: 1, 32, 256>}]} {
    %c0 = arith.constant 0 : index
    %c0_0 = arith.constant 0 : index
    %c0_1 = arith.constant 0 : index
    %0 = vector.load %arg1[%c0, %c0_0, %c0_1] : memref<1x32x256xbf16, #tpu.memory_space<vmem>>, vector<1x32x256xbf16>
    %1 = vector.shape_cast %0 : vector<1x32x256xbf16> to vector<32x256xbf16>
    %c0_2 = arith.constant 0 : index
    %c0_3 = arith.constant 0 : index
    %c0_4 = arith.constant 0 : index
    %2 = vector.load %arg2[%c0_2, %c0_3, %c0_4] : memref<1x32x256xbf16, #tpu.memory_space<vmem>>, vector<1x32x256xbf16>
    %3 = vector.shape_cast %2 : vector<1x32x256xbf16> to vector<32x256xbf16>
    %c0_5 = arith.constant 0 : index
    %c0_6 = arith.constant 0 : index
    %c0_7 = arith.constant 0 : index
    %4 = vector.load %arg3[%c0_5, %c0_6, %c0_7] : memref<1x32x256xbf16, #tpu.memory_space<vmem>>, vector<1x32x256xbf16>
    %5 = vector.shape_cast %4 : vector<1x32x256xbf16> to vector<32x256xbf16>
    %cst = arith.constant dense<0.000000e+00> : vector<256x256xf32>
    %6 = tpu.matmul %1, %3, %cst {dimension_numbers = #tpu.dot_dimension_numbers<[0], [0], [1], [1], [0, 1, 1, 1], [], []>} : vector<32x256xbf16>, vector<32x256xbf16>, vector<256x256xf32> -> vector<256x256xf32>
    %cst_8 = arith.constant 0.176776692 : f32
    %7 = vector.broadcast %cst_8 : f32 to vector<256x256xf32>
    %8 = arith.mulf %6, %7 : vector<256x256xf32>
    %cst_9 = arith.constant dense<0xFF800000> : vector<256xf32>
    %9 = vector.multi_reduction <maximumf>, %8, %cst_9 [1] : vector<256x256xf32> to vector<256xf32>
    %10 = vector.shape_cast %9 : vector<256xf32> to vector<256x1xf32>
    %11 = vector.broadcast %10 : vector<256x1xf32> to vector<256x256xf32>
    %12 = arith.subf %8, %11 : vector<256x256xf32>
    %13 = math.exp %12 : vector<256x256xf32>
    %cst_10 = arith.constant dense<0.000000e+00> : vector<256xf32>
    %14 = vector.multi_reduction <add>, %13, %cst_10 [1] : vector<256x256xf32> to vector<256xf32>
    %15 = vector.shape_cast %14 : vector<256xf32> to vector<256x1xf32>
    %16 = tpu.reciprocal %15 {approx = true} : vector<256x1xf32> -> vector<256x1xf32>
    %17 = vector.broadcast %16 : vector<256x1xf32> to vector<256x256xf32>
    %18 = arith.mulf %13, %17 : vector<256x256xf32>
    %19 = arith.truncf %18 : vector<256x256xf32> to vector<256x256xbf16>
    %cst_11 = arith.constant dense<0.000000e+00> : vector<32x256xf32>
    %20 = tpu.matmul %5, %19, %cst_11 {dimension_numbers = #tpu.dot_dimension_numbers<[1], [1], [0], [0], [0, 0, 1, 0], [], []>} : vector<32x256xbf16>, vector<256x256xbf16>, vector<32x256xf32> -> vector<32x256xf32>
    %21 = arith.truncf %20 : vector<32x256xf32> to vector<32x256xbf16>
    %c0_12 = arith.constant 0 : index
    %c0_13 = arith.constant 0 : index
    %c0_14 = arith.constant 0 : index
    %22 = vector.load %arg4[%c0_12, %c0_13, %c0_14] : memref<1x32x256xbf16, #tpu.memory_space<vmem>>, vector<1x32x256xbf16>
    %23 = vector.shape_cast %22 : vector<1x32x256xbf16> to vector<32x256xbf16>
    %24 = vector.shape_cast %21 : vector<32x256xbf16> to vector<1x32x256xbf16>
    tpu.vector_store %arg4[%c0_12, %c0_13, %c0_14], %24 {strides = array<i32>} : memref<1x32x256xbf16, #tpu.memory_space<vmem>>, vector<1x32x256xbf16>,
    return
  }
  func.func @transform_0(%arg0: i32) -> (i32, i32, i32) {
    %c0_i32 = arith.constant 0 : i32
    %c0_i32_0 = arith.constant 0 : i32
    %c0_i32_1 = arith.constant 0 : i32
    return %arg0, %c0_i32, %c0_i32_0 : i32, i32, i32
  }
  func.func @transform_1(%arg0: i32) -> (i32, i32, i32) {
    %c0_i32 = arith.constant 0 : i32
    %c0_i32_0 = arith.constant 0 : i32
    %c0_i32_1 = arith.constant 0 : i32
    return %arg0, %c0_i32, %c0_i32_0 : i32, i32, i32
  }
  func.func @transform_2(%arg0: i32) -> (i32, i32, i32) {
    %c0_i32 = arith.constant 0 : i32
    %c0_i32_0 = arith.constant 0 : i32
    %c0_i32_1 = arith.constant 0 : i32
    return %arg0, %c0_i32, %c0_i32_0 : i32, i32, i32
  }
  func.func @transform_3(%arg0: i32) -> (i32, i32, i32) {
    %c0_i32 = arith.constant 0 : i32
    %c0_i32_0 = arith.constant 0 : i32
    %c0_i32_1 = arith.constant 0 : i32
    return %arg0, %c0_i32, %c0_i32_0 : i32, i32, i32
  }
}

module attributes {stable_mosaic.version = 11 : i64} {
  func.func @_proj_res_kernel(%arg0: i32, %arg1: i32, %arg2: memref<1x32x1024xf32, #tpu.memory_space<vmem>>, %arg3: memref<1x32x1024xbf16, #tpu.memory_space<vmem>>, %arg4: memref<32x32xbf16, #tpu.memory_space<vmem>>, %arg5: memref<32x1xf32, #tpu.memory_space<vmem>>, %arg6: memref<1x32x1024xf32, #tpu.memory_space<vmem>>) attributes {dimension_semantics = [#tpu.dimension_semantics<parallel>, #tpu.dimension_semantics<parallel>], iteration_bounds = array<i64: 2, 1>, scalar_prefetch = 0 : i64, scratch_operands = 0 : i64, tpu.core_type = #tpu.core_type<tc>, window_params = [{transform_indices = @transform_0, window_bounds = array<i64: 1, 32, 1024>}, {transform_indices = @transform_1, window_bounds = array<i64: 1, 32, 1024>}, {pipeline_mode = #tpu.pipeline_mode<synchronous>, transform_indices = @transform_2, window_bounds = array<i64: 32, 32>}, {pipeline_mode = #tpu.pipeline_mode<synchronous>, transform_indices = @transform_3, window_bounds = array<i64: 32, 1>}, {transform_indices = @transform_4, window_bounds = array<i64: 1, 32, 1024>}]} {
    %c0 = arith.constant 0 : index
    %c0_0 = arith.constant 0 : index
    %0 = vector.load %arg4[%c0, %c0_0] : memref<32x32xbf16, #tpu.memory_space<vmem>>, vector<32x32xbf16>
    %c0_1 = arith.constant 0 : index
    %c0_2 = arith.constant 0 : index
    %c0_3 = arith.constant 0 : index
    %1 = vector.load %arg3[%c0_1, %c0_2, %c0_3] : memref<1x32x1024xbf16, #tpu.memory_space<vmem>>, vector<1x32x1024xbf16>
    %2 = vector.shape_cast %1 : vector<1x32x1024xbf16> to vector<32x1024xbf16>
    %cst = arith.constant dense<0.000000e+00> : vector<32x1024xf32>
    %3 = tpu.matmul %0, %2, %cst {dimension_numbers = #tpu.dot_dimension_numbers<[1], [0], [0], [1], [0, 0, 1, 1], [], []>} : vector<32x32xbf16>, vector<32x1024xbf16>, vector<32x1024xf32> -> vector<32x1024xf32>
    %c0_4 = arith.constant 0 : index
    %c0_5 = arith.constant 0 : index
    %c0_6 = arith.constant 0 : index
    %4 = vector.load %arg2[%c0_4, %c0_5, %c0_6] : memref<1x32x1024xf32, #tpu.memory_space<vmem>>, vector<1x32x1024xf32>
    %5 = vector.shape_cast %4 : vector<1x32x1024xf32> to vector<32x1024xf32>
    %6 = arith.addf %5, %3 : vector<32x1024xf32>
    %c0_7 = arith.constant 0 : index
    %c0_8 = arith.constant 0 : index
    %7 = vector.load %arg5[%c0_7, %c0_8] : memref<32x1xf32, #tpu.memory_space<vmem>>, vector<32x1xf32>
    %8 = vector.broadcast %7 : vector<32x1xf32> to vector<32x1024xf32>
    %9 = arith.addf %6, %8 : vector<32x1024xf32>
    %c0_9 = arith.constant 0 : index
    %c0_10 = arith.constant 0 : index
    %c0_11 = arith.constant 0 : index
    %10 = vector.load %arg6[%c0_9, %c0_10, %c0_11] : memref<1x32x1024xf32, #tpu.memory_space<vmem>>, vector<1x32x1024xf32>
    %11 = vector.shape_cast %10 : vector<1x32x1024xf32> to vector<32x1024xf32>
    %12 = vector.shape_cast %9 : vector<32x1024xf32> to vector<1x32x1024xf32>
    tpu.vector_store %arg6[%c0_9, %c0_10, %c0_11], %12 {strides = array<i32>} : memref<1x32x1024xf32, #tpu.memory_space<vmem>>, vector<1x32x1024xf32>,
    return
  }
  func.func @transform_0(%arg0: i32, %arg1: i32) -> (i32, i32, i32) {
    %c0_i32 = arith.constant 0 : i32
    %c0_i32_0 = arith.constant 0 : i32
    return %arg0, %c0_i32, %arg1 : i32, i32, i32
  }
  func.func @transform_1(%arg0: i32, %arg1: i32) -> (i32, i32, i32) {
    %c0_i32 = arith.constant 0 : i32
    %c0_i32_0 = arith.constant 0 : i32
    return %arg0, %c0_i32, %arg1 : i32, i32, i32
  }
  func.func @transform_2(%arg0: i32, %arg1: i32) -> (i32, i32) {
    %c0_i32 = arith.constant 0 : i32
    %c0_i32_0 = arith.constant 0 : i32
    %c0_i32_1 = arith.constant 0 : i32
    return %c0_i32, %c0_i32_0 : i32, i32
  }
  func.func @transform_3(%arg0: i32, %arg1: i32) -> (i32, i32) {
    %c0_i32 = arith.constant 0 : i32
    %c0_i32_0 = arith.constant 0 : i32
    %c0_i32_1 = arith.constant 0 : i32
    return %c0_i32, %c0_i32_0 : i32, i32
  }
  func.func @transform_4(%arg0: i32, %arg1: i32) -> (i32, i32, i32) {
    %c0_i32 = arith.constant 0 : i32
    %c0_i32_0 = arith.constant 0 : i32
    return %arg0, %c0_i32, %arg1 : i32, i32, i32
  }
}

</mosaic_0001>

<bundles_post_ra>
// kernel: attn_block_3d.4
= control target key start
LH: loop header
LB: loop body
LE: loop exit
PB: predicated region body
PF: predicated region fallthrough
CT: control target
= control target key end

     0   :  { %s640_s9 = smov 0   ;;  %s642_s10 = smov 0   ;;  %s878_s0 = inlined_call_operand.vmem [shape: f32[2,32,1024], index: 0, kind: input, shape index: {}]   ;;  %s879_s1 = inlined_call_operand.vmem [shape: f32[2,32,1], index: 1, kind: output, shape index: {0}]   ;;  %s880_s2 = inlined_call_operand.vmem [shape: f32[2,32,1], index: 2, kind: output, shape index: {1}]  }
   0x1   :  { %s644_s11 = smov 0  }
   0x2 LB: > { %s25_s12 = sadd.s32 1, %s619_s10  ;;  %p565_p0 = scmp.ge.s32.totalorder %s623_s11, 1  ;;  %s623_s11 = sphi %s644_s11, %s13_s11   ;;  %s619_s10 = sphi %s642_s10, %s882_s10   ;;  %s615_s9 = sphi %s640_s9, %s881_s9  }
   0x3   : > { %p27_p1 = scmp.ge.s32.totalorder %s25_s12, 2  ;;  %p134_p2 = scmp.lt.s32.totalorder %s623_s11, 3 }
   0x5   : > { %s884_s12 = smov (%p27_p1, %s25_s12), 0  ;;  %p135_p3 = pnand %p565_p0, %p134_p2 }
   0x6   : > { %p166_p4 = scmp.lt.s32.totalorder (!%p135_p3), %s615_s9, 1 }
   0x7   : > { %138 = sbr.rel (%p135_p3) target bundleno = 296 (0x128), region = 24 }
   0xc   : > { %s886_s9 = smov (!%p166_p4, %s615_s9), 1  ;;  %vm361_vm0 = vcmask 7168  }
   0xd   : > { %s574_s13 = sshll.u32 %s886_s9, 8  ;;  %s575_s17 = sshll.u32 %s886_s9, 5 }
   0xe   : > { %s664_s16 = scalar_lea.vmem %s878_s0, %s574_s13  ;;  %s797_s20 = scalar_lea.vmem %s879_s1, %s575_s17 }
   0xf   : > { %v667_v0 = vld [vmem:[%s664_s16 + $0x80] sm:$0xff]  ;;  %v670_v1 = vld [vmem:[%s664_s16 + $0x88] sm:$0xff]  ;;  %v673_v2 = vld [vmem:[%s664_s16 + $0x90] sm:$0xff]  ;;  %s184_s23 = scalar_lea.vmem %s880_s2, %s575_s17 }
  0x10   : > { %v235_v3 = vadd.f32 %v670_v1, %v667_v0  ;;  %v678_v4 = vld [vmem:[%s664_s16 + $0x98] sm:$0xff]  ;;  %v681_v5 = vld [vmem:[%s664_s16] sm:$0xff]  ;;  %v685_v7 = vld [vmem:[%s664_s16 + $0x8] sm:$0xff] }
  0x11   : > { %v688_v8 = vld [vmem:[%s664_s16 + $0x10] sm:$0xff]  ;;  %v691_v9 = vld [vmem:[%s664_s16 + $0xa0] sm:$0xff]  ;;  %v217_v10 = vadd.f32 %v685_v7, %v681_v5  ;;  %v697_v12 = vld [vmem:[%s664_s16 + $0x18] sm:$0xff] }
  0x12   : > { %v236_v6 = vadd.f32 %v235_v3, %v673_v2  ;;  %v700_v13 = vld [vmem:[%s664_s16 + $0xc0] sm:$0xff]  ;;  %v703_v14 = vld [vmem:[%s664_s16 + $0xc8] sm:$0xff]  ;;  %v710_v17 = vld [vmem:[%s664_s16 + $0xd0] sm:$0xff] }
  0x13   : > { %v706_v15 = vld [vmem:[%s664_s16 + $0xa8] sm:$0xff]  ;;  %v218_v16 = vadd.f32 %v217_v10, %v688_v8  ;;  %v244_v18 = vadd.f32 %v703_v14, %v700_v13  ;;  %v715_v19 = vld [vmem:[%s664_s16 + $0xb0] sm:$0xff]  ;;  %v719_v21 = vld [vmem:[%s664_s16 + $0x20] sm:$0xff] }
  0x14   : > { %v237_v11 = vadd.f32 %v236_v6, %v678_v4  ;;  %v722_v22 = vld [vmem:[%s664_s16 + $0xd8] sm:$0xff]  ;;  %v727_v25 = vld [vmem:[%s664_s16 + $0x40] sm:$0xff]  ;;  %v730_v26 = vld [vmem:[%s664_s16 + $0x48] sm:$0xff] }
  0x15   : > { %v219_v23 = vadd.f32 %v218_v16, %v697_v12  ;;  %v245_v24 = vadd.f32 %v244_v18, %v710_v17  ;;  %v733_v27 = vld [vmem:[%s664_s16 + $0x50] sm:$0xff]  ;;  %v737_v29 = vld [vmem:[%s664_s16 + $0x28] sm:$0xff]  ;;  %v740_v30 = vld [vmem:[%s664_s16 + $0xe0] sm:$0xff]  ;;  %v226_v31 = vadd.f32 %v730_v26, %v727_v25 }
  0x16   : > { %v238_v20 = vadd.f32 %v237_v11, %v691_v9  ;;  %v208_v32 = vld [vmem:[%s664_s16 + $0xb8] sm:$0xff]  ;;  %v752_v37 = vld [vmem:[%s664_s16 + $0x30] sm:$0xff]  ;;  %v755_v38 = vld [vmem:[%s664_s16 + $0xe8] sm:$0xff] }
  0x17   : > { %v220_v33 = vadd.f32 %v219_v23, %v719_v21  ;;  %v246_v34 = vadd.f32 %v245_v24, %v722_v22  ;;  %v748_v35 = vld [vmem:[%s664_s16 + $0x58] sm:$0xff]  ;;  %v227_v39 = vadd.f32 %v226_v31, %v733_v27  ;;  %v761_v42 = vld [vmem:[%s664_s16 + $0x60] sm:$0xff]  ;;  %v767_v45 = vld [vmem:[%s664_s16 + $0xf0] sm:$0xff] }
  0x18   : > { %v239_v28 = vadd.f32 %v238_v20, %v706_v15  ;;  %v764_v44 = vld [vmem:[%s664_s16 + $0x38] sm:$0xff]  ;;  %v773_v49 = vld [vmem:[%s664_s16 + $0x68] sm:$0xff]  ;;  %v782_v54 = vld [vmem:[%s664_s16 + $0x70] sm:$0xff] }
  0x19   : > { %v221_v40 = vadd.f32 %v220_v33, %v737_v29  ;;  %v247_v41 = vadd.f32 %v246_v34, %v740_v30  ;;  %v228_v46 = vadd.f32 %v227_v39, %v748_v35  ;;  %v778_v52 = vld [vmem:[%s664_s16 + $0xf8] sm:$0xff] }
  0x1a   : > { %v240_v36 = vadd.f32 %v239_v28, %v715_v19  ;;  %v787_v57 = vld [vmem:[%s664_s16 + $0x78] sm:$0xff] }
  0x1b   : > { %v222_v47 = vadd.f32 %v221_v40, %v752_v37  ;;  %v248_v48 = vadd.f32 %v247_v41, %v755_v38  ;;  %v229_v50 = vadd.f32 %v228_v46, %v761_v42 }
  0x1c   : > { %v241_v43 = vadd.f32 %v240_v36, %v208_v32 }
  0x1d   : > { %v223_v51 = vadd.f32 %v222_v47, %v764_v44  ;;  %v249_v53 = vadd.f32 %v248_v48, %v767_v45  ;;  %v230_v55 = vadd.f32 %v229_v50, %v773_v49 }
  0x1e   : > { %242 = vadd.xlane.f32.xlu1 %v241_v43 }
  0x1f   : > { %224 = vadd.xlane.f32.xlu0 %v223_v51  ;;  %v250_v56 = vadd.f32 %v249_v53, %v778_v52  ;;  %v231_v58 = vadd.f32 %v230_v55, %v782_v54 }
  0x21   : > { %v232_v59 = vadd.f32 %v231_v58, %v787_v57 }
  0x26   : > { %251 = vadd.xlane.f32.xlu1 %v250_v56 }
  0x27   : > { %233 = vadd.xlane.f32.xlu0 %v232_v59 }
  0x91   : > { %v243_v60 = vpop.xlane.xlu1 %242 }
  0x92   : > { %v255_v61 = vmul.f32 0.0009765625, %v243_v60  ;;  %v225_v62 = vpop.xlane.xlu0 %224 }
  0x93   : > { %v253_v10 = vmul.f32 0.0009765625, %v225_v62 }
  0x94   : > { %v273_v63 = vsub.f32 %v667_v0, %v255_v61  ;;  %v274_v3 = vsub.f32 %v670_v1, %v255_v61  ;;  %v275_v6 = vsub.f32 %v673_v2, %v255_v61  ;;  %364 = vst.msk [vmem:[%s797_s20 + $0x10] sm:$0xff] %vm361_vm0, %v255_v61  ;;  %v276_v11 = vsub.f32 %v678_v4, %v255_v61 }
  0x95   : > { %v277_v20 = vsub.f32 %v691_v9, %v255_v61  ;;  %v278_v23 = vsub.f32 %v706_v15, %v255_v61  ;;  %362 = vst.msk [vmem:[%s797_s20] sm:$0xff] %vm361_vm0, %v253_v10  ;;  %v257_v0 = vsub.f32 %v681_v5, %v253_v10  ;;  %v258_v1 = vsub.f32 %v685_v7, %v253_v10 }
  0x96   : > { %v305_v16 = vmul.f32 %v273_v63, %v273_v63  ;;  %v306_v18 = vmul.f32 %v274_v3, %v274_v3  ;;  %v307_v24 = vmul.f32 %v275_v6, %v275_v6  ;;  %v259_v31 = vsub.f32 %v688_v8, %v253_v10 }
  0x97   : > { %v279_v4 = vsub.f32 %v715_v19, %v255_v61  ;;  %v308_v34 = vmul.f32 %v276_v11, %v276_v11  ;;  %v280_v36 = vsub.f32 %v208_v32, %v255_v61  ;;  %v260_v15 = vsub.f32 %v697_v12, %v253_v10 }
  0x98   : > { %v339_v28 = vadd.f32 %v306_v18, %v305_v16  ;;  %v289_v39 = vmul.f32 %v257_v0, %v257_v0  ;;  %v290_v40 = vmul.f32 %v258_v1, %v258_v1  ;;  %v309_v43 = vmul.f32 %v277_v20, %v277_v20 }
  0x99   : > { %v252_v2 = vpop.xlane.xlu1 %251  ;;  %v310_v5 = vmul.f32 %v278_v23, %v278_v23  ;;  %v261_v46 = vsub.f32 %v719_v21, %v253_v10  ;;  %v291_v19 = vmul.f32 %v259_v31, %v259_v31  ;;  %v262_v48 = vsub.f32 %v737_v29, %v253_v10 }
  0x9a   : > { %v812_v33 = vmul.f32 0.0009765625, %v252_v2  ;;  %v340_v9 = vadd.f32 %v339_v28, %v307_v24  ;;  %v234_v41 = vpop.xlane.xlu0 %233  ;;  %v321_v47 = vadd.f32 %v290_v40, %v289_v39  ;;  %v311_v21 = vmul.f32 %v279_v4, %v279_v4 }
  0x9b   : > { %v820_v8 = vmul.f32 0.0009765625, %v234_v41  ;;  %v312_v53 = vmul.f32 %v280_v36, %v280_v36  ;;  %v292_v55 = vmul.f32 %v260_v15, %v260_v15  ;;  %v263_v59 = vsub.f32 %v752_v37, %v253_v10 }
  0x9c   : > { %v341_v7 = vadd.f32 %v340_v9, %v308_v34  ;;  %365 = vst.msk [vmem:[%s797_s20 + $0x18] sm:$0xff] %vm361_vm0, %v812_v33  ;;  %v281_v32 = vsub.f32 %v700_v13, %v812_v33  ;;  %v282_v50 = vsub.f32 %v703_v14, %v812_v33  ;;  %v283_v51 = vsub.f32 %v710_v17, %v812_v33 }
  0x9d   : > { %v322_v56 = vadd.f32 %v321_v47, %v291_v19  ;;  %363 = vst.msk [vmem:[%s797_s20 + $0x8] sm:$0xff] %vm361_vm0, %v820_v8  ;;  %v264_v29 = vsub.f32 %v764_v44, %v253_v10  ;;  %v293_v61 = vmul.f32 %v261_v46, %v261_v46  ;;  %v284_v14 = vsub.f32 %v722_v22, %v812_v33 }
  0x9e   : > { %v342_v12 = vadd.f32 %v341_v7, %v309_v43  ;;  %v313_v13 = vmul.f32 %v281_v32, %v281_v32  ;;  %v314_v60 = vmul.f32 %v282_v50, %v282_v50  ;;  %v294_v63 = vmul.f32 %v262_v48, %v262_v48 }
  0x9f   : > { %v323_v62 = vadd.f32 %v322_v56, %v292_v55  ;;  %v285_v3 = vsub.f32 %v740_v30, %v812_v33  ;;  %v315_v6 = vmul.f32 %v283_v51, %v283_v51  ;;  %v265_v37 = vsub.f32 %v727_v25, %v820_v8 }
  0xa0   : > { %v343_v58 = vadd.f32 %v342_v12, %v310_v5  ;;  %v348_v16 = vadd.f32 %v314_v60, %v313_v13  ;;  %v266_v18 = vsub.f32 %v730_v26, %v820_v8  ;;  %v295_v10 = vmul.f32 %v263_v59, %v263_v59 }
  0xa1   : > { %v324_v11 = vadd.f32 %v323_v62, %v293_v61  ;;  %v267_v20 = vsub.f32 %v733_v27, %v820_v8  ;;  %v286_v23 = vsub.f32 %v755_v38, %v812_v33  ;;  %v316_v24 = vmul.f32 %v284_v14, %v284_v14 }
  0xa2   : > { %v344_v17 = vadd.f32 %v343_v58, %v311_v21  ;;  %v349_v30 = vadd.f32 %v348_v16, %v315_v6  ;;  %v296_v28 = vmul.f32 %v264_v29, %v264_v29  ;;  %v268_v0 = vsub.f32 %v748_v35, %v820_v8 }
  0xa3   : > { %v325_v22 = vadd.f32 %v324_v11, %v294_v63  ;;  %v297_v25 = vmul.f32 %v265_v37, %v265_v37  ;;  %v298_v1 = vmul.f32 %v266_v18, %v266_v18  ;;  %v287_v26 = vsub.f32 %v767_v45, %v812_v33 }
  0xa4   : > { %v345_v44 = vadd.f32 %v344_v17, %v312_v53  ;;  %v317_v31 = vmul.f32 %v285_v3, %v285_v3  ;;  %v350_v4 = vadd.f32 %v349_v30, %v316_v24  ;;  %v269_v27 = vsub.f32 %v761_v42, %v820_v8 }
  0xa5   : > { %v326_v2 = vadd.f32 %v325_v22, %v295_v10  ;;  %v299_v34 = vmul.f32 %v267_v20, %v267_v20  ;;  %v330_v38 = vadd.f32 %v298_v1, %v297_v25  ;;  %v288_v36 = vsub.f32 %v778_v52, %v812_v33 }
  0xa6   : > { %346 = vadd.xlane.f32.xlu0 %v345_v44  ;;  %v318_v15 = vmul.f32 %v286_v23, %v286_v23  ;;  %v351_v39 = vadd.f32 %v350_v4, %v317_v31  ;;  %v270_v35 = vsub.f32 %v773_v49, %v820_v8  ;;  %v300_v40 = vmul.f32 %v268_v0, %v268_v0 }
  0xa7   : > { %v327_v9 = vadd.f32 %v326_v2, %v296_v28  ;;  %v331_v41 = vadd.f32 %v330_v38, %v299_v34  ;;  %v319_v45 = vmul.f32 %v287_v26, %v287_v26  ;;  %v271_v5 = vsub.f32 %v782_v54, %v820_v8 }
  0xa8   : > { %v352_v43 = vadd.f32 %v351_v39, %v318_v15  ;;  %v301_v42 = vmul.f32 %v269_v27, %v269_v27  ;;  %v320_v46 = vmul.f32 %v288_v36, %v288_v36  ;;  %v272_v52 = vsub.f32 %v787_v57, %v820_v8 }
  0xa9   : > { %328 = vadd.xlane.f32.xlu2 %v327_v9  ;;  %v332_v7 = vadd.f32 %v331_v41, %v300_v40  ;;  %v302_v33 = vmul.f32 %v270_v35, %v270_v35  ;;  %v303_v49 = vmul.f32 %v271_v5, %v271_v5 }
  0xaa   : > { %v353_v19 = vadd.f32 %v352_v43, %v319_v45  ;;  %v304_v48 = vmul.f32 %v272_v52, %v272_v52 }
  0xab   : > { %v333_v47 = vadd.f32 %v332_v7, %v301_v42 }
  0xac   : > { %v354_v32 = vadd.f32 %v353_v19, %v320_v46 }
  0xad   : > { %v334_v12 = vadd.f32 %v333_v47, %v302_v33 }
  0xae   : > { %355 = vadd.xlane.f32.xlu1 %v354_v32 }
  0xaf   : > { %v335_v50 = vadd.f32 %v334_v12, %v303_v49 }
  0xb1   : > { %v336_v51 = vadd.f32 %v335_v50, %v304_v48 }
  0xb3   : > { %337 = vadd.xlane.f32.xlu2 %v336_v51 }
 0x119   : > { %v347_v54 = vpop.xlane.xlu0 %346 }
 0x11a   : > { %368 = vst.msk [vmem:[%s184_s23 + $0x10] sm:$0xff] %vm361_vm0, %v347_v54 }
 0x11c   : > { %v329_v21 = vpop.xlane.xlu2 %328 }
 0x11d   : > { %366 = vst.msk [vmem:[%s184_s23] sm:$0xff] %vm361_vm0, %v329_v21 }
 0x121   : > { %v356_v57 = vpop.xlane.xlu1 %355 }
 0x122   : > { %369 = vst.msk [vmem:[%s184_s23 + $0x18] sm:$0xff] %vm361_vm0, %v356_v57 }
 0x126   : > { %v338_v8 = vpop.xlane.xlu2 %337 }
 0x127   : > { %367 = vst.msk [vmem:[%s184_s23 + $0x8] sm:$0xff] %vm361_vm0, %v338_v8 }
 0x128 PF: > { %s13_s11 = sadd.s32 1, %s623_s11   ;;  %s881_s9 = smov %s619_s10 }
 0x129   : > { %p10_p5 = scmp.ge.s32.totalorder %s13_s11, 4   ;;  %s882_s10 = smov %s884_s12 }
 0x12b   :  { %12 = sbr.rel (!%p10_p5) target bundleno = 2 (0x2), region = 74 }

// kernel: attn_block_3d.5
= control target key start
LH: loop header
LB: loop body
LE: loop exit
PB: predicated region body
PF: predicated region fallthrough
CT: control target
= control target key end

     0   :  { %s1678_s24 = smov 0   ;;  %s1680_s25 = smov 0   ;;  %s2177_s0 = inlined_call_operand.vmem [shape: f32[2,32,1024], index: 0, kind: input, shape index: {}]   ;;  %s2178_s1 = inlined_call_operand.vmem [shape: f32[2,32,1], index: 1, kind: input, shape index: {}]   ;;  %s2179_s2 = inlined_call_operand.vmem [shape: f32[2,32,1], index: 2, kind: input, shape index: {}]   ;;  %s2180_s3 = inlined_call_operand.vmem [shape: bf16[3,32,32], index: 3, kind: input, shape index: {}]   ;;  %s2181_s4 = inlined_call_operand.vmem [shape: f32[3,32,1], index: 4, kind: input, shape index: {}]   ;;  %s2182_s5 = inlined_call_operand.vmem [shape: bf16[2,32,1024], index: 5, kind: output, shape index: {0}]   ;;  %s2183_s6 = inlined_call_operand.vmem [shape: bf16[2,32,1024], index: 6, kind: output, shape index: {1}]   ;;  %s2184_s7 = inlined_call_operand.vmem [shape: bf16[2,32,1024], index: 7, kind: output, shape index: {2}]  }
   0x1   :  { %s1682_s26 = smov 0  }
   0x2 LB: > { %s30_s27 = sadd.s32 1, %s1631_s25  ;;  %p1470_p0 = scmp.ge.s32.totalorder %s1635_s26, 1  ;;  %s1635_s26 = sphi %s1682_s26, %s18_s26   ;;  %s1631_s25 = sphi %s1680_s25, %s2186_s25   ;;  %s1627_s24 = sphi %s1678_s24, %s2185_s24  }
   0x3   : > { %p32_p1 = scmp.ge.s32.totalorder %s30_s27, 2  ;;  %p287_p2 = scmp.lt.s32.totalorder %s1635_s26, 3 }
   0x5   : > { %s2188_s27 = smov (%p32_p1, %s30_s27), 0  ;;  %p288_p3 = pnand %p1470_p0, %p287_p2 }
   0x6   : > { %p356_p4 = scmp.lt.s32.totalorder (!%p288_p3), %s1627_s24, 1 }
   0x7   : > { %291 = sbr.rel (%p288_p3) target bundleno = 479 (0x1df), region = 40 }
   0xc   : > { %v1637_v0 = vmov 0   ;;  %s2190_s24 = smov (!%p356_p4, %s1627_s24), 1  ;;  %v570_v9 = vld [vmem:[%s2181_s4] sm:$0xff]  ;;  %v572_v10 = vld [vmem:[%s2181_s4 + $0x10] sm:$0xff]  ;;  %v571_v11 = vld [vmem:[%s2181_s4 + $0x8] sm:$0xff]  ;;  %vm604_vm0 = vcmask 261120  }
   0xd   : > { %1612 = vset.pattern.permute.xlu2 %v1637_v0  ;;  %1611 = vset.pattern.permute.xlu1 %v1637_v0  ;;  %s1574_s28 = sshll.u32 %s2190_s24, 5  ;;  %v573_v12 = vld [vmem:[%s2181_s4 + $0x18] sm:$0xff]  ;;  %v1512_v13 = vld [vmem:[%s2181_s4 + $0x28] sm:$0xff]  ;;  %v1511_v14 = vld [vmem:[%s2181_s4 + $0x20] sm:$0xff]  ;;  %s1573_s17 = sshll.u32 %s2190_s24, 8 }
   0xe   : > { %1610 = vset.pattern.permute.xlu0 %v1637_v0  ;;  %s374_s8 = scalar_lea.vmem %s2179_s2, %s1574_s28  ;;  %s369_s11 = scalar_lea.vmem %s2178_s1, %s1574_s28  ;;  %v1513_v15 = vld [vmem:[%s2181_s4 + $0x30] sm:$0xff]  ;;  %v1543_v16 = vld [vmem:[%s2181_s4 + $0x40] sm:$0xff]  ;;  %v1514_v17 = vld [vmem:[%s2181_s4 + $0x38] sm:$0xff] }
   0xf   : > { %v496_v1 = vld [vmem:[%s374_s8 + $0x10] sm:$0xff]  ;;  %v438_v3 = vld [vmem:[%s369_s11] sm:$0xff]  ;;  %v497_v4 = vld [vmem:[%s374_s8 + $0x18] sm:$0xff]  ;;  %s1745_s20 = scalar_lea.vmem %s2177_s0, %s1573_s17  ;;  %s1940_s10 = sshll.u32 %s2190_s24, 7 }
  0x10   : > { %v440_v2 = vld [vmem:[%s369_s11 + $0x10] sm:$0xff]  ;;  %510 = vperm.xlu1 %1611, %v496_v1   ;;  %444 = vperm.xlu2 %1612, %v438_v3   ;;  %v441_v5 = vld [vmem:[%s369_s11 + $0x18] sm:$0xff]  ;;  %v439_v6 = vld [vmem:[%s369_s11 + $0x8] sm:$0xff]  ;;  %s1953_s15 = scalar_lea.vmem %s2182_s5, %s1940_s10  ;;  %s2051_s19 = scalar_lea.vmem %s2183_s6, %s1940_s10 }
  0x11   : > { %454 = vperm.xlu0 %1610, %v440_v2   ;;  %v495_v7 = vld [vmem:[%s374_s8 + $0x8] sm:$0xff]  ;;  %v494_v8 = vld [vmem:[%s374_s8] sm:$0xff]  ;;  %v1546_v19 = vld [vmem:[%s2181_s4 + $0x58] sm:$0xff]  ;;  %s2113_s22 = scalar_lea.vmem %s2184_s7, %s1940_s10 }
  0x12   : > { %v1544_v18 = vld [vmem:[%s2181_s4 + $0x48] sm:$0xff]  ;;  %v1545_v20 = vld [vmem:[%s2181_s4 + $0x50] sm:$0xff]  ;;  %v422_v22 = vld [vmem:[%s1745_s20 + $0x80] sm:$0xff] }
  0x13   : > { %v423_v23 = vld [vmem:[%s1745_s20 + $0x88] sm:$0xff]  ;;  %v424_v24 = vld [vmem:[%s1745_s20 + $0x90] sm:$0xff]  ;;  %v406_v25 = vld [vmem:[%s1745_s20] sm:$0xff] }
  0x14   : > { %v407_v28 = vld [vmem:[%s1745_s20 + $0x8] sm:$0xff]  ;;  %v408_v29 = vld [vmem:[%s1745_s20 + $0x10] sm:$0xff]  ;;  %v409_v30 = vld [vmem:[%s1745_s20 + $0x18] sm:$0xff] }
  0x15   : > { %v425_v31 = vld [vmem:[%s1745_s20 + $0x98] sm:$0xff]  ;;  %v414_v32 = vld [vmem:[%s1745_s20 + $0x40] sm:$0xff]  ;;  %v411_v35 = vld [vmem:[%s1745_s20 + $0x28] sm:$0xff] }
  0x16   : > { %v410_v33 = vld [vmem:[%s1745_s20 + $0x20] sm:$0xff]  ;;  %v412_v36 = vld [vmem:[%s1745_s20 + $0x30] sm:$0xff]  ;;  %v413_v37 = vld [vmem:[%s1745_s20 + $0x38] sm:$0xff] }
  0x17   : > { %v426_v34 = vld [vmem:[%s1745_s20 + $0xa0] sm:$0xff]  ;;  %v415_v39 = vld [vmem:[%s1745_s20 + $0x48] sm:$0xff]  ;;  %v416_v41 = vld [vmem:[%s1745_s20 + $0x50] sm:$0xff] }
  0x18   : > { %515 = vperm.xlu1 %1611, %v497_v4   ;;  %449 = vperm.xlu2 %1612, %v439_v6   ;;  %v417_v43 = vld [vmem:[%s1745_s20 + $0x58] sm:$0xff]  ;;  %v427_v49 = vld [vmem:[%s1745_s20 + $0xa8] sm:$0xff]  ;;  %v428_v50 = vld [vmem:[%s1745_s20 + $0xb0] sm:$0xff] }
  0x19   : > { %459 = vperm.xlu0 %1610, %v441_v5   ;;  %v418_v51 = vld [vmem:[%s1745_s20 + $0x60] sm:$0xff]  ;;  %v431_v54 = vld [vmem:[%s1745_s20 + $0xc8] sm:$0xff]  ;;  %v432_v59 = vld [vmem:[%s1745_s20 + $0xd0] sm:$0xff] }
  0x1a   : > { %v430_v53 = vld [vmem:[%s1745_s20 + $0xc0] sm:$0xff]  ;;  %v433_v60 = vld [vmem:[%s1745_s20 + $0xd8] sm:$0xff]  ;;  %v435_v3 = vld [vmem:[%s1745_s20 + $0xe8] sm:$0xff] }
  0x1b   : > { %v434_v1 = vld [vmem:[%s1745_s20 + $0xe0] sm:$0xff]  ;;  %v436_v5 = vld [vmem:[%s1745_s20 + $0xf0] sm:$0xff] }
  0x20   : > { %505 = vperm.xlu1 %1611, %v495_v7   ;;  %576 = vperm.xlu2 %1612, %v570_v9   ;;  %v437_v7 = vld [vmem:[%s1745_s20 + $0xf8] sm:$0xff] }
  0x21   : > { %500 = vperm.xlu0 %1610, %v494_v8  }
  0x28   : > { %586 = vperm.xlu1 %1611, %v572_v10   ;;  %591 = vperm.xlu2 %1612, %v573_v12  }
  0x29   : > { %581 = vperm.xlu0 %1610, %v571_v11  }
  0x30   : > { %812 = vperm.xlu1 %1611, %v1512_v13   ;;  %817 = vperm.xlu2 %1612, %v1513_v15  }
  0x31   : > { %807 = vperm.xlu0 %1610, %v1511_v14  }
  0x38   : > { %1037 = vperm.xlu1 %1611, %v1543_v16   ;;  %1042 = vperm.xlu2 %1612, %v1544_v18  }
  0x39   : > { %822 = vperm.xlu0 %1610, %v1514_v17  }
  0x40   : > { %1052 = vperm.xlu1 %1611, %v1546_v19   ;;  %v429_v19 = vld [vmem:[%s1745_s20 + $0xb8] sm:$0xff] }
  0x41   : > { %1047 = vperm.xlu0 %1610, %v1545_v20   ;;  %v419_v20 = vld [vmem:[%s1745_s20 + $0x68] sm:$0xff] }
  0x6a   : > { %v445_v21 = vpop.permute.xlu2 %444 }
  0x6b   : > { %v1765_v38 = vmul.f32 %v445_v21, %v406_v25  ;;  %v1768_v40 = vmul.f32 %v445_v21, %v407_v28  ;;  %v1771_v42 = vmul.f32 %v445_v21, %v408_v29  ;;  %v1774_v44 = vmul.f32 %v445_v21, %v409_v30 }
  0x6c   : > { %v1785_v55 = vmul.f32 %v445_v21, %v410_v33  ;;  %v1787_v56 = vmul.f32 %v445_v21, %v411_v35  ;;  %v1789_v57 = vmul.f32 %v445_v21, %v412_v36  ;;  %v1791_v58 = vmul.f32 %v445_v21, %v413_v37 }
  0x72   : > { %v450_v52 = vpop.permute.xlu2 %449 }
  0x73   : > { %v470_v61 = vmul.f32 %v450_v52, %v414_v32  ;;  %v471_v62 = vmul.f32 %v450_v52, %v415_v39  ;;  %v472_v63 = vmul.f32 %v450_v52, %v416_v41  ;;  %v473_v0 = vmul.f32 %v450_v52, %v417_v43  ;;  %v421_v32 = vld [vmem:[%s1745_s20 + $0x78] sm:$0xff] }
  0x74   : > { %v474_v8 = vmul.f32 %v450_v52, %v418_v51  ;;  %v475_v36 = vmul.f32 %v450_v52, %v419_v20 }
  0x82   : > { %v1751_v26 = vpop.permute.xlu1 %510 }
  0x83   : > { %v1753_v27 = vpop.permute.xlu0 %454 }
  0x84   : > { %v478_v45 = vmul.f32 %v1753_v27, %v422_v22  ;;  %v479_v46 = vmul.f32 %v1753_v27, %v423_v23  ;;  %v480_v47 = vmul.f32 %v1753_v27, %v424_v24  ;;  %v481_v48 = vmul.f32 %v1753_v27, %v425_v31  ;;  %v420_v31 = vld [vmem:[%s1745_s20 + $0x70] sm:$0xff] }
  0x85   : > { %v482_v2 = vmul.f32 %v1753_v27, %v426_v34  ;;  %v483_v4 = vmul.f32 %v1753_v27, %v427_v49  ;;  %v484_v6 = vmul.f32 %v1753_v27, %v428_v50  ;;  %v485_v35 = vmul.f32 %v1753_v27, %v429_v19 }
  0x86   : > { %v534_v11 = vadd.f32 %v1751_v26, %v478_v45  ;;  %v535_v12 = vadd.f32 %v1751_v26, %v479_v46  ;;  %v536_v13 = vadd.f32 %v1751_v26, %v480_v47  ;;  %v537_v14 = vadd.f32 %v1751_v26, %v481_v48 }
  0x87   : > { %v538_v45 = vadd.f32 %v1751_v26, %v482_v2  ;;  %v539_v46 = vadd.f32 %v1751_v26, %v483_v4  ;;  %v476_v47 = vmul.f32 %v450_v52, %v420_v31  ;;  %v477_v48 = vmul.f32 %v450_v52, %v421_v32 }
  0x88   : > { %v540_v27 = vadd.f32 %v1751_v26, %v484_v6  ;;  %v541_v52 = vadd.f32 %v1751_v26, %v485_v35 }
  0x8a   : > { %v516_v9 = vpop.permute.xlu1 %515 }
  0x8b   : > { %v460_v10 = vpop.permute.xlu0 %459 }
  0x8c   : > { %v486_v15 = vmul.f32 %v460_v10, %v430_v53  ;;  %v487_v16 = vmul.f32 %v460_v10, %v431_v54  ;;  %v488_v17 = vmul.f32 %v460_v10, %v432_v59  ;;  %v489_v18 = vmul.f32 %v460_v10, %v433_v60 }
  0x8d   : > { %v490_v21 = vmul.f32 %v460_v10, %v434_v1  ;;  %v491_v22 = vmul.f32 %v460_v10, %v435_v3  ;;  %v492_v23 = vmul.f32 %v460_v10, %v436_v5  ;;  %v493_v24 = vmul.f32 %v460_v10, %v437_v7 }
  0x8e   : > { %v542_v25 = vadd.f32 %v516_v9, %v486_v15  ;;  %v543_v28 = vadd.f32 %v516_v9, %v487_v16  ;;  %v544_v29 = vadd.f32 %v516_v9, %v488_v17  ;;  %v545_v30 = vadd.f32 %v516_v9, %v489_v18  ;;  %v1581_v15 = vld [vmem:[%s2180_s3 + $0x10] sm:$0xff]  ;;  %v1582_v16 = vld [vmem:[%s2180_s3 + $0x18] sm:$0xff]  ;;  %v1937_v17 = vpop.permute.xlu2 %576  ;;  %v1945_v18 = vld [vmem:[%s2180_s3 + $0x20] sm:$0xff] }
  0x8f   : > { %v546_v33 = vadd.f32 %v516_v9, %v490_v21  ;;  %v547_v34 = vadd.f32 %v516_v9, %v491_v22  ;;  %v548_v49 = vadd.f32 %v516_v9, %v492_v23  ;;  %v549_v50 = vadd.f32 %v516_v9, %v493_v24 }
  0x90   : > { %v1811_v37 = vpack.c.bf16 %v542_v25, %v534_v11  ;;  %v1813_v39 = vpack.c.bf16 %v543_v28, %v535_v12  ;;  %v1815_v41 = vpack.c.bf16 %v544_v29, %v536_v13  ;;  %v1817_v43 = vpack.c.bf16 %v545_v30, %v537_v14  ;;  %v1580_v14 = vld [vmem:[%s2180_s3 + $0x8] sm:$0xff] }
  0x91   : > { %v1826_v54 = vpack.c.bf16 %v546_v33, %v538_v45  ;;  %v1828_v59 = vpack.c.bf16 %v547_v34, %v539_v46  ;;  %v1839_v11 = vpack.c.bf16 %v548_v49, %v540_v27  ;;  %v1841_v12 = vpack.c.bf16 %v549_v50, %v541_v52 }
  0x92   : > { %617 = vmatpush.bf16.msra.mxu0 %v1811_v37  ;;  %636 = vmatpush.bf16.msra.mxu1 %v1813_v39  ;;  %v506_v51 = vpop.permute.xlu1 %505 }
  0x93   : > { %655 = vmatpush.bf16.msra.mxu2 %v1815_v41  ;;  %674 = vmatpush.bf16.msra.mxu3 %v1817_v43  ;;  %v501_v53 = vpop.permute.xlu0 %500  ;;  %v526_v1 = vadd.f32 %v506_v51, %v470_v61  ;;  %v527_v3 = vadd.f32 %v506_v51, %v471_v62  ;;  %v528_v5 = vadd.f32 %v506_v51, %v472_v63 }
  0x94   : > { %v518_v60 = vadd.f32 %v501_v53, %v1765_v38  ;;  %v519_v2 = vadd.f32 %v501_v53, %v1768_v40  ;;  %v520_v4 = vadd.f32 %v501_v53, %v1771_v42  ;;  %v521_v6 = vadd.f32 %v501_v53, %v1774_v44  ;;  %v1579_v42 = vld [vmem:[%s2180_s3] sm:$0xff] }
  0x95   : > { %v529_v7 = vadd.f32 %v506_v51, %v473_v0  ;;  %v522_v40 = vadd.f32 %v501_v53, %v1785_v55  ;;  %v530_v61 = vadd.f32 %v506_v51, %v474_v8  ;;  %v523_v44 = vadd.f32 %v501_v53, %v1787_v56 }
  0x96   : > { %v1835_v9 = vpack.c.bf16 %v526_v1, %v518_v60  ;;  %v1837_v10 = vpack.c.bf16 %v527_v3, %v519_v2  ;;  %v1843_v26 = vpack.c.bf16 %v528_v5, %v520_v4  ;;  %v531_v62 = vadd.f32 %v506_v51, %v475_v36 }
  0x97   : > { %v1845_v38 = vpack.c.bf16 %v529_v7, %v521_v6  ;;  %v524_v63 = vadd.f32 %v501_v53, %v1789_v57  ;;  %v532_v55 = vadd.f32 %v506_v51, %v476_v47  ;;  %v525_v0 = vadd.f32 %v501_v53, %v1791_v58  ;;  %v1993_v53 = vpop.permute.xlu2 %591 }
  0x98   : > { %618 = vmatpush.bf16.msra.mxu0 %v1835_v9  ;;  %637 = vmatpush.bf16.msra.mxu1 %v1837_v10  ;;  %v533_v8 = vadd.f32 %v506_v51, %v477_v48  ;;  %v1864_v56 = vpack.c.bf16 %v530_v61, %v522_v40  ;;  %v1866_v57 = vpack.c.bf16 %v531_v62, %v523_v44 }
  0x99   : > { %656 = vmatpush.bf16.msra.mxu2 %v1843_v26  ;;  %675 = vmatpush.bf16.msra.mxu3 %v1845_v38  ;;  %v556_v58 = vpack.c.bf16 %v532_v55, %v524_v63 }
  0x9a   : > { %v557_v13 = vpack.c.bf16 %v533_v8, %v525_v0 }
  0x9b   : > { %1491 = vmatmul.msk.bf16.vlgmr.msra.gmra.mxu0 %vm604_vm0, %v1579_v42  ;;  %1493 = vmatmul.msk.bf16.vlgmr.msra.gmra.mxu1 %vm604_vm0, %v1579_v42  ;;  %v1964_v24 = vpop.permute.xlu0 %581 }
  0x9c   : > { %693 = vmatpush.bf16.msrb.mxu0 %v1826_v54  ;;  %712 = vmatpush.bf16.msrb.mxu1 %v1828_v59 }
  0x9d   : > { %731 = vmatpush.bf16.msrb.mxu2 %v1839_v11  ;;  %750 = vmatpush.bf16.msrb.mxu3 %v1841_v12 }
  0x9e   : > { %1495 = vmatmul.msk.bf16.vlgmr.msra.gmra.mxu2 %vm604_vm0, %v1579_v42  ;;  %1497 = vmatmul.msk.bf16.vlgmr.msra.gmra.mxu3 %vm604_vm0, %v1579_v42 }
  0xa0   : > { %694 = vmatpush.bf16.msrb.mxu0 %v1864_v56  ;;  %713 = vmatpush.bf16.msrb.mxu1 %v1866_v57 }
  0xa1   : > { %732 = vmatpush.bf16.msrb.mxu2 %v556_v58  ;;  %751 = vmatpush.bf16.msrb.mxu3 %v557_v13 }
  0xa4   : > { %847 = vmatpush.bf16.msra.mxu0 %v1811_v37  ;;  %866 = vmatpush.bf16.msra.mxu1 %v1813_v39 }
  0xa5   : > { %885 = vmatpush.bf16.msra.mxu2 %v1815_v41  ;;  %904 = vmatpush.bf16.msra.mxu3 %v1817_v43 }
  0xa8   : > { %848 = vmatpush.bf16.msra.mxu0 %v1835_v9  ;;  %867 = vmatpush.bf16.msra.mxu1 %v1837_v10 }
  0xa9   : > { %886 = vmatpush.bf16.msra.mxu2 %v1843_v26  ;;  %905 = vmatpush.bf16.msra.mxu3 %v1845_v38 }
  0xab   : > { %1492 = vmatmul.msk.bf16.gmra.mxu0 %vm604_vm0, %v1580_v14  ;;  %1494 = vmatmul.msk.bf16.gmra.mxu1 %vm604_vm0, %v1580_v14 }
  0xae   : > { %1496 = vmatmul.msk.bf16.gmra.mxu2 %vm604_vm0, %v1580_v14  ;;  %1498 = vmatmul.msk.bf16.gmra.mxu3 %vm604_vm0, %v1580_v14 }
  0xbb   : > { %1499 = vmatmul.msk.bf16.vlgmr.msrb.gmra.mxu0 %vm604_vm0, %v1579_v42  ;;  %1501 = vmatmul.msk.bf16.vlgmr.msrb.gmra.mxu1 %vm604_vm0, %v1579_v42 }
  0xbc   : > { %923 = vmatpush.bf16.msrb.mxu0 %v1826_v54  ;;  %942 = vmatpush.bf16.msrb.mxu1 %v1828_v59 }
  0xbe   : > { %1503 = vmatmul.msk.bf16.vlgmr.msrb.gmra.mxu2 %vm604_vm0, %v1579_v42  ;;  %1505 = vmatmul.msk.bf16.vlgmr.msrb.gmra.mxu3 %vm604_vm0, %v1579_v42 }
  0xbf   : > { %961 = vmatpush.bf16.msrb.mxu2 %v1839_v11  ;;  %980 = vmatpush.bf16.msrb.mxu3 %v1841_v12 }
  0xc0   : > { %924 = vmatpush.bf16.msrb.mxu0 %v1864_v56  ;;  %943 = vmatpush.bf16.msrb.mxu1 %v1866_v57 }
  0xc3   : > { %962 = vmatpush.bf16.msrb.mxu2 %v556_v58  ;;  %981 = vmatpush.bf16.msrb.mxu3 %v557_v13 }
  0xcb   : > { %1500 = vmatmul.msk.bf16.gmra.mxu0 %vm604_vm0, %v1580_v14  ;;  %1502 = vmatmul.msk.bf16.gmra.mxu1 %vm604_vm0, %v1580_v14 }
  0xce   : > { %1504 = vmatmul.msk.bf16.gmra.mxu2 %vm604_vm0, %v1580_v14  ;;  %1506 = vmatmul.msk.bf16.gmra.mxu3 %vm604_vm0, %v1580_v14 }
  0xdb   : > { %1523 = vmatmul.msk.bf16.vlgmr.msra.gmra.mxu0 %vm604_vm0, %v1581_v15  ;;  %1525 = vmatmul.msk.bf16.vlgmr.msra.gmra.mxu1 %vm604_vm0, %v1581_v15 }
  0xdc   : > { %1077 = vmatpush.bf16.msra.mxu0 %v1811_v37  ;;  %1096 = vmatpush.bf16.msra.mxu1 %v1813_v39  ;;  %v1972_v37 = vpop.permute.xlu1 %586 }
  0xde   : > { %1527 = vmatmul.msk.bf16.vlgmr.msra.gmra.mxu2 %vm604_vm0, %v1581_v15  ;;  %1529 = vmatmul.msk.bf16.vlgmr.msra.gmra.mxu3 %vm604_vm0, %v1581_v15 }
  0xdf   : > { %1115 = vmatpush.bf16.msra.mxu2 %v1815_v41  ;;  %1134 = vmatpush.bf16.msra.mxu3 %v1817_v43  ;;  %v1977_v43 = vld [vmem:[%s2180_s3 + $0x28] sm:$0xff] }
  0xe0   : > { %1078 = vmatpush.bf16.msra.mxu0 %v1835_v9  ;;  %1097 = vmatpush.bf16.msra.mxu1 %v1837_v10 }
  0xe3   : > { %1116 = vmatpush.bf16.msra.mxu2 %v1843_v26  ;;  %1135 = vmatpush.bf16.msra.mxu3 %v1845_v38 }
  0xeb   : > { %1524 = vmatmul.msk.bf16.gmra.mxu0 %vm604_vm0, %v1582_v16  ;;  %1526 = vmatmul.msk.bf16.gmra.mxu1 %vm604_vm0, %v1582_v16 }
  0xee   : > { %1528 = vmatmul.msk.bf16.gmra.mxu2 %vm604_vm0, %v1582_v16  ;;  %1530 = vmatmul.msk.bf16.gmra.mxu3 %vm604_vm0, %v1582_v16 }
  0xfb   : > { %1531 = vmatmul.msk.bf16.vlgmr.msrb.gmra.mxu0 %vm604_vm0, %v1581_v15  ;;  %1533 = vmatmul.msk.bf16.vlgmr.msrb.gmra.mxu1 %vm604_vm0, %v1581_v15 }
  0xfc   : > { %1153 = vmatpush.bf16.msrb.mxu0 %v1826_v54  ;;  %1172 = vmatpush.bf16.msrb.mxu1 %v1828_v59 }
  0xfe   : > { %1535 = vmatmul.msk.bf16.vlgmr.msrb.gmra.mxu2 %vm604_vm0, %v1581_v15  ;;  %1537 = vmatmul.msk.bf16.vlgmr.msrb.gmra.mxu3 %vm604_vm0, %v1581_v15 }
  0xff   : > { %1191 = vmatpush.bf16.msrb.mxu2 %v1839_v11  ;;  %1210 = vmatpush.bf16.msrb.mxu3 %v1841_v12 }
 0x100   : > { %1154 = vmatpush.bf16.msrb.mxu0 %v1864_v56  ;;  %1173 = vmatpush.bf16.msrb.mxu1 %v1866_v57 }
 0x103   : > { %1192 = vmatpush.bf16.msrb.mxu2 %v556_v58  ;;  %1211 = vmatpush.bf16.msrb.mxu3 %v557_v13 }
 0x10b   : > { %1532 = vmatmul.msk.bf16.gmra.mxu0 %vm604_vm0, %v1582_v16  ;;  %1534 = vmatmul.msk.bf16.gmra.mxu1 %vm604_vm0, %v1582_v16 }
 0x10e   : > { %1536 = vmatmul.msk.bf16.gmra.mxu2 %vm604_vm0, %v1582_v16  ;;  %1538 = vmatmul.msk.bf16.gmra.mxu3 %vm604_vm0, %v1582_v16 }
 0x118   : > { %v620_v19 = vpop.f32.mrf.mxu0  ;;  %v639_v20 = vpop.f32.mrf.mxu1 }
 0x119   : > { %v621_v21 = vadd.f32 %v620_v19, %v1937_v17  ;;  %v640_v22 = vadd.f32 %v639_v20, %v1937_v17 }
 0x11b   : > { %v763_v23 = vpack.c.bf16 %v640_v22, %v621_v21  ;;  %1555 = vmatmul.msk.bf16.vlgmr.msra.gmra.mxu0 %vm604_vm0, %v1945_v18  ;;  %1557 = vmatmul.msk.bf16.vlgmr.msra.gmra.mxu1 %vm604_vm0, %v1945_v18 }
 0x11d   : > { %779 = vst [vmem:[%s1953_s15] sm:$0xff] %v763_v23 }
 0x11e   : > { %1559 = vmatmul.msk.bf16.vlgmr.msra.gmra.mxu2 %vm604_vm0, %v1945_v18  ;;  %1561 = vmatmul.msk.bf16.vlgmr.msra.gmra.mxu3 %vm604_vm0, %v1945_v18 }
 0x120   : > { %v622_v31 = vpop.f32.mrf.mxu0  ;;  %v641_v32 = vpop.f32.mrf.mxu1 }
 0x121   : > { %v658_v25 = vpop.f32.mrf.mxu2  ;;  %v677_v28 = vpop.f32.mrf.mxu3  ;;  %v623_v33 = vadd.f32 %v622_v31, %v1964_v24  ;;  %v642_v34 = vadd.f32 %v641_v32, %v1964_v24 }
 0x122   : > { %v659_v29 = vadd.f32 %v658_v25, %v1937_v17  ;;  %v678_v30 = vadd.f32 %v677_v28, %v1937_v17 }
 0x123   : > { %v767_v36 = vpack.c.bf16 %v642_v34, %v623_v33 }
 0x124   : > { %v764_v35 = vpack.c.bf16 %v678_v30, %v659_v29 }
 0x125   : > { %783 = vst [vmem:[%s1953_s15 + $0x20] sm:$0xff] %v767_v36  ;;  %v2041_v36 = vpop.permute.xlu0 %807 }
 0x126   : > { %780 = vst [vmem:[%s1953_s15 + $0x8] sm:$0xff] %v764_v35 }
 0x128   : > { %v625_v47 = vpop.f32.mrf.mxu0  ;;  %v644_v48 = vpop.f32.mrf.mxu1 }
 0x129   : > { %v660_v39 = vpop.f32.mrf.mxu2  ;;  %v679_v41 = vpop.f32.mrf.mxu3  ;;  %v626_v27 = vadd.f32 %v625_v47, %v1972_v37  ;;  %v645_v49 = vadd.f32 %v644_v48, %v1972_v37 }
 0x12a   : > { %v661_v45 = vadd.f32 %v660_v39, %v1964_v24  ;;  %v680_v46 = vadd.f32 %v679_v41, %v1964_v24 }
 0x12b   : > { %v771_v51 = vpack.c.bf16 %v645_v49, %v626_v27  ;;  %1556 = vmatmul.msk.bf16.gmra.mxu0 %vm604_vm0, %v1977_v43  ;;  %1558 = vmatmul.msk.bf16.gmra.mxu1 %vm604_vm0, %v1977_v43 }
 0x12c   : > { %v768_v50 = vpack.c.bf16 %v680_v46, %v661_v45 }
 0x12d   : > { %787 = vst [vmem:[%s1953_s15 + $0x40] sm:$0xff] %v771_v51 }
 0x12e   : > { %784 = vst [vmem:[%s1953_s15 + $0x28] sm:$0xff] %v768_v50  ;;  %1560 = vmatmul.msk.bf16.gmra.mxu2 %vm604_vm0, %v1977_v43  ;;  %1562 = vmatmul.msk.bf16.gmra.mxu3 %vm604_vm0, %v1977_v43  ;;  %v2055_v50 = vpop.permute.xlu1 %812 }
 0x130   : > { %v627_v1 = vpop.f32.mrf.mxu0  ;;  %v646_v2 = vpop.f32.mrf.mxu1 }
 0x131   : > { %v663_v54 = vpop.f32.mrf.mxu2  ;;  %v682_v59 = vpop.f32.mrf.mxu3  ;;  %v628_v3 = vadd.f32 %v627_v1, %v1993_v53  ;;  %v647_v4 = vadd.f32 %v646_v2, %v1993_v53 }
 0x132   : > { %v664_v52 = vadd.f32 %v663_v54, %v1972_v37  ;;  %v683_v60 = vadd.f32 %v682_v59, %v1972_v37 }
 0x133   : > { %v775_v6 = vpack.c.bf16 %v647_v4, %v628_v3 }
 0x134   : > { %v772_v5 = vpack.c.bf16 %v683_v60, %v664_v52 }
 0x135   : > { %791 = vst [vmem:[%s1953_s15 + $0x60] sm:$0xff] %v775_v6 }
 0x136   : > { %788 = vst [vmem:[%s1953_s15 + $0x48] sm:$0xff] %v772_v5  ;;  %v2063_v5 = vpop.permute.xlu2 %817 }
 0x138   : > { %v696_v12 = vpop.f32.mrf.mxu0  ;;  %v715_v26 = vpop.f32.mrf.mxu1 }
 0x139   : > { %v665_v7 = vpop.f32.mrf.mxu2  ;;  %v684_v9 = vpop.f32.mrf.mxu3  ;;  %v697_v38 = vadd.f32 %v696_v12, %v1937_v17  ;;  %v716_v40 = vadd.f32 %v715_v26, %v1937_v17 }
 0x13a   : > { %v666_v10 = vadd.f32 %v665_v7, %v1993_v53  ;;  %v685_v11 = vadd.f32 %v684_v9, %v1993_v53 }
 0x13b   : > { %v765_v42 = vpack.c.bf16 %v716_v40, %v697_v38  ;;  %1563 = vmatmul.msk.bf16.vlgmr.msrb.gmra.mxu0 %vm604_vm0, %v1945_v18  ;;  %1565 = vmatmul.msk.bf16.vlgmr.msrb.gmra.mxu1 %vm604_vm0, %v1945_v18 }
 0x13c   : > { %v776_v61 = vpack.c.bf16 %v685_v11, %v666_v10 }
 0x13d   : > { %781 = vst [vmem:[%s1953_s15 + $0x10] sm:$0xff] %v765_v42  ;;  %v2071_v42 = vpop.permute.xlu0 %822 }
 0x13e   : > { %792 = vst [vmem:[%s1953_s15 + $0x68] sm:$0xff] %v776_v61  ;;  %1567 = vmatmul.msk.bf16.vlgmr.msrb.gmra.mxu2 %vm604_vm0, %v1945_v18  ;;  %1569 = vmatmul.msk.bf16.vlgmr.msrb.gmra.mxu3 %vm604_vm0, %v1945_v18 }
 0x140   : > { %v698_v0 = vpop.f32.mrf.mxu0  ;;  %v717_v8 = vpop.f32.mrf.mxu1 }
 0x141   : > { %v734_v44 = vpop.f32.mrf.mxu2  ;;  %v753_v62 = vpop.f32.mrf.mxu3  ;;  %v699_v56 = vadd.f32 %v698_v0, %v1964_v24  ;;  %v718_v57 = vadd.f32 %v717_v8, %v1964_v24 }
 0x142   : > { %v735_v63 = vadd.f32 %v734_v44, %v1937_v17  ;;  %v754_v55 = vadd.f32 %v753_v62, %v1937_v17 }
 0x143   : > { %v769_v13 = vpack.c.bf16 %v718_v57, %v699_v56 }
 0x144   : > { %v766_v58 = vpack.c.bf16 %v754_v55, %v735_v63 }
 0x145   : > { %785 = vst [vmem:[%s1953_s15 + $0x30] sm:$0xff] %v769_v13 }
 0x146   : > { %782 = vst [vmem:[%s1953_s15 + $0x18] sm:$0xff] %v766_v58 }
 0x148   : > { %v701_v19 = vpop.f32.mrf.mxu0  ;;  %v720_v17 = vpop.f32.mrf.mxu1 }
 0x149   : > { %v736_v14 = vpop.f32.mrf.mxu2  ;;  %v755_v15 = vpop.f32.mrf.mxu3  ;;  %v702_v20 = vadd.f32 %v701_v19, %v1972_v37  ;;  %v721_v21 = vadd.f32 %v720_v17, %v1972_v37 }
 0x14a   : > { %v737_v16 = vadd.f32 %v736_v14, %v1964_v24  ;;  %v756_v18 = vadd.f32 %v755_v15, %v1964_v24 }
 0x14b   : > { %v773_v23 = vpack.c.bf16 %v721_v21, %v702_v20  ;;  %1564 = vmatmul.msk.bf16.gmra.mxu0 %vm604_vm0, %v1977_v43  ;;  %1566 = vmatmul.msk.bf16.gmra.mxu1 %vm604_vm0, %v1977_v43 }
 0x14c   : > { %v770_v22 = vpack.c.bf16 %v756_v18, %v737_v16 }
 0x14d   : > { %789 = vst [vmem:[%s1953_s15 + $0x50] sm:$0xff] %v773_v23 }
 0x14e   : > { %786 = vst [vmem:[%s1953_s15 + $0x38] sm:$0xff] %v770_v22  ;;  %1568 = vmatmul.msk.bf16.gmra.mxu2 %vm604_vm0, %v1977_v43  ;;  %1570 = vmatmul.msk.bf16.gmra.mxu3 %vm604_vm0, %v1977_v43 }
 0x150   : > { %v703_v30 = vpop.f32.mrf.mxu0  ;;  %v722_v31 = vpop.f32.mrf.mxu1 }
 0x151   : > { %v739_v24 = vpop.f32.mrf.mxu2  ;;  %v758_v25 = vpop.f32.mrf.mxu3  ;;  %v704_v32 = vadd.f32 %v703_v30, %v1993_v53  ;;  %v723_v33 = vadd.f32 %v722_v31, %v1993_v53 }
 0x152   : > { %v740_v28 = vadd.f32 %v739_v24, %v1972_v37  ;;  %v759_v29 = vadd.f32 %v758_v25, %v1972_v37 }
 0x153   : > { %v777_v35 = vpack.c.bf16 %v723_v33, %v704_v32 }
 0x154   : > { %v774_v34 = vpack.c.bf16 %v759_v29, %v740_v28 }
 0x155   : > { %793 = vst [vmem:[%s1953_s15 + $0x70] sm:$0xff] %v777_v35 }
 0x156   : > { %790 = vst [vmem:[%s1953_s15 + $0x58] sm:$0xff] %v774_v34 }
 0x158   : > { %v850_v45 = vpop.f32.mrf.mxu0  ;;  %v869_v46 = vpop.f32.mrf.mxu1 }
 0x159   : > { %v741_v39 = vpop.f32.mrf.mxu2  ;;  %v760_v41 = vpop.f32.mrf.mxu3  ;;  %v851_v47 = vadd.f32 %v850_v45, %v2041_v36  ;;  %v870_v48 = vadd.f32 %v869_v46, %v2041_v36 }
 0x15a   : > { %v742_v43 = vadd.f32 %v741_v39, %v1993_v53  ;;  %v761_v37 = vadd.f32 %v760_v41, %v1993_v53 }
 0x15b   : > { %v993_v49 = vpack.c.bf16 %v870_v48, %v851_v47 }
 0x15c   : > { %v778_v27 = vpack.c.bf16 %v761_v37, %v742_v43 }
 0x15d   : > { %1009 = vst [vmem:[%s2051_s19] sm:$0xff] %v993_v49 }
 0x15e   : > { %794 = vst [vmem:[%s1953_s15 + $0x78] sm:$0xff] %v778_v27 }
 0x160   : > { %v852_v52 = vpop.f32.mrf.mxu0  ;;  %v871_v60 = vpop.f32.mrf.mxu1 }
 0x161   : > { %v888_v51 = vpop.f32.mrf.mxu2  ;;  %v907_v53 = vpop.f32.mrf.mxu3  ;;  %v853_v1 = vadd.f32 %v852_v52, %v2055_v50  ;;  %v872_v2 = vadd.f32 %v871_v60, %v2055_v50 }
 0x162   : > { %v889_v54 = vadd.f32 %v888_v51, %v2041_v36  ;;  %v908_v59 = vadd.f32 %v907_v53, %v2041_v36 }
 0x163   : > { %v997_v4 = vpack.c.bf16 %v872_v2, %v853_v1 }
 0x164   : > { %v994_v3 = vpack.c.bf16 %v908_v59, %v889_v54 }
 0x165   : > { %1013 = vst [vmem:[%s2051_s19 + $0x20] sm:$0xff] %v997_v4 }
 0x166   : > { %1010 = vst [vmem:[%s2051_s19 + $0x8] sm:$0xff] %v994_v3  ;;  %v2103_v3 = vpop.permute.xlu1 %1037 }
 0x168   : > { %v855_v11 = vpop.f32.mrf.mxu0  ;;  %v874_v12 = vpop.f32.mrf.mxu1 }
 0x169   : > { %v890_v6 = vpop.f32.mrf.mxu2  ;;  %v909_v7 = vpop.f32.mrf.mxu3  ;;  %v856_v26 = vadd.f32 %v855_v11, %v2063_v5  ;;  %v875_v38 = vadd.f32 %v874_v12, %v2063_v5 }
 0x16a   : > { %v891_v9 = vadd.f32 %v890_v6, %v2055_v50  ;;  %v910_v10 = vadd.f32 %v909_v7, %v2055_v50 }
 0x16b   : > { %v1001_v61 = vpack.c.bf16 %v875_v38, %v856_v26 }
 0x16c   : > { %v998_v40 = vpack.c.bf16 %v910_v10, %v891_v9 }
 0x16d   : > { %1017 = vst [vmem:[%s2051_s19 + $0x40] sm:$0xff] %v1001_v61 }
 0x16e   : > { %1014 = vst [vmem:[%s2051_s19 + $0x28] sm:$0xff] %v998_v40  ;;  %v2117_v40 = vpop.permute.xlu2 %1042 }
 0x170   : > { %v857_v0 = vpop.f32.mrf.mxu0  ;;  %v876_v8 = vpop.f32.mrf.mxu1 }
 0x171   : > { %v893_v44 = vpop.f32.mrf.mxu2  ;;  %v912_v62 = vpop.f32.mrf.mxu3  ;;  %v858_v56 = vadd.f32 %v857_v0, %v2071_v42  ;;  %v877_v57 = vadd.f32 %v876_v8, %v2071_v42 }
 0x172   : > { %v894_v63 = vadd.f32 %v893_v44, %v2063_v5  ;;  %v913_v55 = vadd.f32 %v912_v62, %v2063_v5 }
 0x173   : > { %v1005_v13 = vpack.c.bf16 %v877_v57, %v858_v56 }
 0x174   : > { %v1002_v58 = vpack.c.bf16 %v913_v55, %v894_v63 }
 0x175   : > { %1021 = vst [vmem:[%s2051_s19 + $0x60] sm:$0xff] %v1005_v13 }
 0x176   : > { %1018 = vst [vmem:[%s2051_s19 + $0x48] sm:$0xff] %v1002_v58  ;;  %v2125_v58 = vpop.permute.xlu0 %1047 }
 0x178   : > { %v926_v19 = vpop.f32.mrf.mxu0  ;;  %v945_v17 = vpop.f32.mrf.mxu1 }
 0x179   : > { %v895_v14 = vpop.f32.mrf.mxu2  ;;  %v914_v15 = vpop.f32.mrf.mxu3  ;;  %v927_v20 = vadd.f32 %v926_v19, %v2041_v36  ;;  %v946_v21 = vadd.f32 %v945_v17, %v2041_v36 }
 0x17a   : > { %v896_v16 = vadd.f32 %v895_v14, %v2071_v42  ;;  %v915_v18 = vadd.f32 %v914_v15, %v2071_v42 }
 0x17b   : > { %v995_v23 = vpack.c.bf16 %v946_v21, %v927_v20 }
 0x17c   : > { %v1006_v22 = vpack.c.bf16 %v915_v18, %v896_v16 }
 0x17d   : > { %1011 = vst [vmem:[%s2051_s19 + $0x10] sm:$0xff] %v995_v23  ;;  %v2133_v23 = vpop.permute.xlu1 %1052 }
 0x17e   : > { %1022 = vst [vmem:[%s2051_s19 + $0x68] sm:$0xff] %v1006_v22 }
 0x180   : > { %v928_v30 = vpop.f32.mrf.mxu0  ;;  %v947_v31 = vpop.f32.mrf.mxu1 }
 0x181   : > { %v964_v24 = vpop.f32.mrf.mxu2  ;;  %v983_v25 = vpop.f32.mrf.mxu3  ;;  %v929_v32 = vadd.f32 %v928_v30, %v2055_v50  ;;  %v948_v33 = vadd.f32 %v947_v31, %v2055_v50 }
 0x182   : > { %v965_v28 = vadd.f32 %v964_v24, %v2041_v36  ;;  %v984_v29 = vadd.f32 %v983_v25, %v2041_v36 }
 0x183   : > { %v999_v35 = vpack.c.bf16 %v948_v33, %v929_v32 }
 0x184   : > { %v996_v34 = vpack.c.bf16 %v984_v29, %v965_v28 }
 0x185   : > { %1015 = vst [vmem:[%s2051_s19 + $0x30] sm:$0xff] %v999_v35 }
 0x186   : > { %1012 = vst [vmem:[%s2051_s19 + $0x18] sm:$0xff] %v996_v34 }
 0x188   : > { %v931_v45 = vpop.f32.mrf.mxu0  ;;  %v950_v36 = vpop.f32.mrf.mxu1 }
 0x189   : > { %v966_v39 = vpop.f32.mrf.mxu2  ;;  %v985_v41 = vpop.f32.mrf.mxu3  ;;  %v932_v46 = vadd.f32 %v931_v45, %v2063_v5  ;;  %v951_v47 = vadd.f32 %v950_v36, %v2063_v5 }
 0x18a   : > { %v967_v43 = vadd.f32 %v966_v39, %v2055_v50  ;;  %v986_v37 = vadd.f32 %v985_v41, %v2055_v50 }
 0x18b   : > { %v1003_v27 = vpack.c.bf16 %v951_v47, %v932_v46 }
 0x18c   : > { %v1000_v48 = vpack.c.bf16 %v986_v37, %v967_v43 }
 0x18d   : > { %1019 = vst [vmem:[%s2051_s19 + $0x50] sm:$0xff] %v1003_v27 }
 0x18e   : > { %1016 = vst [vmem:[%s2051_s19 + $0x38] sm:$0xff] %v1000_v48 }
 0x190   : > { %v933_v59 = vpop.f32.mrf.mxu0  ;;  %v952_v50 = vpop.f32.mrf.mxu1 }
 0x191   : > { %v969_v49 = vpop.f32.mrf.mxu2  ;;  %v988_v51 = vpop.f32.mrf.mxu3  ;;  %v934_v52 = vadd.f32 %v933_v59, %v2071_v42  ;;  %v953_v60 = vadd.f32 %v952_v50, %v2071_v42 }
 0x192   : > { %v970_v53 = vadd.f32 %v969_v49, %v2063_v5  ;;  %v989_v54 = vadd.f32 %v988_v51, %v2063_v5 }
 0x193   : > { %v1007_v2 = vpack.c.bf16 %v953_v60, %v934_v52 }
 0x194   : > { %v1004_v1 = vpack.c.bf16 %v989_v54, %v970_v53 }
 0x195   : > { %1023 = vst [vmem:[%s2051_s19 + $0x70] sm:$0xff] %v1007_v2 }
 0x196   : > { %1020 = vst [vmem:[%s2051_s19 + $0x58] sm:$0xff] %v1004_v1 }
 0x198   : > { %v1080_v9 = vpop.f32.mrf.mxu0  ;;  %v1099_v10 = vpop.f32.mrf.mxu1 }
 0x199   : > { %v971_v4 = vpop.f32.mrf.mxu2  ;;  %v990_v6 = vpop.f32.mrf.mxu3  ;;  %v1081_v11 = vadd.f32 %v1080_v9, %v2103_v3  ;;  %v1100_v12 = vadd.f32 %v1099_v10, %v2103_v3 }
 0x19a   : > { %v972_v7 = vadd.f32 %v971_v4, %v2071_v42  ;;  %v991_v5 = vadd.f32 %v990_v6, %v2071_v42 }
 0x19b   : > { %v1223_v38 = vpack.c.bf16 %v1100_v12, %v1081_v11 }
 0x19c   : > { %v1008_v26 = vpack.c.bf16 %v991_v5, %v972_v7 }
 0x19d   : > { %1239 = vst [vmem:[%s2113_s22] sm:$0xff] %v1223_v38 }
 0x19e   : > { %1024 = vst [vmem:[%s2051_s19 + $0x78] sm:$0xff] %v1008_v26 }
 0x1a0   : > { %v1082_v63 = vpop.f32.mrf.mxu0  ;;  %v1101_v55 = vpop.f32.mrf.mxu1 }
 0x1a1   : > { %v1118_v61 = vpop.f32.mrf.mxu2  ;;  %v1137_v42 = vpop.f32.mrf.mxu3  ;;  %v1083_v0 = vadd.f32 %v1082_v63, %v2117_v40  ;;  %v1102_v8 = vadd.f32 %v1101_v55, %v2117_v40 }
 0x1a2   : > { %v1119_v44 = vadd.f32 %v1118_v61, %v2103_v3  ;;  %v1138_v62 = vadd.f32 %v1137_v42, %v2103_v3 }
 0x1a3   : > { %v1227_v57 = vpack.c.bf16 %v1102_v8, %v1083_v0 }
 0x1a4   : > { %v1224_v56 = vpack.c.bf16 %v1138_v62, %v1119_v44 }
 0x1a5   : > { %1243 = vst [vmem:[%s2113_s22 + $0x20] sm:$0xff] %v1227_v57 }
 0x1a6   : > { %1240 = vst [vmem:[%s2113_s22 + $0x8] sm:$0xff] %v1224_v56 }
 0x1a8   : > { %v1085_v18 = vpop.f32.mrf.mxu0  ;;  %v1104_v19 = vpop.f32.mrf.mxu1 }
 0x1a9   : > { %v1120_v13 = vpop.f32.mrf.mxu2  ;;  %v1139_v14 = vpop.f32.mrf.mxu3  ;;  %v1086_v17 = vadd.f32 %v1085_v18, %v2125_v58  ;;  %v1105_v20 = vadd.f32 %v1104_v19, %v2125_v58 }
 0x1aa   : > { %v1121_v15 = vadd.f32 %v1120_v13, %v2117_v40  ;;  %v1140_v16 = vadd.f32 %v1139_v14, %v2117_v40 }
 0x1ab   : > { %v1231_v22 = vpack.c.bf16 %v1105_v20, %v1086_v17 }
 0x1ac   : > { %v1228_v21 = vpack.c.bf16 %v1140_v16, %v1121_v15 }
 0x1ad   : > { %1247 = vst [vmem:[%s2113_s22 + $0x40] sm:$0xff] %v1231_v22 }
 0x1ae   : > { %1244 = vst [vmem:[%s2113_s22 + $0x28] sm:$0xff] %v1228_v21 }
 0x1b0   : > { %v1087_v30 = vpop.f32.mrf.mxu0  ;;  %v1106_v31 = vpop.f32.mrf.mxu1 }
 0x1b1   : > { %v1123_v24 = vpop.f32.mrf.mxu2  ;;  %v1142_v25 = vpop.f32.mrf.mxu3  ;;  %v1088_v32 = vadd.f32 %v1087_v30, %v2133_v23  ;;  %v1107_v33 = vadd.f32 %v1106_v31, %v2133_v23 }
 0x1b2   : > { %v1124_v28 = vadd.f32 %v1123_v24, %v2125_v58  ;;  %v1143_v29 = vadd.f32 %v1142_v25, %v2125_v58 }
 0x1b3   : > { %v1235_v35 = vpack.c.bf16 %v1107_v33, %v1088_v32 }
 0x1b4   : > { %v1232_v34 = vpack.c.bf16 %v1143_v29, %v1124_v28 }
 0x1b5   : > { %1251 = vst [vmem:[%s2113_s22 + $0x60] sm:$0xff] %v1235_v35 }
 0x1b6   : > { %1248 = vst [vmem:[%s2113_s22 + $0x48] sm:$0xff] %v1232_v34 }
 0x1b8   : > { %v1156_v45 = vpop.f32.mrf.mxu0  ;;  %v1175_v36 = vpop.f32.mrf.mxu1 }
 0x1b9   : > { %v1125_v39 = vpop.f32.mrf.mxu2  ;;  %v1144_v41 = vpop.f32.mrf.mxu3  ;;  %v1157_v46 = vadd.f32 %v1156_v45, %v2103_v3  ;;  %v1176_v47 = vadd.f32 %v1175_v36, %v2103_v3 }
 0x1ba   : > { %v1126_v43 = vadd.f32 %v1125_v39, %v2133_v23  ;;  %v1145_v37 = vadd.f32 %v1144_v41, %v2133_v23 }
 0x1bb   : > { %v1225_v27 = vpack.c.bf16 %v1176_v47, %v1157_v46 }
 0x1bc   : > { %v1236_v48 = vpack.c.bf16 %v1145_v37, %v1126_v43 }
 0x1bd   : > { %1241 = vst [vmem:[%s2113_s22 + $0x10] sm:$0xff] %v1225_v27 }
 0x1be   : > { %1252 = vst [vmem:[%s2113_s22 + $0x68] sm:$0xff] %v1236_v48 }
 0x1c0   : > { %v1158_v59 = vpop.f32.mrf.mxu0  ;;  %v1177_v50 = vpop.f32.mrf.mxu1 }
 0x1c1   : > { %v1194_v49 = vpop.f32.mrf.mxu2  ;;  %v1213_v51 = vpop.f32.mrf.mxu3  ;;  %v1159_v52 = vadd.f32 %v1158_v59, %v2117_v40  ;;  %v1178_v60 = vadd.f32 %v1177_v50, %v2117_v40 }
 0x1c2   : > { %v1195_v53 = vadd.f32 %v1194_v49, %v2103_v3  ;;  %v1214_v54 = vadd.f32 %v1213_v51, %v2103_v3 }
 0x1c3   : > { %v1229_v2 = vpack.c.bf16 %v1178_v60, %v1159_v52 }
 0x1c4   : > { %v1226_v1 = vpack.c.bf16 %v1214_v54, %v1195_v53 }
 0x1c5   : > { %1245 = vst [vmem:[%s2113_s22 + $0x30] sm:$0xff] %v1229_v2 }
 0x1c6   : > { %1242 = vst [vmem:[%s2113_s22 + $0x18] sm:$0xff] %v1226_v1 }
 0x1c8   : > { %v1161_v9 = vpop.f32.mrf.mxu0  ;;  %v1180_v3 = vpop.f32.mrf.mxu1 }
 0x1c9   : > { %v1196_v4 = vpop.f32.mrf.mxu2  ;;  %v1215_v6 = vpop.f32.mrf.mxu3  ;;  %v1162_v10 = vadd.f32 %v1161_v9, %v2125_v58  ;;  %v1181_v11 = vadd.f32 %v1180_v3, %v2125_v58 }
 0x1ca   : > { %v1197_v7 = vadd.f32 %v1196_v4, %v2117_v40  ;;  %v1216_v5 = vadd.f32 %v1215_v6, %v2117_v40 }
 0x1cb   : > { %v1233_v26 = vpack.c.bf16 %v1181_v11, %v1162_v10 }
 0x1cc   : > { %v1230_v12 = vpack.c.bf16 %v1216_v5, %v1197_v7 }
 0x1cd   : > { %1249 = vst [vmem:[%s2113_s22 + $0x50] sm:$0xff] %v1233_v26 }
 0x1ce   : > { %1246 = vst [vmem:[%s2113_s22 + $0x38] sm:$0xff] %v1230_v12 }
 0x1d0   : > { %v1163_v40 = vpop.f32.mrf.mxu0  ;;  %v1182_v62 = vpop.f32.mrf.mxu1 }
 0x1d1   : > { %v1199_v38 = vpop.f32.mrf.mxu2  ;;  %v1218_v61 = vpop.f32.mrf.mxu3  ;;  %v1164_v63 = vadd.f32 %v1163_v40, %v2133_v23  ;;  %v1183_v55 = vadd.f32 %v1182_v62, %v2133_v23 }
 0x1d2   : > { %v1200_v42 = vadd.f32 %v1199_v38, %v2125_v58  ;;  %v1219_v44 = vadd.f32 %v1218_v61, %v2125_v58 }
 0x1d3   : > { %v1237_v8 = vpack.c.bf16 %v1183_v55, %v1164_v63 }
 0x1d4   : > { %v1234_v0 = vpack.c.bf16 %v1219_v44, %v1200_v42 }
 0x1d5   : > { %1253 = vst [vmem:[%s2113_s22 + $0x70] sm:$0xff] %v1237_v8 }
 0x1d6   : > { %1250 = vst [vmem:[%s2113_s22 + $0x58] sm:$0xff] %v1234_v0 }
 0x1d9   : > { %v1201_v56 = vpop.f32.mrf.mxu2  ;;  %v1220_v57 = vpop.f32.mrf.mxu3 }
 0x1da   : > { %v1202_v13 = vadd.f32 %v1201_v56, %v2133_v23  ;;  %v1221_v14 = vadd.f32 %v1220_v57, %v2133_v23 }
 0x1dc   : > { %v1238_v15 = vpack.c.bf16 %v1221_v14, %v1202_v13 }
 0x1de   : > { %1254 = vst [vmem:[%s2113_s22 + $0x78] sm:$0xff] %v1238_v15 }
 0x1df PF: > { %s18_s26 = sadd.s32 1, %s1635_s26   ;;  %s2185_s24 = smov %s1631_s25 }
 0x1e0   : > { %p15_p5 = scmp.ge.s32.totalorder %s18_s26, 4   ;;  %s2186_s25 = smov %s2188_s27 }
 0x1e2   :  { %17 = sbr.rel (!%p15_p5) target bundleno = 2 (0x2), region = 104 }

// kernel: attn_block_3d.6
= control target key start
LH: loop header
LB: loop body
LE: loop exit
PB: predicated region body
PF: predicated region fallthrough
CT: control target
= control target key end

     0   :  { %s1618_s12 = smov 0   ;;  %s2324_s0 = inlined_call_operand.vmem [shape: bf16[8,32,256], index: 0, kind: input, shape index: {}]   ;;  %s2325_s1 = inlined_call_operand.vmem [shape: bf16[8,32,256], index: 1, kind: input, shape index: {}]   ;;  %s2326_s2 = inlined_call_operand.vmem [shape: bf16[8,32,256], index: 2, kind: input, shape index: {}]   ;;  %s2327_s3 = inlined_call_operand.vmem [shape: bf16[8,32,256], index: 3, kind: output, shape index: {}]  }
   0x1 LB: > { %s1274_s13 = sadd.s32 4294967295, %s1596_s12   ;;  %p1278_p0 = scmp.ge.s32.totalorder %s1596_s12, 1  ;;  %s1596_s12 = sphi %s1618_s12, %s13_s12  }
   0x2   : > { %p157_p1 = scmp.lt.s32.totalorder %s1596_s12, 9 }
   0x4   : > { %p158_p2 = pnand %p1278_p0, %p157_p1 }
   0x6   : > { %161 = sbr.rel (%p158_p2) target bundleno = 1004 (0x3ec), region = 32 }
   0xb   : > { %p191_p3 = scmp.lt.s32.totalorder %s1274_s13, 7  ;;  %vm288_vm0 = vcmask 261120  }
   0xd   : > { %s2448_s13 = smov (!%p191_p3, %s1274_s13), 7 }
   0xe   : > { %s1626_s14 = sshll.u32 %s2448_s13, 5 }
   0xf   : > { %s1632_s17 = scalar_lea.vmem %s2324_s0, %s1626_s14  ;;  %s200_s20 = scalar_lea.vmem %s2325_s1, %s1626_s14 }
  0x10   : > { %v1373_v0 = vld [vmem:[%s1632_s17 + $0x4] sm:$0xf]  ;;  %v1289_v1 = vld [vmem:[%s1632_s17] sm:$0xf]  ;;  %v1291_v2 = vld [vmem:[%s1632_s17 + $0x8] sm:$0xf0]  ;;  %s2260_s23 = scalar_lea.vmem %s2326_s2, %s1626_s14  ;;  %s210_s26 = scalar_lea.vmem %s2327_s3, %s1626_s14 }
  0x11   : > { %v1374_v3 = vld [vmem:[%s1632_s17 + $0x4] sm:$0xf0]  ;;  %v1294_v4 = vor.u32 %v1373_v0, %v1291_v2  ;;  %v1313_v6 = vld [vmem:[%s200_s20 + $0x10] sm:$0xf]  ;;  %v1380_v7 = vld [vmem:[%s200_s20 + $0x14] sm:$0xf0] }
  0x12   : > { %v1290_v5 = vor.u32 %v1374_v3, %v1289_v1  ;;  %v1379_v8 = vld [vmem:[%s200_s20 + $0x14] sm:$0xf]  ;;  %v1315_v9 = vld [vmem:[%s200_s20 + $0x18] sm:$0xf0]  ;;  %v1314_v10 = vor.u32 %v1380_v7, %v1313_v6  ;;  %v1305_v12 = vld [vmem:[%s200_s20] sm:$0xf] }
  0x13   : > { %v1318_v11 = vor.u32 %v1379_v8, %v1315_v9  ;;  %v1378_v13 = vld [vmem:[%s200_s20 + $0x4] sm:$0xf0]  ;;  %v1377_v14 = vld [vmem:[%s200_s20 + $0x4] sm:$0xf]  ;;  %v1307_v15 = vld [vmem:[%s200_s20 + $0x8] sm:$0xf0] }
  0x14   : > { %244 = vxpose.binary.xlu0.c.b16.start [1/4] (short) %v1294_v4, %v1290_v5, 128  ;;  %v1306_v16 = vor.u32 %v1378_v13, %v1305_v12  ;;  %v1310_v17 = vor.u32 %v1377_v14, %v1307_v15  ;;  %v1375_v18 = vld [vmem:[%s1632_s17 + $0x14] sm:$0xf]  ;;  %v1297_v19 = vld [vmem:[%s1632_s17 + $0x10] sm:$0xf]  ;;  %v1299_v20 = vld [vmem:[%s1632_s17 + $0x18] sm:$0xf0] }
  0x15   : > { %343 = vmatpush.bf16.msra.mxu0 %v1314_v10  ;;  %432 = vmatpush.bf16.msra.mxu1 %v1318_v11  ;;  %v1376_v21 = vld [vmem:[%s1632_s17 + $0x14] sm:$0xf0]  ;;  %v1302_v23 = vor.u32 %v1375_v18, %v1299_v20 }
  0x16   : > { %1387 = vmatpush.bf16.msra.mxu3 %v1318_v11  ;;  %1385 = vmatpush.bf16.msra.mxu2 %v1314_v10  ;;  %v1298_v22 = vor.u32 %v1376_v21, %v1297_v19 }
  0x19   : > { %344 = vmatpush.bf16.msra.mxu0 %v1306_v16  ;;  %433 = vmatpush.bf16.msra.mxu1 %v1310_v17 }
  0x1a   : > { %1388 = vmatpush.bf16.msra.mxu3 %v1310_v17  ;;  %1386 = vmatpush.bf16.msra.mxu2 %v1306_v16 }
  0x24   : > { %245 = vxpose.binary.xlu0.c.b16.end [2/4] (short) %v1302_v23, %v1298_v22, 128 }
  0xc0   : > { %v252_v24 = vpop.trf.xlu0 }
  0xc1   : > { %1319 = vmatmul.msk.bf16.vlgmr.msra.gmra.mxu0 %vm288_vm0, %v252_v24  ;;  %1335 = vmatmul.msk.bf16.vlgmr.msra.gmra.mxu1 %vm288_vm0, %v252_v24 }
  0xc8   : > { %v253_v25 = vpop.trf.xlu0 }
  0xd0   : > { %v254_v26 = vpop.trf.xlu0 }
  0xd1   : > { %1320 = vmatmul.msk.bf16.gmra.mxu0 %vm288_vm0, %v254_v26  ;;  %1336 = vmatmul.msk.bf16.gmra.mxu1 %vm288_vm0, %v254_v26 }
  0xd8   : > { %v255_v27 = vpop.trf.xlu0 }
  0xe0   : > { %v256_v28 = vpop.trf.xlu0 }
  0xe1   : > { %1321 = vmatmul.msk.bf16.gmra.mxu0 %vm288_vm0, %v256_v28  ;;  %1337 = vmatmul.msk.bf16.gmra.mxu1 %vm288_vm0, %v256_v28 }
  0xe8   : > { %v257_v29 = vpop.trf.xlu0 }
  0xf0   : > { %v258_v30 = vpop.trf.xlu0 }
  0xf1   : > { %1322 = vmatmul.msk.bf16.gmra.mxu0 %vm288_vm0, %v258_v30  ;;  %1338 = vmatmul.msk.bf16.gmra.mxu1 %vm288_vm0, %v258_v30 }
  0xf8   : > { %v259_v31 = vpop.trf.xlu0 }
  0xf9   : > { %1346 = vmatmul.msk.bf16.vlgmr.msra.gmra.mxu3 %vm288_vm0, %v259_v31 }
 0x100   : > { %v260_v32 = vpop.trf.xlu0 }
 0x101   : > { %1323 = vmatmul.msk.bf16.gmra.mxu0 %vm288_vm0, %v260_v32  ;;  %1339 = vmatmul.msk.bf16.gmra.mxu1 %vm288_vm0, %v260_v32 }
 0x108   : > { %v261_v33 = vpop.trf.xlu0 }
 0x109   : > { %1331 = vmatmul.msk.bf16.vlgmr.msra.gmra.mxu2 %vm288_vm0, %v261_v33  ;;  %1347 = vmatmul.msk.bf16.gmra.mxu3 %vm288_vm0, %v261_v33 }
 0x110   : > { %v262_v34 = vpop.trf.xlu0 }
 0x111   : > { %1324 = vmatmul.msk.bf16.gmra.mxu0 %vm288_vm0, %v262_v34  ;;  %1340 = vmatmul.msk.bf16.gmra.mxu1 %vm288_vm0, %v262_v34 }
 0x118   : > { %v263_v35 = vpop.trf.xlu0 }
 0x119   : > { %1332 = vmatmul.msk.bf16.gmra.mxu2 %vm288_vm0, %v263_v35  ;;  %1348 = vmatmul.msk.bf16.gmra.mxu3 %vm288_vm0, %v263_v35 }
 0x120   : > { %v264_v36 = vpop.trf.xlu0 }
 0x121   : > { %1325 = vmatmul.msk.bf16.gmra.mxu0 %vm288_vm0, %v264_v36  ;;  %1341 = vmatmul.msk.bf16.gmra.mxu1 %vm288_vm0, %v264_v36 }
 0x128   : > { %v265_v37 = vpop.trf.xlu0 }
 0x129   : > { %1333 = vmatmul.msk.bf16.gmra.mxu2 %vm288_vm0, %v265_v37  ;;  %1349 = vmatmul.msk.bf16.gmra.mxu3 %vm288_vm0, %v265_v37 }
 0x130   : > { %v266_v38 = vpop.trf.xlu0 }
 0x131   : > { %1326 = vmatmul.msk.bf16.gmra.mxu0 %vm288_vm0, %v266_v38  ;;  %1342 = vmatmul.msk.bf16.gmra.mxu1 %vm288_vm0, %v266_v38 }
 0x138   : > { %v267_v39 = vpop.trf.xlu0 }
 0x139   : > { %1334 = vmatmul.msk.bf16.gmra.mxu2 %vm288_vm0, %v267_v39  ;;  %1350 = vmatmul.msk.bf16.gmra.mxu3 %vm288_vm0, %v267_v39 }
 0x13e   : > { %v346_v40 = vpop.f32.mrf.mxu0  ;;  %v435_v41 = vpop.f32.mrf.mxu1 }
 0x13f   : > { %v1716_v13 = vmul.f32 0.17677669, %v346_v40  ;;  %v1720_v15 = vmul.f32 0.17677669, %v435_v41 }
 0x141   : > { %1327 = vmatmul.msk.bf16.gmra.mxu0 %vm288_vm0, %v253_v25  ;;  %1343 = vmatmul.msk.bf16.gmra.mxu1 %vm288_vm0, %v253_v25  ;;  %v579_v20 = vmax.f32 %v1716_v13, %v1720_v15 }
 0x146   : > { %v348_v42 = vpop.f32.mrf.mxu0  ;;  %v437_v43 = vpop.f32.mrf.mxu1 }
 0x147   : > { %v1730_v22 = vmul.f32 0.17677669, %v348_v42  ;;  %v1732_v25 = vmul.f32 0.17677669, %v437_v43 }
 0x14e   : > { %v351_v44 = vpop.f32.mrf.mxu0  ;;  %v440_v45 = vpop.f32.mrf.mxu1 }
 0x14f   : > { %v1696_v1 = vmul.f32 0.17677669, %v351_v44  ;;  %v1700_v3 = vmul.f32 0.17677669, %v440_v45 }
 0x151   : > { %1328 = vmatmul.msk.bf16.gmra.mxu0 %vm288_vm0, %v255_v27  ;;  %1344 = vmatmul.msk.bf16.gmra.mxu1 %vm288_vm0, %v255_v27  ;;  %v585_v10 = vmax.f32 %v1696_v1, %v1700_v3 }
 0x156   : > { %v353_v46 = vpop.f32.mrf.mxu0  ;;  %v442_v47 = vpop.f32.mrf.mxu1 }
 0x157   : > { %v1722_v16 = vmul.f32 0.17677669, %v353_v46  ;;  %v1724_v17 = vmul.f32 0.17677669, %v442_v47 }
 0x159   : > { %v588_v21 = vmax.f32 %v1722_v16, %v1724_v17 }
 0x15e   : > { %v356_v48 = vpop.f32.mrf.mxu0  ;;  %v445_v49 = vpop.f32.mrf.mxu1 }
 0x15f   : > { %v1684_v57 = vmul.f32 0.17677669, %v356_v48  ;;  %v1686_v58 = vmul.f32 0.17677669, %v445_v49 }
 0x161   : > { %1329 = vmatmul.msk.bf16.gmra.mxu0 %vm288_vm0, %v257_v29  ;;  %1345 = vmatmul.msk.bf16.gmra.mxu1 %vm288_vm0, %v257_v29  ;;  %v591_v63 = vmax.f32 %v1684_v57, %v1686_v58 }
 0x166   : > { %v358_v50 = vpop.f32.mrf.mxu0  ;;  %v447_v51 = vpop.f32.mrf.mxu1 }
 0x167   : > { %v1702_v4 = vmul.f32 0.17677669, %v358_v50  ;;  %v1704_v5 = vmul.f32 0.17677669, %v447_v51 }
 0x169   : > { %v594_v11 = vmax.f32 %v1702_v4, %v1704_v5 }
 0x16e   : > { %v361_v52 = vpop.f32.mrf.mxu0  ;;  %v450_v53 = vpop.f32.mrf.mxu1 }
 0x16f   : > { %v1677_v54 = vmul.f32 0.17677669, %v361_v52  ;;  %v1679_v55 = vmul.f32 0.17677669, %v450_v53 }
 0x171   : > { %1330 = vmatmul.msk.bf16.gmra.mxu0 %vm288_vm0, %v259_v31  ;;  %v597_v56 = vmax.f32 %v1677_v54, %v1679_v55  ;;  %v582_v31 = vmax.f32 %v1730_v22, %v1732_v25 }
 0x173   : > { %598 = vmax.xlane.f32.xlu2 %v597_v56 }
 0x176   : > { %v363_v59 = vpop.f32.mrf.mxu0  ;;  %v452_v60 = vpop.f32.mrf.mxu1 }
 0x177   : > { %v1688_v61 = vmul.f32 0.17677669, %v363_v59  ;;  %v1690_v62 = vmul.f32 0.17677669, %v452_v60 }
 0x179   : > { %v600_v0 = vmax.f32 %v1688_v61, %v1690_v62 }
 0x17b   : > { %592 = vmax.xlane.f32.xlu2 %v591_v63  ;;  %601 = vmax.xlane.f32.xlu1 %v600_v0 }
 0x17c   : > { %v1698_v2 = vpop.f32.mrf.mxu3 }
 0x17e   : > { %v366_v6 = vpop.f32.mrf.mxu0  ;;  %v455_v7 = vpop.f32.mrf.mxu1 }
 0x17f   : > { %v1706_v8 = vmul.f32 0.17677669, %v366_v6  ;;  %v1708_v9 = vmul.f32 0.17677669, %v455_v7 }
 0x181   : > { %v603_v12 = vmax.f32 %v1706_v8, %v1708_v9 }
 0x183   : > { %586 = vmax.xlane.f32.xlu2 %v585_v10  ;;  %595 = vmax.xlane.f32.xlu1 %v594_v11 }
 0x184   : > { %604 = vmax.xlane.f32.xlu0 %v603_v12  ;;  %v1718_v14 = vpop.f32.mrf.mxu3 }
 0x186   : > { %v368_v18 = vpop.f32.mrf.mxu0  ;;  %v457_v19 = vpop.f32.mrf.mxu1 }
 0x187   : > { %v1742_v34 = vmul.f32 0.17677669, %v368_v18  ;;  %v1744_v35 = vmul.f32 0.17677669, %v457_v19 }
 0x189   : > { %v606_v40 = vmax.f32 %v1742_v34, %v1744_v35 }
 0x18b   : > { %580 = vmax.xlane.f32.xlu2 %v579_v20  ;;  %589 = vmax.xlane.f32.xlu1 %v588_v21 }
 0x18c   : > { %v406_v23 = vpop.f32.mrf.mxu2  ;;  %v495_v24 = vpop.f32.mrf.mxu3 }
 0x18d   : > { %v1734_v26 = vmul.f32 0.17677669, %v406_v23  ;;  %v1736_v27 = vmul.f32 0.17677669, %v495_v24 }
 0x18e   : > { %v371_v28 = vpop.f32.mrf.mxu0  ;;  %v460_v29 = vpop.f32.mrf.mxu1 }
 0x18f   : > { %v651_v30 = vmax.f32 %v1734_v26, %v1736_v27  ;;  %v1754_v42 = vmul.f32 0.17677669, %v371_v28  ;;  %v1756_v45 = vmul.f32 0.17677669, %v460_v29 }
 0x191   : > { %v609_v51 = vmax.f32 %v1754_v42, %v1756_v45 }
 0x193   : > { %583 = vmax.xlane.f32.xlu1 %v582_v31  ;;  %652 = vmax.xlane.f32.xlu2 %v651_v30 }
 0x194   : > { %v408_v32 = vpop.f32.mrf.mxu2  ;;  %v497_v33 = vpop.f32.mrf.mxu3 }
 0x195   : > { %v1770_v60 = vmul.f32 0.17677669, %v408_v32  ;;  %v1772_v63 = vmul.f32 0.17677669, %v497_v33 }
 0x196   : > { %v373_v36 = vpop.f32.mrf.mxu0  ;;  %v462_v37 = vpop.f32.mrf.mxu1 }
 0x197   : > { %v1746_v38 = vmul.f32 0.17677669, %v373_v36  ;;  %v1748_v39 = vmul.f32 0.17677669, %v462_v37  ;;  %2367 = vst [vmem:[#allocation2_spill] sm:$0xff] %v1770_v60  ;;  %v654_v10 = vmax.f32 %v1770_v60, %v1772_v63 }
 0x198   : > { %2368 = vst [vmem:[#allocation3_spill] sm:$0xff] %v1772_v63 }
 0x199   : > { %v612_v41 = vmax.f32 %v1746_v38, %v1748_v39 }
 0x19b   : > { %607 = vmax.xlane.f32.xlu1 %v606_v40  ;;  %613 = vmax.xlane.f32.xlu2 %v612_v41 }
 0x19c   : > { %v411_v43 = vpop.f32.mrf.mxu2  ;;  %v500_v44 = vpop.f32.mrf.mxu3 }
 0x19d   : > { %v1758_v46 = vmul.f32 0.17677669, %v411_v43  ;;  %v1760_v47 = vmul.f32 0.17677669, %v500_v44 }
 0x19e   : > { %v376_v48 = vpop.f32.mrf.mxu0  ;;  %v465_v49 = vpop.f32.mrf.mxu1 }
 0x19f   : > { %v657_v50 = vmax.f32 %v1758_v46, %v1760_v47  ;;  %v1766_v52 = vmul.f32 0.17677669, %v376_v48  ;;  %v1768_v53 = vmul.f32 0.17677669, %v465_v49 }
 0x1a1   : > { %v615_v7 = vmax.f32 %v1766_v52, %v1768_v53 }
 0x1a3   : > { %610 = vmax.xlane.f32.xlu1 %v609_v51  ;;  %658 = vmax.xlane.f32.xlu2 %v657_v50 }
 0x1a4   : > { %v413_v56 = vpop.f32.mrf.mxu2  ;;  %v502_v59 = vpop.f32.mrf.mxu3 }
 0x1a5   : > { %v1778_v11 = vmul.f32 0.17677669, %v413_v56  ;;  %v1780_v19 = vmul.f32 0.17677669, %v502_v59 }
 0x1a6   : > { %v378_v0 = vpop.f32.mrf.mxu0  ;;  %v467_v6 = vpop.f32.mrf.mxu1 }
 0x1a7   : > { %v1782_v20 = vmul.f32 0.17677669, %v378_v0  ;;  %v1784_v21 = vmul.f32 0.17677669, %v467_v6  ;;  %v660_v28 = vmax.f32 %v1778_v11, %v1780_v19 }
 0x1a9   : > { %v618_v29 = vmax.f32 %v1782_v20, %v1784_v21 }
 0x1ab   : > { %655 = vmax.xlane.f32.xlu1 %v654_v10  ;;  %616 = vmax.xlane.f32.xlu2 %v615_v7 }
 0x1ac   : > { %v416_v12 = vpop.f32.mrf.mxu2  ;;  %v505_v18 = vpop.f32.mrf.mxu3 }
 0x1ad   : > { %v1794_v36 = vmul.f32 0.17677669, %v416_v12  ;;  %v1796_v37 = vmul.f32 0.17677669, %v505_v18 }
 0x1ae   : > { %v381_v23 = vpop.f32.mrf.mxu0  ;;  %v470_v24 = vpop.f32.mrf.mxu1 }
 0x1af   : > { %v1790_v30 = vmul.f32 0.17677669, %v381_v23  ;;  %v1792_v31 = vmul.f32 0.17677669, %v470_v24  ;;  %v663_v44 = vmax.f32 %v1794_v36, %v1796_v37 }
 0x1b1   : > { %v621_v43 = vmax.f32 %v1790_v30, %v1792_v31 }
 0x1b3   : > { %661 = vmax.xlane.f32.xlu1 %v660_v28  ;;  %619 = vmax.xlane.f32.xlu2 %v618_v29 }
 0x1b4   : > { %v418_v32 = vpop.f32.mrf.mxu2  ;;  %v507_v33 = vpop.f32.mrf.mxu3 }
 0x1b5   : > { %v1802_v48 = vmul.f32 0.17677669, %v418_v32  ;;  %v1804_v51 = vmul.f32 0.17677669, %v507_v33 }
 0x1b6   : > { %v383_v40 = vpop.f32.mrf.mxu0  ;;  %v472_v41 = vpop.f32.mrf.mxu1 }
 0x1b7   : > { %v666_v10 = vmax.f32 %v1802_v48, %v1804_v51  ;;  %v1814_v12 = vmul.f32 0.17677669, %v383_v40  ;;  %v1816_v18 = vmul.f32 0.17677669, %v472_v41 }
 0x1bb   : > { %664 = vmax.xlane.f32.xlu2 %v663_v44  ;;  %622 = vmax.xlane.f32.xlu1 %v621_v43  ;;  %v624_v43 = vmax.f32 %v1814_v12, %v1816_v18 }
 0x1bc   : > { %v421_v49 = vpop.f32.mrf.mxu2  ;;  %v510_v50 = vpop.f32.mrf.mxu3 }
 0x1bd   : > { %v1806_v56 = vmul.f32 0.17677669, %v421_v49  ;;  %v1808_v59 = vmul.f32 0.17677669, %v510_v50 }
 0x1be   : > { %v386_v0 = vpop.f32.mrf.mxu0  ;;  %v475_v6 = vpop.f32.mrf.mxu1 }
 0x1bf   : > { %v669_v7 = vmax.f32 %v1806_v56, %v1808_v59  ;;  %v1818_v23 = vmul.f32 0.17677669, %v386_v0  ;;  %v1820_v24 = vmul.f32 0.17677669, %v475_v6 }
 0x1c1   : > { %2369 = vst [vmem:[#allocation4_spill] sm:$0xff] %v1818_v23  ;;  %v627_v44 = vmax.f32 %v1818_v23, %v1820_v24 }
 0x1c2   : > { %2370 = vst [vmem:[#allocation5_spill] sm:$0xff] %v1820_v24 }
 0x1c3   : > { %667 = vmax.xlane.f32.xlu1 %v666_v10  ;;  %670 = vmax.xlane.f32.xlu2 %v669_v7 }
 0x1c4   : > { %v423_v32 = vpop.f32.mrf.mxu2  ;;  %v512_v33 = vpop.f32.mrf.mxu3 }
 0x1c5   : > { %v1826_v40 = vmul.f32 0.17677669, %v423_v32  ;;  %v1828_v41 = vmul.f32 0.17677669, %v512_v33 }
 0x1c6   : > { %v388_v28 = vpop.f32.mrf.mxu0  ;;  %v477_v29 = vpop.f32.mrf.mxu1 }
 0x1c7   : > { %v672_v7 = vmax.f32 %v1826_v40, %v1828_v41  ;;  %v1840_v32 = vmul.f32 0.17677669, %v477_v29 }
 0x1c9   : > { %2374 = vst [vmem:[#allocation9_spill] sm:$0xff] %v1840_v32 }
 0x1cb   : > { %625 = vmax.xlane.f32.xlu1 %v624_v43  ;;  %628 = vmax.xlane.f32.xlu2 %v627_v44  ;;  %v1838_v43 = vmul.f32 0.17677669, %v388_v28 }
 0x1cd   : > { %2373 = vst [vmem:[#allocation8_spill] sm:$0xff] %v1838_v43 }
 0x1ce   : > { %v391_v49 = vpop.f32.mrf.mxu0  ;;  %v480_v50 = vpop.f32.mrf.mxu1 }
 0x1cf   : > { %v1830_v0 = vmul.f32 0.17677669, %v391_v49  ;;  %v1832_v6 = vmul.f32 0.17677669, %v480_v50  ;;  %v630_v49 = vmax.f32 %v1838_v43, %v1840_v32 }
 0x1d1   : > { %2371 = vst [vmem:[#allocation6_spill] sm:$0xff] %v1830_v0  ;;  %v633_v10 = vmax.f32 %v1830_v0, %v1832_v6 }
 0x1d2   : > { %2372 = vst [vmem:[#allocation7_spill] sm:$0xff] %v1832_v6 }
 0x1d3   : > { %634 = vmax.xlane.f32.xlu2 %v633_v10  ;;  %673 = vmax.xlane.f32.xlu1 %v672_v7 }
 0x1d6   : > { %v393_v33 = vpop.f32.mrf.mxu0  ;;  %v482_v44 = vpop.f32.mrf.mxu1 }
 0x1d7   : > { %v1844_v50 = vmul.f32 0.17677669, %v393_v33  ;;  %v1846_v24 = vmul.f32 0.17677669, %v482_v44 }
 0x1d9   : > { %v636_v29 = vmax.f32 %v1844_v50, %v1846_v24 }
 0x1db   : > { %631 = vmax.xlane.f32.xlu1 %v630_v49 }
 0x1de   : > { %v396_v23 = vpop.f32.mrf.mxu0  ;;  %v485_v63 = vpop.f32.mrf.mxu1 }
 0x1df   : > { %v1848_v60 = vmul.f32 0.17677669, %v396_v23  ;;  %v1850_v10 = vmul.f32 0.17677669, %v485_v63 }
 0x1e1   : > { %2375 = vst [vmem:[#allocation10_spill] sm:$0xff] %v1848_v60  ;;  %v639_v28 = vmax.f32 %v1848_v60, %v1850_v10 }
 0x1e2   : > { %2376 = vst [vmem:[#allocation11_spill] sm:$0xff] %v1850_v10 }
 0x1e3   : > { %640 = vmax.xlane.f32.xlu2 %v639_v28  ;;  %637 = vmax.xlane.f32.xlu1 %v636_v29 }
 0x1e6   : > { %v599_v7 = vpop.xlane.xlu2 %598  ;;  %v398_v49 = vpop.f32.mrf.mxu0 }
 0x1e7   : > { %v1856_v33 = vmul.f32 0.17677669, %v398_v49  ;;  %v487_v44 = vpop.f32.mrf.mxu1  ;;  %v687_v32 = vsub.f32 %v1677_v54, %v599_v7  ;;  %v688_v63 = vsub.f32 %v1679_v55, %v599_v7  ;;  %v1867_v49 = vmul.f32 0.17677669, %v1698_v2 }
 0x1e8   : > { %v1859_v43 = vmul.f32 0.17677669, %v487_v44 }
 0x1e9   : > { %2377 = vst [vmem:[#allocation12_spill] sm:$0xff] %v1856_v33  ;;  %v763_v6 = vmul.f32 1.442695, %v687_v32  ;;  %v765_v0 = vmul.f32 1.442695, %v688_v63 }
 0x1ea   : > { %2378 = vst [vmem:[#allocation13_spill] sm:$0xff] %v1859_v43  ;;  %v642_v23 = vmax.f32 %v1856_v33, %v1859_v43 }
 0x1eb   : > { %2379 = vst [vmem:[#allocation14_spill] sm:$0xff] %v1867_v49  ;;  %1398 = vpow2.f32 %v763_v6 }
 0x1ec   : > { %643 = vmax.xlane.f32.xlu1 %v642_v23  ;;  %1400 = vpow2.f32 %v765_v0 }
 0x1ee   : > { %v1864_v10 = vpop.xlane.xlu2 %592  ;;  %v602_v28 = vpop.xlane.xlu1 %601 }
 0x1ef   : > { %v401_v29 = vpop.f32.mrf.mxu0  ;;  %v689_v54 = vsub.f32 %v1688_v61, %v602_v28  ;;  %v690_v55 = vsub.f32 %v1690_v62, %v602_v28  ;;  %v1884_v61 = vmul.f32 0.17677669, %v1718_v14 }
 0x1f0   : > { %v1870_v44 = vmul.f32 0.17677669, %v401_v29 }
 0x1f1   : > { %v767_v7 = vmul.f32 1.442695, %v689_v54  ;;  %v769_v63 = vmul.f32 1.442695, %v690_v55  ;;  %v1875_v23 = vpop.eup %1398  ;;  %2383 = vst [vmem:[#allocation18_spill] sm:$0xff] %v1884_v61 }
 0x1f2   : > { %2380 = vst [vmem:[#allocation15_spill] sm:$0xff] %v1870_v44  ;;  %v645_v32 = vmax.f32 %v1870_v44, %v1867_v49  ;;  %v1881_v6 = vpop.eup %1400 }
 0x1f3   : > { %2381 = vst [vmem:[#allocation16_spill] sm:$0xff] %v1875_v23  ;;  %1402 = vpow2.f32 %v767_v7  ;;  %v885_v55 = vadd.f32 %v1881_v6, %v1875_v23 }
 0x1f4   : > { %646 = vmax.xlane.f32.xlu2 %v645_v32  ;;  %2382 = vst [vmem:[#allocation17_spill] sm:$0xff] %v1881_v6  ;;  %1404 = vpow2.f32 %v769_v63 }
 0x1f6   : > { %v1877_v43 = vpop.xlane.xlu2 %586  ;;  %v1879_v2 = vpop.xlane.xlu1 %595 }
 0x1f7   : > { %v403_v0 = vpop.f32.mrf.mxu0  ;;  %v605_v29 = vpop.xlane.xlu0 %604 }
 0x1f8   : > { %v1886_v62 = vmul.f32 0.17677669, %v403_v0  ;;  %v691_v28 = vsub.f32 %v1706_v8, %v605_v29  ;;  %v692_v54 = vsub.f32 %v1708_v9, %v605_v29 }
 0x1f9   : > { %v1894_v14 = vpop.eup %1402 }
 0x1fa   : > { %2384 = vst [vmem:[#allocation19_spill] sm:$0xff] %v1886_v62  ;;  %v648_v32 = vmax.f32 %v1886_v62, %v1884_v61  ;;  %v771_v33 = vmul.f32 1.442695, %v691_v28  ;;  %v773_v60 = vmul.f32 1.442695, %v692_v54  ;;  %v1900_v8 = vpop.eup %1404 }
 0x1fb   : > { %2385 = vst [vmem:[#allocation20_spill] sm:$0xff] %v1894_v14  ;;  %v888_v9 = vadd.f32 %v1900_v8, %v1894_v14 }
 0x1fc   : > { %886 = vadd.xlane.f32.xlu2 %v885_v55  ;;  %649 = vmax.xlane.f32.xlu1 %v648_v32  ;;  %2386 = vst [vmem:[#allocation21_spill] sm:$0xff] %v1900_v8  ;;  %1406 = vpow2.f32 %v771_v33 }
 0x1fd   : > { %1408 = vpow2.f32 %v773_v60 }
 0x1fe   : > { %v1896_v7 = vpop.xlane.xlu2 %580  ;;  %v1898_v0 = vpop.xlane.xlu1 %589 }
 0x202   : > { %v1904_v63 = vpop.eup %1406 }
 0x203   : > { %v1906_v29 = vpop.eup %1408 }
 0x204   : > { %889 = vadd.xlane.f32.xlu1 %v888_v9  ;;  %2387 = vst [vmem:[#allocation22_spill] sm:$0xff] %v1906_v29  ;;  %v891_v55 = vadd.f32 %v1906_v29, %v1904_v63 }
 0x206   : > { %v1908_v28 = vpop.xlane.xlu1 %583  ;;  %v1910_v54 = vpop.xlane.xlu2 %652  ;;  %892 = vadd.xlane.f32.xlu2 %v891_v55 }
 0x20e   : > { %v608_v32 = vpop.xlane.xlu1 %607  ;;  %v614_v6 = vpop.xlane.xlu2 %613 }
 0x20f   : > { %v693_v60 = vsub.f32 %v1742_v34, %v608_v32  ;;  %v694_v33 = vsub.f32 %v1744_v35, %v608_v32  ;;  %v697_v14 = vsub.f32 %v1746_v38, %v614_v6  ;;  %v698_v23 = vsub.f32 %v1748_v39, %v614_v6 }
 0x211   : > { %v775_v8 = vmul.f32 1.442695, %v693_v60  ;;  %v777_v9 = vmul.f32 1.442695, %v694_v33  ;;  %v783_v61 = vmul.f32 1.442695, %v697_v14 }
 0x212   : > { %v785_v62 = vmul.f32 1.442695, %v698_v23 }
 0x213   : > { %1410 = vpow2.f32 %v775_v8 }
 0x214   : > { %1412 = vpow2.f32 %v777_v9 }
 0x215   : > { %1414 = vpow2.f32 %v783_v61 }
 0x216   : > { %v611_v49 = vpop.xlane.xlu1 %610  ;;  %v1918_v44 = vpop.xlane.xlu2 %658  ;;  %1416 = vpow2.f32 %v785_v62 }
 0x217   : > { %v695_v55 = vsub.f32 %v1754_v42, %v611_v49  ;;  %v696_v29 = vsub.f32 %v1756_v45, %v611_v49 }
 0x219   : > { %v1922_v34 = vpop.eup %1410  ;;  %v779_v35 = vmul.f32 1.442695, %v695_v55  ;;  %v781_v32 = vmul.f32 1.442695, %v696_v29 }
 0x21a   : > { %v1924_v60 = vpop.eup %1412 }
 0x21b   : > { %1418 = vpow2.f32 %v779_v35  ;;  %v894_v38 = vadd.f32 %v1924_v60, %v1922_v34  ;;  %v1930_v42 = vpop.eup %1414 }
 0x21c   : > { %1420 = vpow2.f32 %v781_v32  ;;  %v1934_v6 = vpop.eup %1416 }
 0x21d   : > { %895 = vadd.xlane.f32.xlu1 %v894_v38  ;;  %v900_v29 = vadd.f32 %v1934_v6, %v1930_v42 }
 0x21e   : > { %v1928_v39 = vpop.xlane.xlu1 %655  ;;  %v617_v23 = vpop.xlane.xlu2 %616 }
 0x21f   : > { %v699_v45 = vsub.f32 %v1766_v52, %v617_v23  ;;  %v700_v49 = vsub.f32 %v1768_v53, %v617_v23 }
 0x221   : > { %v1936_v61 = vpop.eup %1418  ;;  %v787_v62 = vmul.f32 1.442695, %v699_v45  ;;  %v789_v8 = vmul.f32 1.442695, %v700_v49 }
 0x222   : > { %v1938_v14 = vpop.eup %1420 }
 0x223   : > { %v897_v33 = vadd.f32 %v1938_v14, %v1936_v61  ;;  %1422 = vpow2.f32 %v787_v62 }
 0x224   : > { %1424 = vpow2.f32 %v789_v8 }
 0x225   : > { %901 = vadd.xlane.f32.xlu1 %v900_v29  ;;  %898 = vadd.xlane.f32.xlu2 %v897_v33  ;;  %v683_v33 = vsub.f32 %v1684_v57, %v1864_v10 }
 0x226   : > { %v1944_v52 = vpop.xlane.xlu1 %661  ;;  %v620_v53 = vpop.xlane.xlu2 %619 }
 0x227   : > { %v701_v9 = vsub.f32 %v1782_v20, %v620_v53  ;;  %v702_v55 = vsub.f32 %v1784_v21, %v620_v53 }
 0x229   : > { %v791_v35 = vmul.f32 1.442695, %v701_v9  ;;  %v793_v32 = vmul.f32 1.442695, %v702_v55  ;;  %v1948_v38 = vpop.eup %1422  ;;  %v684_v9 = vsub.f32 %v1686_v58, %v1864_v10 }
 0x22a   : > { %v1950_v23 = vpop.eup %1424 }
 0x22b   : > { %1426 = vpow2.f32 %v791_v35  ;;  %v903_v45 = vadd.f32 %v1950_v23, %v1948_v38 }
 0x22c   : > { %1428 = vpow2.f32 %v793_v32  ;;  %v757_v32 = vmul.f32 1.442695, %v684_v9 }
 0x22d   : > { %904 = vadd.xlane.f32.xlu2 %v903_v45 }
 0x22e   : > { %v623_v49 = vpop.xlane.xlu1 %622  ;;  %v665_v35 = vpop.xlane.xlu2 %664 }
 0x22f   : > { %v703_v62 = vsub.f32 %v1790_v30, %v623_v49  ;;  %v704_v8 = vsub.f32 %v1792_v31, %v623_v49  ;;  %v755_v31 = vmul.f32 1.442695, %v683_v33  ;;  %v731_v45 = vsub.f32 %v1794_v36, %v665_v35 }
 0x230   : > { %v732_v49 = vsub.f32 %v1796_v37, %v665_v35  ;;  %v685_v37 = vsub.f32 %v1702_v4, %v1879_v2 }
 0x231   : > { %v795_v20 = vmul.f32 1.442695, %v703_v62  ;;  %v797_v29 = vmul.f32 1.442695, %v704_v8  ;;  %v1956_v21 = vpop.eup %1426  ;;  %v851_v58 = vmul.f32 1.442695, %v731_v45 }
 0x232   : > { %v1960_v53 = vpop.eup %1428  ;;  %v853_v8 = vmul.f32 1.442695, %v732_v49  ;;  %v759_v45 = vmul.f32 1.442695, %v685_v37 }
 0x233   : > { %1430 = vpow2.f32 %v795_v20  ;;  %v906_v55 = vadd.f32 %v1960_v53, %v1956_v21 }
 0x234   : > { %1432 = vpow2.f32 %v797_v29 }
 0x235   : > { %907 = vadd.xlane.f32.xlu1 %v906_v55  ;;  %1434 = vpow2.f32 %v755_v31  ;;  %v686_v31 = vsub.f32 %v1704_v5, %v1879_v2 }
 0x236   : > { %v668_v30 = vpop.xlane.xlu1 %667  ;;  %1436 = vpow2.f32 %v757_v32  ;;  %v679_v32 = vsub.f32 %v1696_v1, %v1877_v43 }
 0x237   : > { %1438 = vpow2.f32 %v851_v58  ;;  %v761_v49 = vmul.f32 1.442695, %v686_v31 }
 0x238   : > { %1440 = vpow2.f32 %v853_v8  ;;  %v747_v5 = vmul.f32 1.442695, %v679_v32 }
 0x239   : > { %v1968_v57 = vpop.eup %1430 }
 0x23a   : > { %v1970_v62 = vpop.eup %1432 }
 0x23b   : > { %v909_v10 = vadd.f32 %v1970_v62, %v1968_v57  ;;  %v1976_v36 = vpop.eup %1434 }
 0x23c   : > { %v1980_v35 = vpop.eup %1436 }
 0x23d   : > { %910 = vadd.xlane.f32.xlu2 %v909_v10  ;;  %v879_v4 = vadd.f32 %v1980_v35, %v1976_v36  ;;  %v1992_v10 = vpop.eup %1438 }
 0x23e   : > { %v626_v20 = vpop.xlane.xlu1 %625  ;;  %v1994_v2 = vpop.eup %1440 }
 0x23f   : > { %v705_v29 = vsub.f32 %v1814_v12, %v626_v20  ;;  %v706_v33 = vsub.f32 %v1816_v18, %v626_v20  ;;  %v680_v12 = vsub.f32 %v1700_v3, %v1877_v43  ;;  %v671_v18 = vpop.xlane.xlu2 %670  ;;  %v733_v3 = vsub.f32 %v1802_v48, %v668_v30 }
 0x240   : > { %v734_v20 = vsub.f32 %v1804_v51, %v668_v30  ;;  %v736_v37 = vsub.f32 %v1808_v59, %v671_v18  ;;  %v681_v59 = vsub.f32 %v1722_v16, %v1898_v0 }
 0x241   : > { %v799_v9 = vmul.f32 1.442695, %v705_v29  ;;  %v801_v55 = vmul.f32 1.442695, %v706_v33  ;;  %v749_v1 = vmul.f32 1.442695, %v680_v12  ;;  %v735_v29 = vsub.f32 %v1806_v56, %v671_v18 }
 0x242   : > { %v857_v48 = vmul.f32 1.442695, %v734_v20  ;;  %v861_v12 = vmul.f32 1.442695, %v736_v37 }
 0x243   : > { %1442 = vpow2.f32 %v799_v9  ;;  %v855_v9 = vmul.f32 1.442695, %v733_v3  ;;  %v859_v30 = vmul.f32 1.442695, %v735_v29  ;;  %v751_v3 = vmul.f32 1.442695, %v681_v59 }
 0x244   : > { %1444 = vpow2.f32 %v801_v55  ;;  %v951_v55 = vadd.f32 %v1994_v2, %v1992_v10 }
 0x245   : > { %880 = vadd.xlane.f32.xlu2 %v879_v4  ;;  %1446 = vpow2.f32 %v759_v45  ;;  %v682_v4 = vsub.f32 %v1724_v17, %v1898_v0 }
 0x246   : > { %v1990_v58 = vpop.xlane.xlu1 %673  ;;  %1448 = vpow2.f32 %v761_v49  ;;  %v727_v49 = vsub.f32 %v1758_v46, %v1918_v44 }
 0x247   : > { %1450 = vpow2.f32 %v747_v5  ;;  %v2008_v31 = vpop.xlane.xlu2 %628  ;;  %v753_v20 = vmul.f32 1.442695, %v682_v4  ;;  %v676_v4 = vsub.f32 %v1720_v15, %v1896_v7  ;;  %v729_v15 = vsub.f32 %v1778_v11, %v1944_v52 }
 0x248   : > { %1452 = vpow2.f32 %v749_v1  ;;  %v728_v1 = vsub.f32 %v1760_v47, %v1918_v44  ;;  %v843_v0 = vmul.f32 1.442695, %v727_v49  ;;  %v724_v11 = vsub.f32 %v1736_v27, %v1910_v54 }
 0x249   : > { %v1996_v8 = vpop.eup %1442  ;;  %1454 = vpow2.f32 %v855_v9 }
 0x24a   : > { %v1999_v43 = vpop.eup %1444  ;;  %1456 = vpow2.f32 %v857_v48  ;;  %v845_v9 = vmul.f32 1.442695, %v728_v1  ;;  %v741_v1 = vmul.f32 1.442695, %v676_v4 }
 0x24b   : > { %v912_v33 = vadd.f32 %v1999_v43, %v1996_v8  ;;  %v2012_v51 = vpop.eup %1446  ;;  %1458 = vpow2.f32 %v859_v30 }
 0x24c   : > { %v2014_v56 = vpop.eup %1448  ;;  %1460 = vpow2.f32 %v861_v12 }
 0x24d   : > { %913 = vadd.xlane.f32.xlu1 %v912_v33  ;;  %952 = vadd.xlane.f32.xlu2 %v951_v55  ;;  %v2016_v45 = vpop.eup %1450  ;;  %v882_v5 = vadd.f32 %v2014_v56, %v2012_v51  ;;  %1462 = vpow2.f32 %v751_v3  ;;  %v737_v55 = vsub.f32 %v1826_v40, %v1990_v58 }
 0x24e   : > { %v2010_v32 = vpop.xlane.xlu1 %631  ;;  %v2020_v18 = vpop.eup %1452  ;;  %1464 = vpow2.f32 %v753_v20  ;;  %v730_v20 = vsub.f32 %v1780_v19, %v1944_v52 }
 0x24f   : > { %v873_v16 = vadd.f32 %v2020_v18, %v2016_v45  ;;  %v2032_v17 = vpop.eup %1454  ;;  %v2038_v47 = vpop.xlane.xlu2 %634  ;;  %1466 = vpow2.f32 %v843_v0  ;;  %v863_v40 = vmul.f32 1.442695, %v737_v55  ;;  %v723_v0 = vsub.f32 %v1734_v26, %v1910_v54 }
 0x250   : > { %v2036_v37 = vpop.eup %1456  ;;  %1468 = vpow2.f32 %v845_v9  ;;  %v847_v9 = vmul.f32 1.442695, %v729_v15  ;;  %v849_v55 = vmul.f32 1.442695, %v730_v20 }
 0x251   : > { %v2040_v44 = vpop.eup %1458  ;;  %v954_v59 = vadd.f32 %v2036_v37, %v2032_v17  ;;  %v835_v26 = vmul.f32 1.442695, %v723_v0 }
 0x252   : > { %v2044_v30 = vpop.eup %1460 }
 0x253   : > { %v957_v49 = vadd.f32 %v2044_v30, %v2040_v44 }
 0x255   : > { %883 = vadd.xlane.f32.xlu1 %v882_v5  ;;  %874 = vadd.xlane.f32.xlu2 %v873_v16 }
 0x256   : > { %v638_v29 = vpop.xlane.xlu1 %637 }
 0x257   : > { %v713_v46 = vsub.f32 %v1844_v50, %v638_v29  ;;  %v714_v33 = vsub.f32 %v1846_v24, %v638_v29  ;;  %v738_v50 = vsub.f32 %v1828_v41, %v1990_v58  ;;  %v675_v24 = vsub.f32 %v1716_v13, %v1896_v7  ;;  %v2056_v41 = vpop.eup %1462  ;;  %v2060_v3 = vpop.xlane.xlu2 %640 }
 0x258   : > { %v2058_v13 = vpop.eup %1464 }
 0x259   : > { %v815_v48 = vmul.f32 1.442695, %v713_v46  ;;  %v817_v12 = vmul.f32 1.442695, %v714_v33  ;;  %v865_v5 = vmul.f32 1.442695, %v738_v50  ;;  %v2062_v16 = vpop.eup %1466  ;;  %v876_v46 = vadd.f32 %v2058_v13, %v2056_v41 }
 0x25a   : > { %v739_v58 = vmul.f32 1.442695, %v675_v24  ;;  %v2066_v7 = vpop.eup %1468  ;;  %v837_v24 = vmul.f32 1.442695, %v724_v11 }
 0x25b   : > { %1470 = vpow2.f32 %v815_v48  ;;  %2388 = vst [vmem:[#allocation23_spill] sm:$0xff] %v2066_v7  ;;  %v945_v52 = vadd.f32 %v2066_v7, %v2062_v16 }
 0x25c   : > { %1472 = vpow2.f32 %v817_v12 }
 0x25d   : > { %955 = vadd.xlane.f32.xlu1 %v954_v59  ;;  %958 = vadd.xlane.f32.xlu2 %v957_v49  ;;  %1474 = vpow2.f32 %v863_v40  ;;  %v677_v59 = vsub.f32 %v1730_v22, %v1908_v28  ;;  %v678_v40 = vsub.f32 %v1732_v25, %v1908_v28  ;;  %v2391_v49 = vld [vmem:[#allocation15_spill] sm:$0xff] }
 0x25e   : > { %1476 = vpow2.f32 %v865_v5 }
 0x25f   : > { %1478 = vpow2.f32 %v739_v58  ;;  %v2086_v50 = vpop.xlane.xlu1 %643  ;;  %v743_v20 = vmul.f32 1.442695, %v677_v59  ;;  %v745_v0 = vmul.f32 1.442695, %v678_v40  ;;  %v2397_v59 = vld [vmem:[#allocation10_spill] sm:$0xff] }
 0x260   : > { %1480 = vpow2.f32 %v741_v1  ;;  %v2392_v1 = vld [vmem:[#allocation14_spill] sm:$0xff]  ;;  %v715_v40 = vsub.f32 %v2397_v59, %v2060_v3 }
 0x261   : > { %v2070_v29 = vpop.eup %1470  ;;  %1482 = vpow2.f32 %v847_v9 }
 0x262   : > { %2389 = vst [vmem:[#allocation24_spill] sm:$0xff] %v2070_v29  ;;  %v2076_v33 = vpop.eup %1472  ;;  %1484 = vpow2.f32 %v849_v55 }
 0x263   : > { %2390 = vst [vmem:[#allocation25_spill] sm:$0xff] %v2076_v33  ;;  %v924_v19 = vadd.f32 %v2076_v33, %v2070_v29  ;;  %v2084_v48 = vpop.eup %1474  ;;  %1486 = vpow2.f32 %v835_v26 }
 0x264   : > { %v2088_v12 = vpop.eup %1476  ;;  %1488 = vpow2.f32 %v837_v24  ;;  %v2396_v24 = vld [vmem:[#allocation3_spill] sm:$0xff] }
 0x265   : > { %877 = vadd.xlane.f32.xlu1 %v876_v46  ;;  %925 = vadd.xlane.f32.xlu0 %v924_v19  ;;  %v2090_v54 = vpop.eup %1478  ;;  %v960_v58 = vadd.f32 %v2088_v12, %v2084_v48  ;;  %1490 = vpow2.f32 %v743_v20 }
 0x266   : > { %946 = vadd.xlane.f32.xlu2 %v945_v52  ;;  %v2094_v4 = vpop.eup %1480  ;;  %v2394_v52 = vld [vmem:[#allocation2_spill] sm:$0xff]  ;;  %1492 = vpow2.f32 %v745_v0  ;;  %v819_v0 = vmul.f32 1.442695, %v715_v40 }
 0x267   : > { %v647_v27 = vpop.xlane.xlu2 %646  ;;  %v867_v22 = vadd.f32 %v2094_v4, %v2090_v54  ;;  %v2104_v46 = vpop.eup %1482  ;;  %v725_v55 = vsub.f32 %v2394_v52, %v1928_v39 }
 0x268   : > { %v719_v5 = vsub.f32 %v2391_v49, %v647_v27  ;;  %v720_v15 = vsub.f32 %v2392_v1, %v647_v27  ;;  %v2106_v28 = vpop.eup %1484  ;;  %v726_v27 = vsub.f32 %v2396_v24, %v1928_v39 }
 0x269   : > { %v2108_v19 = vpop.eup %1486 }
 0x26a   : > { %v827_v11 = vmul.f32 1.442695, %v719_v5  ;;  %v829_v9 = vmul.f32 1.442695, %v720_v15  ;;  %2393 = vst [vmem:[#allocation15_spill] sm:$0xff] %v2108_v19  ;;  %v2112_v26 = vpop.eup %1488  ;;  %v948_v5 = vadd.f32 %v2106_v28, %v2104_v46 }
 0x26b   : > { %2395 = vst [vmem:[#allocation14_spill] sm:$0xff] %v2112_v26  ;;  %v839_v15 = vmul.f32 1.442695, %v725_v55  ;;  %v939_v20 = vadd.f32 %v2112_v26, %v2108_v19  ;;  %v2124_v39 = vpop.eup %1490  ;;  %v2407_v19 = vld [vmem:[#allocation17_spill] sm:$0xff] }
 0x26c   : > { %1494 = vpow2.f32 %v827_v11  ;;  %v2126_v52 = vpop.eup %1492 }
 0x26d   : > { %961 = vadd.xlane.f32.xlu1 %v960_v58  ;;  %v2398_v58 = vld [vmem:[#allocation11_spill] sm:$0xff]  ;;  %1496 = vpow2.f32 %v829_v9  ;;  %v870_v40 = vadd.f32 %v2126_v52, %v2124_v39 }
 0x26e   : > { %868 = vadd.xlane.f32.xlu2 %v867_v22  ;;  %v716_v1 = vsub.f32 %v2398_v58, %v2060_v3  ;;  %v841_v22 = vmul.f32 1.442695, %v726_v27  ;;  %v2400_v3 = vld [vmem:[#allocation19_spill] sm:$0xff]  ;;  %v2402_v27 = vld [vmem:[#allocation6_spill] sm:$0xff] }
 0x26f   : > { %v650_v25 = vpop.xlane.xlu1 %649  ;;  %v887_v49 = vpop.xlane.xlu2 %886 }
 0x270   : > { %1498 = vrcp.f32 %v887_v49  ;;  %v821_v24 = vmul.f32 1.442695, %v716_v1  ;;  %v721_v9 = vsub.f32 %v2400_v3, %v650_v25  ;;  %v711_v49 = vsub.f32 %v2402_v27, %v2038_v47  ;;  %v2404_v1 = vld [vmem:[#allocation7_spill] sm:$0xff] }
 0x272   : > { %v2128_v59 = vpop.eup %1494  ;;  %v811_v33 = vmul.f32 1.442695, %v711_v49 }
 0x273   : > { %2399 = vst [vmem:[#allocation2_spill] sm:$0xff] %v2128_v59  ;;  %v2131_v55 = vpop.eup %1496 }
 0x274   : > { %2401 = vst [vmem:[#allocation3_spill] sm:$0xff] %v2131_v55  ;;  %v933_v3 = vadd.f32 %v2131_v55, %v2128_v59 }
 0x275   : > { %949 = vadd.xlane.f32.xlu1 %v948_v5  ;;  %v2403_v5 = vld [vmem:[#allocation18_spill] sm:$0xff] }
 0x276   : > { %940 = vadd.xlane.f32.xlu2 %v939_v20  ;;  %v722_v58 = vsub.f32 %v2403_v5, %v650_v25  ;;  %v1499_v20 = vpop.eup %1498  ;;  %v2405_v25 = vld [vmem:[#allocation16_spill] sm:$0xff] }
 0x277   : > { %v890_v11 = vpop.xlane.xlu1 %889  ;;  %v2406_v5 = vld [vmem:[#allocation20_spill] sm:$0xff] }
 0x278   : > { %1500 = vrcp.f32 %v890_v11  ;;  %v712_v11 = vsub.f32 %v2404_v1, %v2038_v47  ;;  %v833_v29 = vmul.f32 1.442695, %v722_v58  ;;  %v2151_v47 = vmul.f32 %v1499_v20, %v2407_v19  ;;  %v2410_v58 = vld [vmem:[#allocation12_spill] sm:$0xff] }
 0x279   : > { %1502 = vpow2.f32 %v839_v15  ;;  %v831_v15 = vmul.f32 1.442695, %v721_v9 }
 0x27a   : > { %1504 = vpow2.f32 %v841_v22  ;;  %v813_v1 = vmul.f32 1.442695, %v712_v11  ;;  %v2413_v11 = vld [vmem:[#allocation8_spill] sm:$0xff] }
 0x27b   : > { %1506 = vpow2.f32 %v819_v0  ;;  %v2145_v0 = vmul.f32 %v1499_v20, %v2405_v25  ;;  %v2412_v20 = vld [vmem:[#allocation13_spill] sm:$0xff] }
 0x27c   : > { %1508 = vpow2.f32 %v821_v24  ;;  %v2408_v24 = vld [vmem:[#allocation21_spill] sm:$0xff] }
 0x27d   : > { %871 = vadd.xlane.f32.xlu1 %v870_v40  ;;  %1510 = vpow2.f32 %v831_v15  ;;  %v2414_v15 = vld [vmem:[#allocation9_spill] sm:$0xff] }
 0x27e   : > { %v1501_v22 = vpop.eup %1500  ;;  %934 = vadd.xlane.f32.xlu2 %v933_v3  ;;  %v717_v3 = vsub.f32 %v2410_v58, %v2086_v50  ;;  %1512 = vpow2.f32 %v833_v29  ;;  %v710_v25 = vsub.f32 %v2414_v15, %v2010_v32 }
 0x27f   : > { %v2142_v27 = vpop.eup %1502  ;;  %v2148_v26 = vmul.f32 %v1501_v22, %v2406_v5  ;;  %v2154_v9 = vmul.f32 %v1501_v22, %v2408_v24  ;;  %v718_v22 = vsub.f32 %v2412_v20, %v2086_v50  ;;  %1514 = vpow2.f32 %v811_v33 }
 0x280   : > { %v2156_v40 = vpop.eup %1504  ;;  %v709_v24 = vsub.f32 %v2413_v11, %v2010_v32  ;;  %1516 = vpow2.f32 %v813_v1  ;;  %v823_v55 = vmul.f32 1.442695, %v717_v3  ;;  %v809_v50 = vmul.f32 1.442695, %v710_v25  ;;  %v2417_v1 = vld [vmem:[#allocation4_spill] sm:$0xff]  ;;  %v2419_v3 = vld [vmem:[#allocation5_spill] sm:$0xff] }
 0x281   : > { %v2158_v49 = vpop.eup %1506  ;;  %v942_v58 = vadd.f32 %v2156_v40, %v2142_v27  ;;  %v825_v59 = vmul.f32 1.442695, %v718_v22  ;;  %v707_v11 = vsub.f32 %v2417_v1, %v2008_v31 }
 0x282   : > { %2409 = vst [vmem:[#allocation10_spill] sm:$0xff] %v2158_v49  ;;  %v2166_v19 = vpop.eup %1508  ;;  %v807_v29 = vmul.f32 1.442695, %v709_v24  ;;  %1518 = vpow2.f32 %v823_v55 }
 0x283   : > { %2411 = vst [vmem:[#allocation11_spill] sm:$0xff] %v2166_v19  ;;  %v927_v5 = vadd.f32 %v2166_v19, %v2158_v49  ;;  %v2178_v7 = vpop.eup %1510  ;;  %1520 = vpow2.f32 %v825_v59 }
 0x284   : > { %v2180_v33 = vpop.eup %1512  ;;  %1522 = vpow2.f32 %v807_v29 }
 0x285   : > { %943 = vadd.xlane.f32.xlu1 %v942_v58  ;;  %2415 = vst [vmem:[#allocation19_spill] sm:$0xff] %v2180_v33  ;;  %v2182_v20 = vpop.eup %1514  ;;  %v708_v58 = vsub.f32 %v2419_v3, %v2008_v31  ;;  %v936_v22 = vadd.f32 %v2180_v33, %v2178_v7  ;;  %1524 = vpow2.f32 %v809_v50 }
 0x286   : > { %928 = vadd.xlane.f32.xlu2 %v927_v5  ;;  %2416 = vst [vmem:[#allocation6_spill] sm:$0xff] %v2182_v20  ;;  %v2186_v32 = vpop.eup %1516  ;;  %v803_v5 = vmul.f32 1.442695, %v707_v11 }
 0x287   : > { %2418 = vst [vmem:[#allocation18_spill] sm:$0xff] %v2186_v32  ;;  %v921_v25 = vadd.f32 %v2186_v32, %v2182_v20  ;;  %v805_v24 = vmul.f32 1.442695, %v708_v58  ;;  %v893_v58 = vpop.xlane.xlu2 %892 }
 0x288   : > { %v2194_v15 = vpop.eup %1518  ;;  %1526 = vpow2.f32 %v803_v5 }
 0x289   : > { %2420 = vst [vmem:[#allocation7_spill] sm:$0xff] %v2194_v15  ;;  %v2196_v55 = vpop.eup %1520  ;;  %1528 = vpow2.f32 %v805_v24 }
 0x28a   : > { %2421 = vst [vmem:[#allocation16_spill] sm:$0xff] %v2196_v55  ;;  %v2198_v1 = vpop.eup %1522  ;;  %v930_v59 = vadd.f32 %v2196_v55, %v2194_v15 }
 0x28b   : > { %2422 = vst [vmem:[#allocation20_spill] sm:$0xff] %v2198_v1  ;;  %v2200_v31 = vpop.eup %1524 }
 0x28c   : > { %2423 = vst [vmem:[#allocation17_spill] sm:$0xff] %v2200_v31  ;;  %v918_v29 = vadd.f32 %v2200_v31, %v2198_v1 }
 0x28d   : > { %937 = vadd.xlane.f32.xlu1 %v936_v22 }
 0x28e   : > { %922 = vadd.xlane.f32.xlu2 %v921_v25  ;;  %v2206_v50 = vpop.eup %1526 }
 0x28f   : > { %2424 = vst [vmem:[#allocation21_spill] sm:$0xff] %v2206_v50  ;;  %v2208_v11 = vpop.eup %1528 }
 0x290   : > { %2425 = vst [vmem:[#allocation12_spill] sm:$0xff] %v2208_v11  ;;  %v915_v3 = vadd.f32 %v2208_v11, %v2206_v50  ;;  %v896_v22 = vpop.xlane.xlu1 %895 }
 0x295   : > { %931 = vadd.xlane.f32.xlu1 %v930_v59 }
 0x296   : > { %919 = vadd.xlane.f32.xlu2 %v918_v29 }
 0x298   : > { %v899_v5 = vpop.xlane.xlu2 %898  ;;  %v902_v25 = vpop.xlane.xlu1 %901 }
 0x29d   : > { %916 = vadd.xlane.f32.xlu1 %v915_v3 }
 0x2a0   : > { %v905_v24 = vpop.xlane.xlu2 %904 }
 0x2a8   : > { %v908_v32 = vpop.xlane.xlu1 %907 }
 0x2b0   : > { %v911_v20 = vpop.xlane.xlu2 %910 }
 0x2b1   : > { %1530 = vrcp.f32 %v911_v20 }
 0x2b7   : > { %v1531_v1 = vpop.eup %1530 }
 0x2b8   : > { %v881_v31 = vpop.xlane.xlu2 %880  ;;  %v1023_v49 = vmul.f32 %v1531_v1, %v1968_v57  ;;  %v1024_v11 = vmul.f32 %v1531_v1, %v1970_v62 }
 0x2c0   : > { %v914_v59 = vpop.xlane.xlu1 %913  ;;  %v2216_v20 = vpop.xlane.xlu2 %952 }
 0x2c1   : > { %1532 = vrcp.f32 %v914_v59 }
 0x2c2   : > { %1534 = vrcp.f32 %v908_v32 }
 0x2c3   : > { %1536 = vrcp.f32 %v905_v24 }
 0x2c4   : > { %1538 = vrcp.f32 %v902_v25 }
 0x2c5   : > { %1540 = vrcp.f32 %v899_v5 }
 0x2c6   : > { %1542 = vrcp.f32 %v896_v22 }
 0x2c7   : > { %v1533_v29 = vpop.eup %1532  ;;  %1544 = vrcp.f32 %v893_v58 }
 0x2c8   : > { %v884_v19 = vpop.xlane.xlu1 %883  ;;  %v1025_v3 = vmul.f32 %v1533_v29, %v1996_v8  ;;  %v1026_v50 = vmul.f32 %v1533_v29, %v1999_v43  ;;  %v1535_v33 = vpop.eup %1534 }
 0x2c9   : > { %v1537_v32 = vpop.eup %1536  ;;  %v1021_v24 = vmul.f32 %v1535_v33, %v1956_v21  ;;  %v1022_v57 = vmul.f32 %v1535_v33, %v1960_v53  ;;  %1546 = vrcp.f32 %v884_v19 }
 0x2ca   : > { %v1073_v55 = vpack.c.bf16 %v1025_v3, %v1023_v49  ;;  %v1074_v15 = vpack.c.bf16 %v1026_v50, %v1024_v11  ;;  %v1019_v62 = vmul.f32 %v1537_v32, %v1948_v38  ;;  %v1020_v8 = vmul.f32 %v1537_v32, %v1950_v23  ;;  %v1539_v43 = vpop.eup %1538  ;;  %v2426_v32 = vld [vmem:[#allocation22_spill] sm:$0xff] }
 0x2cb   : > { %v1541_v50 = vpop.eup %1540  ;;  %v1017_v21 = vmul.f32 %v1539_v43, %v1930_v42  ;;  %v1018_v33 = vmul.f32 %v1539_v43, %v1934_v6  ;;  %1548 = vrcp.f32 %v881_v31 }
 0x2cc   : > { %1111 = vmatpush.bf16.xpose.msrb.mxu2 %v1073_v55  ;;  %1130 = vmatpush.bf16.xpose.msrb.mxu3 %v1074_v15  ;;  %v1071_v49 = vpack.c.bf16 %v1021_v24, %v1019_v62  ;;  %v1072_v1 = vpack.c.bf16 %v1022_v57, %v1020_v8  ;;  %v875_v15 = vpop.xlane.xlu2 %874  ;;  %v1015_v55 = vmul.f32 %v1541_v50, %v1936_v61  ;;  %v1543_v5 = vpop.eup %1542 }
 0x2cd   : > { %v1016_v53 = vmul.f32 %v1541_v50, %v1938_v14  ;;  %v1545_v25 = vpop.eup %1544  ;;  %v1013_v29 = vmul.f32 %v1543_v5, %v1922_v34  ;;  %v1014_v22 = vmul.f32 %v1543_v5, %v1924_v60  ;;  %v2427_v34 = vpack.c.bf16 %v2148_v26, %v2145_v0  ;;  %v1381_v5 = vld [vmem:[%s2260_s23 + $0x4] sm:$0xf] }
 0x2ce   : > { %v1069_v11 = vpack.c.bf16 %v1017_v21, %v1015_v55  ;;  %v1011_v42 = vmul.f32 %v1545_v25, %v1904_v63  ;;  %v1012_v14 = vmul.f32 %v1545_v25, %v2426_v32  ;;  %v2428_v60 = vpack.c.bf16 %v2154_v9, %v2151_v47  ;;  %v1355_v25 = vld [vmem:[%s2260_s23 + $0x8] sm:$0xf0] }
 0x2cf   : > { %v1070_v23 = vpack.c.bf16 %v1018_v33, %v1016_v53  ;;  %v1547_v62 = vpop.eup %1546 }
 0x2d0   : > { %v2220_v59 = vpop.xlane.xlu1 %955  ;;  %v1067_v24 = vpack.c.bf16 %v1013_v29, %v1011_v42  ;;  %v1068_v6 = vpack.c.bf16 %v1014_v22, %v1012_v14  ;;  %v1005_v8 = vmul.f32 %v1547_v62, %v2012_v51  ;;  %v1006_v43 = vmul.f32 %v1547_v62, %v2014_v56 }
 0x2d1   : > { %v1549_v63 = vpop.eup %1548  ;;  %v2272_v42 = vor.u32 %v1381_v5, %v1355_v25 }
 0x2d2   : > { %v1003_v19 = vmul.f32 %v1549_v63, %v1976_v36  ;;  %v1004_v31 = vmul.f32 %v1549_v63, %v1980_v35 }
 0x2d4   : > { %1112 = vmatpush.bf16.xpose.msrb.mxu2 %v1071_v49  ;;  %1131 = vmatpush.bf16.xpose.msrb.mxu3 %v1072_v1  ;;  %v959_v3 = vpop.xlane.xlu2 %958  ;;  %v1063_v1 = vpack.c.bf16 %v1005_v8, %v1003_v19  ;;  %v1064_v50 = vpack.c.bf16 %v1006_v43, %v1004_v31  ;;  %v1361_v43 = vld [vmem:[%s2260_s23 + $0x10] sm:$0xf]  ;;  %v1384_v31 = vld [vmem:[%s2260_s23 + $0x14] sm:$0xf0] }
 0x2d8   : > { %v878_v38 = vpop.xlane.xlu1 %877 }
 0x2d9   : > { %1550 = vrcp.f32 %v878_v38 }
 0x2da   : > { %1552 = vrcp.f32 %v875_v15 }
 0x2dc   : > { %1113 = vmatpush.bf16.xpose.msrb.mxu2 %v1069_v11  ;;  %1132 = vmatpush.bf16.xpose.msrb.mxu3 %v1070_v23  ;;  %v2232_v57 = vpop.xlane.xlu2 %946 }
 0x2df   : > { %v1551_v26 = vpop.eup %1550 }
 0x2e0   : > { %v962_v61 = vpop.xlane.xlu1 %961  ;;  %v1553_v47 = vpop.eup %1552  ;;  %v1001_v9 = vmul.f32 %v1551_v26, %v2056_v41  ;;  %v1002_v51 = vmul.f32 %v1551_v26, %v2058_v13  ;;  %v2289_v26 = vor.u32 %v1384_v31, %v1361_v43 }
 0x2e1   : > { %v999_v36 = vmul.f32 %v1553_v47, %v2016_v45  ;;  %v1000_v35 = vmul.f32 %v1553_v47, %v2020_v18  ;;  %v2430_v47 = vld [vmem:[#allocation15_spill] sm:$0xff] }
 0x2e3   : > { %v1061_v56 = vpack.c.bf16 %v1001_v9, %v999_v36  ;;  %v1062_v15 = vpack.c.bf16 %v1002_v51, %v1000_v35  ;;  %v2431_v51 = vld [vmem:[#allocation14_spill] sm:$0xff] }
 0x2e4   : > { %1114 = vmatpush.bf16.xpose.msrb.mxu2 %v1067_v24  ;;  %1133 = vmatpush.bf16.xpose.msrb.mxu3 %v1068_v6  ;;  %v869_v0 = vpop.xlane.xlu2 %868 }
 0x2e8   : > { %v950_v58 = vpop.xlane.xlu1 %949 }
 0x2ec   : > { %1115 = vmatpush.bf16.xpose.msrb.mxu2 %v2427_v34  ;;  %1134 = vmatpush.bf16.xpose.msrb.mxu3 %v2428_v60  ;;  %v941_v29 = vpop.xlane.xlu2 %940  ;;  %v2429_v34 = vld [vmem:[#allocation23_spill] sm:$0xff] }
 0x2f0   : > { %v872_v49 = vpop.xlane.xlu1 %871 }
 0x2f1   : > { %1554 = vrcp.f32 %v872_v49  ;;  %v1383_v49 = vld [vmem:[%s2260_s23 + $0x14] sm:$0xf] }
 0x2f2   : > { %1556 = vrcp.f32 %v962_v61 }
 0x2f3   : > { %1558 = vrcp.f32 %v869_v0 }
 0x2f4   : > { %1116 = vmatpush.bf16.xpose.msrb.mxu2 %v1063_v1  ;;  %1135 = vmatpush.bf16.xpose.msrb.mxu3 %v1064_v50  ;;  %1560 = vrcp.f32 %v959_v3  ;;  %v1363_v1 = vld [vmem:[%s2260_s23 + $0x18] sm:$0xf0] }
 0x2f5   : > { %1562 = vrcp.f32 %v2220_v59 }
 0x2f6   : > { %1564 = vrcp.f32 %v2216_v20 }
 0x2f7   : > { %v1555_v55 = vpop.eup %1554  ;;  %1566 = vrcp.f32 %v950_v58  ;;  %v935_v58 = vpop.xlane.xlu2 %934 }
 0x2f8   : > { %v1557_v21 = vpop.eup %1556  ;;  %v997_v41 = vmul.f32 %v1555_v55, %v2124_v39  ;;  %v998_v13 = vmul.f32 %v1555_v55, %v2126_v52  ;;  %v944_v3 = vpop.xlane.xlu1 %943  ;;  %1568 = vrcp.f32 %v2232_v57 }
 0x2f9   : > { %v1559_v53 = vpop.eup %1558  ;;  %v1057_v38 = vmul.f32 %v1557_v21, %v2084_v48  ;;  %v1058_v45 = vmul.f32 %v1557_v21, %v2088_v12  ;;  %1570 = vrcp.f32 %v944_v3  ;;  %v2432_v21 = vld [vmem:[#allocation19_spill] sm:$0xff] }
 0x2fa   : > { %v1561_v33 = vpop.eup %1560  ;;  %v995_v18 = vmul.f32 %v1559_v53, %v2090_v54  ;;  %v996_v11 = vmul.f32 %v1559_v53, %v2094_v4  ;;  %v1353_v54 = vld [vmem:[%s2260_s23] sm:$0xf]  ;;  %v1382_v4 = vld [vmem:[%s2260_s23 + $0x4] sm:$0xf0]  ;;  %1572 = vrcp.f32 %v941_v29 }
 0x2fb   : > { %v1055_v39 = vmul.f32 %v1561_v33, %v2040_v44  ;;  %v1056_v48 = vmul.f32 %v1561_v33, %v2044_v30  ;;  %v1563_v23 = vpop.eup %1562  ;;  %v2270_v61 = vor.u32 %v1382_v4, %v1353_v54  ;;  %v2433_v33 = vld [vmem:[#allocation2_spill] sm:$0xff]  ;;  %v2438_v4 = vld [vmem:[#allocation11_spill] sm:$0xff] }
 0x2fc   : > { %1117 = vmatpush.bf16.xpose.msrb.mxu2 %v1061_v56  ;;  %1136 = vmatpush.bf16.xpose.msrb.mxu3 %v1062_v15  ;;  %v1059_v12 = vpack.c.bf16 %v997_v41, %v995_v18  ;;  %v1060_v52 = vpack.c.bf16 %v998_v13, %v996_v11  ;;  %v1565_v22 = vpop.eup %1564  ;;  %v1053_v44 = vmul.f32 %v1563_v23, %v2032_v17  ;;  %v2434_v13 = vld [vmem:[#allocation3_spill] sm:$0xff]  ;;  %v2437_v54 = vld [vmem:[#allocation10_spill] sm:$0xff] }
 0x2fd   : > { %v1089_v20 = vpack.c.bf16 %v1057_v38, %v1055_v39  ;;  %v1090_v59 = vpack.c.bf16 %v1058_v45, %v1056_v48  ;;  %v1054_v30 = vmul.f32 %v1563_v23, %v2036_v37  ;;  %v1051_v32 = vmul.f32 %v1565_v22, %v1992_v10  ;;  %v1567_v17 = vpop.eup %1566  ;;  %v926_v48 = vpop.xlane.xlu0 %925 }
 0x2fe   : > { %v1052_v14 = vmul.f32 %v1565_v22, %v1994_v2  ;;  %v1569_v37 = vpop.eup %1568  ;;  %v1049_v10 = vmul.f32 %v1567_v17, %v2104_v46  ;;  %v1050_v2 = vmul.f32 %v1567_v17, %v2106_v28  ;;  %v2441_v17 = vld [vmem:[#allocation24_spill] sm:$0xff] }
 0x2ff   : > { %v1087_v24 = vpack.c.bf16 %v1053_v44, %v1051_v32  ;;  %v1047_v62 = vmul.f32 %v1569_v37, %v2062_v16  ;;  %v1048_v60 = vmul.f32 %v1569_v37, %v2429_v34  ;;  %v1571_v19 = vpop.eup %1570  ;;  %v2291_v16 = vor.u32 %v1383_v49, %v1363_v1  ;;  %v929_v0 = vpop.xlane.xlu2 %928  ;;  %v2439_v32 = vld [vmem:[#allocation6_spill] sm:$0xff]  ;;  %v2446_v49 = vld [vmem:[#allocation17_spill] sm:$0xff] }
 0x300   : > { %v1088_v6 = vpack.c.bf16 %v1054_v30, %v1052_v14  ;;  %v938_v57 = vpop.xlane.xlu1 %937  ;;  %v1573_v50 = vpop.eup %1572  ;;  %v1045_v46 = vmul.f32 %v1571_v19, %v2142_v27  ;;  %v1046_v28 = vmul.f32 %v1571_v19, %v2156_v40  ;;  %v2445_v19 = vld [vmem:[#allocation20_spill] sm:$0xff] }
 0x301   : > { %v1085_v63 = vpack.c.bf16 %v1049_v10, %v1047_v62  ;;  %v1086_v8 = vpack.c.bf16 %v1050_v2, %v1048_v60  ;;  %1574 = vrcp.f32 %v938_v57  ;;  %v1043_v9 = vmul.f32 %v1573_v50, %v2430_v47  ;;  %v2443_v60 = vld [vmem:[#allocation21_spill] sm:$0xff] }
 0x302   : > { %1576 = vrcp.f32 %v935_v58  ;;  %v1044_v36 = vmul.f32 %v1573_v50, %v2431_v51  ;;  %v2442_v58 = vld [vmem:[#allocation25_spill] sm:$0xff] }
 0x303   : > { %v1083_v56 = vpack.c.bf16 %v1045_v46, %v1043_v9 }
 0x304   : > { %1118 = vmatpush.bf16.xpose.msrb.mxu2 %v1059_v12  ;;  %1137 = vmatpush.bf16.xpose.msrb.mxu3 %v1060_v52  ;;  %v1084_v15 = vpack.c.bf16 %v1046_v28, %v1044_v36  ;;  %v2435_v52 = vld [vmem:[#allocation7_spill] sm:$0xff] }
 0x307   : > { %v1575_v27 = vpop.eup %1574  ;;  %v923_v45 = vpop.xlane.xlu2 %922 }
 0x308   : > { %v932_v35 = vpop.xlane.xlu1 %931  ;;  %v1577_v40 = vpop.eup %1576  ;;  %v1041_v55 = vmul.f32 %v1575_v27, %v2178_v7  ;;  %v1042_v53 = vmul.f32 %v1575_v27, %v2432_v21 }
 0x309   : > { %1578 = vrcp.f32 %v932_v35  ;;  %v1039_v41 = vmul.f32 %v1577_v40, %v2433_v33  ;;  %v1040_v38 = vmul.f32 %v1577_v40, %v2434_v13 }
 0x30a   : > { %1580 = vrcp.f32 %v929_v0 }
 0x30b   : > { %1119 = vmatmul.bf16.vlgmr.msrb.gmra.mxu2 %v2270_v61  ;;  %1138 = vmatmul.bf16.vlgmr.msrb.gmra.mxu3 %v2272_v42  ;;  %v1081_v18 = vpack.c.bf16 %v1041_v55, %v1039_v41  ;;  %v1082_v11 = vpack.c.bf16 %v1042_v53, %v1040_v38  ;;  %1582 = vrcp.f32 %v923_v45 }
 0x30c   : > { %1149 = vmatpush.bf16.xpose.msra.mxu2 %v1089_v20  ;;  %1168 = vmatpush.bf16.xpose.msra.mxu3 %v1090_v59  ;;  %v2436_v59 = vld [vmem:[#allocation16_spill] sm:$0xff]  ;;  %1584 = vrcp.f32 %v926_v48 }
 0x30f   : > { %v1579_v39 = vpop.eup %1578  ;;  %v920_v44 = vpop.xlane.xlu2 %919 }
 0x310   : > { %v1581_v12 = vpop.eup %1580  ;;  %v1037_v20 = vmul.f32 %v1579_v39, %v2435_v52  ;;  %v1038_v7 = vmul.f32 %v1579_v39, %v2436_v59  ;;  %v917_v25 = vpop.xlane.xlu1 %916 }
 0x311   : > { %v1035_v23 = vmul.f32 %v1581_v12, %v2437_v54  ;;  %v1036_v5 = vmul.f32 %v1581_v12, %v2438_v4  ;;  %v1583_v3 = vpop.eup %1582  ;;  %1586 = vrcp.f32 %v917_v25 }
 0x312   : > { %v1585_v30 = vpop.eup %1584  ;;  %v1031_v14 = vmul.f32 %v1583_v3, %v2439_v32  ;;  %1588 = vrcp.f32 %v920_v44 }
 0x313   : > { %v1079_v29 = vpack.c.bf16 %v1037_v20, %v1035_v23  ;;  %v1080_v22 = vpack.c.bf16 %v1038_v7, %v1036_v5  ;;  %v1033_v37 = vmul.f32 %v1585_v30, %v2441_v17  ;;  %v1034_v10 = vmul.f32 %v1585_v30, %v2442_v58 }
 0x314   : > { %1150 = vmatpush.bf16.xpose.msra.mxu2 %v1087_v24  ;;  %1169 = vmatpush.bf16.xpose.msra.mxu3 %v1088_v6  ;;  %v2440_v24 = vld [vmem:[#allocation18_spill] sm:$0xff] }
 0x315   : > { %v1032_v6 = vmul.f32 %v1583_v3, %v2440_v24  ;;  %v1077_v2 = vpack.c.bf16 %v1033_v37, %v1031_v14 }
 0x317   : > { %v1078_v57 = vpack.c.bf16 %v1034_v10, %v1032_v6  ;;  %v1587_v62 = vpop.eup %1586 }
 0x318   : > { %v1589_v34 = vpop.eup %1588 }
 0x319   : > { %v1029_v31 = vmul.f32 %v1589_v34, %v2445_v19  ;;  %v1030_v1 = vmul.f32 %v1589_v34, %v2446_v49 }
 0x31b   : > { %1124 = vmatmul.bf16.gmra.mxu2 %v2289_v26  ;;  %1143 = vmatmul.bf16.gmra.mxu3 %v2291_v16 }
 0x31c   : > { %1151 = vmatpush.bf16.xpose.msra.mxu2 %v1085_v63  ;;  %1170 = vmatpush.bf16.xpose.msra.mxu3 %v1086_v8  ;;  %v1027_v63 = vmul.f32 %v1587_v62, %v2443_v60  ;;  %v2444_v8 = vld [vmem:[#allocation12_spill] sm:$0xff] }
 0x31d   : > { %v1028_v43 = vmul.f32 %v1587_v62, %v2444_v8 }
 0x31e   : > { %v1075_v50 = vpack.c.bf16 %v1029_v31, %v1027_v63 }
 0x31f   : > { %v1076_v46 = vpack.c.bf16 %v1030_v1, %v1028_v43 }
 0x324   : > { %1152 = vmatpush.bf16.xpose.msra.mxu2 %v1083_v56  ;;  %1171 = vmatpush.bf16.xpose.msra.mxu3 %v1084_v15 }
 0x32c   : > { %1153 = vmatpush.bf16.xpose.msra.mxu2 %v1081_v18  ;;  %1172 = vmatpush.bf16.xpose.msra.mxu3 %v1082_v11 }
 0x334   : > { %1154 = vmatpush.bf16.xpose.msra.mxu2 %v1079_v29  ;;  %1173 = vmatpush.bf16.xpose.msra.mxu3 %v1080_v22 }
 0x33c   : > { %1155 = vmatpush.bf16.xpose.msra.mxu2 %v1077_v2  ;;  %1174 = vmatpush.bf16.xpose.msra.mxu3 %v1078_v57 }
 0x344   : > { %1156 = vmatpush.bf16.xpose.msra.mxu2 %v1075_v50  ;;  %1175 = vmatpush.bf16.xpose.msra.mxu3 %v1076_v46 }
 0x34b   : > { %1157 = vmatmul.bf16.vlgmr.msra.gmra.mxu2 %v2270_v61  ;;  %1176 = vmatmul.bf16.vlgmr.msra.gmra.mxu3 %v2272_v42 }
 0x35b   : > { %1162 = vmatmul.bf16.gmra.mxu2 %v2289_v26  ;;  %1181 = vmatmul.bf16.gmra.mxu3 %v2291_v16 }
 0x38e   : > { %v1120_v28 = vpop.f32.mrf.mxu2  ;;  %v1139_v0 = vpop.f32.mrf.mxu3 }
 0x38f   : > { %v1140_v40 = vadd.f32 %v1139_v0, %v1120_v28 }
 0x396   : > { %v1122_v47 = vpop.f32.mrf.mxu2  ;;  %v1141_v9 = vpop.f32.mrf.mxu3 }
 0x397   : > { %v1142_v16 = vadd.f32 %v1141_v9, %v1122_v47 }
 0x39e   : > { %v1125_v51 = vpop.f32.mrf.mxu2  ;;  %v1144_v36 = vpop.f32.mrf.mxu3 }
 0x39f   : > { %v1145_v13 = vadd.f32 %v1144_v36, %v1125_v51 }
 0x3a6   : > { %v1127_v35 = vpop.f32.mrf.mxu2  ;;  %v1146_v56 = vpop.f32.mrf.mxu3 }
 0x3a7   : > { %v1147_v39 = vadd.f32 %v1146_v56, %v1127_v35 }
 0x3ce   : > { %v1158_v15 = vpop.f32.mrf.mxu2  ;;  %v1177_v27 = vpop.f32.mrf.mxu3 }
 0x3cf   : > { %v1178_v55 = vadd.f32 %v1177_v27, %v1158_v15 }
 0x3d1   : > { %v1187_v61 = vpack.c.bf16 %v1178_v55, %v1140_v40 }
 0x3d3   : > { %1191 = vst [vmem:[%s210_s26] sm:$0xff] %v1187_v61 }
 0x3d6   : > { %v1160_v42 = vpop.f32.mrf.mxu2  ;;  %v1179_v26 = vpop.f32.mrf.mxu3 }
 0x3d7   : > { %v1180_v21 = vadd.f32 %v1179_v26, %v1160_v42 }
 0x3d9   : > { %v1188_v53 = vpack.c.bf16 %v1180_v21, %v1142_v16 }
 0x3db   : > { %1192 = vst [vmem:[%s210_s26 + $0x8] sm:$0xff] %v1188_v53 }
 0x3de   : > { %v1163_v33 = vpop.f32.mrf.mxu2  ;;  %v1182_v41 = vpop.f32.mrf.mxu3 }
 0x3df   : > { %v1183_v38 = vadd.f32 %v1182_v41, %v1163_v33 }
 0x3e1   : > { %v1189_v45 = vpack.c.bf16 %v1183_v38, %v1145_v13 }
 0x3e3   : > { %1193 = vst [vmem:[%s210_s26 + $0x10] sm:$0xff] %v1189_v45 }
 0x3e6   : > { %v1165_v18 = vpop.f32.mrf.mxu2  ;;  %v1184_v11 = vpop.f32.mrf.mxu3 }
 0x3e7   : > { %v1185_v48 = vadd.f32 %v1184_v11, %v1165_v18 }
 0x3e9   : > { %v1190_v12 = vpack.c.bf16 %v1185_v48, %v1147_v39 }
 0x3eb   : > { %1194 = vst [vmem:[%s210_s26 + $0x18] sm:$0xff] %v1190_v12 }
 0x3ec PF: > { %s13_s12 = sadd.s32 1, %s1596_s12  }
 0x3ed   : > { %p10_p4 = scmp.ge.s32.totalorder %s13_s12, 10  }
 0x3ef   :  { %12 = sbr.rel (!%p10_p4) target bundleno = 1 (0x1), region = 68 }

// kernel: attn_block_3d.7
= control target key start
LH: loop header
LB: loop body
LE: loop exit
PB: predicated region body
PF: predicated region fallthrough
CT: control target
= control target key end

     0   :  { %s999_s15 = smov 0   ;;  %s1001_s16 = smov 0   ;;  %s1215_s0 = inlined_call_operand.vmem [shape: f32[2,32,1024], index: 0, kind: input, shape index: {}]   ;;  %s1216_s1 = inlined_call_operand.vmem [shape: bf16[2,32,1024], index: 1, kind: input, shape index: {}]   ;;  %s1217_s2 = inlined_call_operand.vmem [shape: bf16[32,32], index: 2, kind: input, shape index: {}]   ;;  %s1218_s3 = inlined_call_operand.vmem [shape: f32[32,1], index: 3, kind: input, shape index: {}]   ;;  %s1219_s4 = inlined_call_operand.vmem [shape: f32[2,32,1024], index: 4, kind: output, shape index: {}]  }
   0x1   :  { %s1003_s17 = smov 0  }
   0x2 LB: > { %s26_s18 = sadd.s32 1, %s967_s16  ;;  %p804_p0 = scmp.ge.s32.totalorder %s971_s17, 1  ;;  %s971_s17 = sphi %s1003_s17, %s14_s17   ;;  %s967_s16 = sphi %s1001_s16, %s1221_s16   ;;  %s963_s15 = sphi %s999_s15, %s1220_s15  }
   0x3   : > { %p28_p1 = scmp.ge.s32.totalorder %s26_s18, 2  ;;  %p200_p2 = scmp.lt.s32.totalorder %s971_s17, 3 }
   0x5   : > { %s1223_s18 = smov (%p28_p1, %s26_s18), 0  ;;  %p201_p3 = pnand %p804_p0, %p200_p2 }
   0x6   : > { %p244_p4 = scmp.lt.s32.totalorder (!%p201_p3), %s963_s15, 1 }
   0x7   : > { %204 = sbr.rel (%p201_p3) target bundleno = 221 (0xdd), region = 36 }
   0xc   : > { %v607_v0 = vld [vmem:[%s1218_s3] sm:$0xff]  ;;  %v973_v1 = vmov 0   ;;  %s1225_s15 = smov (!%p244_p4, %s963_s15), 1  ;;  %v609_v2 = vld [vmem:[%s1218_s3 + $0x10] sm:$0xff]  ;;  %vm384_vm0 = vcmask 261120   ;;  %v608_v6 = vld [vmem:[%s1218_s3 + $0x8] sm:$0xff] }
   0xd   : > { %947 = vset.pattern.permute.xlu0 %v973_v1  ;;  %948 = vset.pattern.permute.xlu1 %v973_v1  ;;  %s902_s23 = sshll.u32 %s1225_s15, 7  ;;  %v904_v25 = vld [vmem:[%s1217_s2] sm:$0xff]  ;;  %v610_v52 = vld [vmem:[%s1218_s3 + $0x18] sm:$0xff]  ;;  %v905_v54 = vld [vmem:[%s1217_s2 + $0x8] sm:$0xff]  ;;  %s901_s9 = sshll.u32 %s1225_s15, 8 }
   0xe   : > { %613 = vperm.xlu0 %947, %v607_v0   ;;  %623 = vperm.xlu1 %948, %v609_v2   ;;  %s1029_s26 = scalar_lea.vmem %s1216_s1, %s902_s23  ;;  %s1095_s12 = scalar_lea.vmem %s1215_s0, %s901_s9 }
   0xf   : > { %v853_v3 = vld [vmem:[%s1029_s26 + $0x40] sm:$0xf]  ;;  %v914_v5 = vld [vmem:[%s1029_s26 + $0x44] sm:$0xf]  ;;  %v861_v9 = vld [vmem:[%s1029_s26 + $0x48] sm:$0xf]  ;;  %s1104_s15 = scalar_lea.vmem %s1219_s4, %s901_s9 }
  0x10   : > { %v918_v4 = vld [vmem:[%s1029_s26 + $0x5c] sm:$0xf0]  ;;  %v855_v8 = vld [vmem:[%s1029_s26 + $0x60] sm:$0xf0]  ;;  %v919_v10 = vld [vmem:[%s1029_s26 + $0x64] sm:$0xf0] }
  0x11   : > { %v854_v7 = vor.u32 %v918_v4, %v853_v3  ;;  %v858_v11 = vor.u32 %v914_v5, %v855_v8  ;;  %v862_v12 = vor.u32 %v919_v10, %v861_v9  ;;  %v915_v13 = vld [vmem:[%s1029_s26 + $0x4c] sm:$0xf]  ;;  %v821_v15 = vld [vmem:[%s1029_s26] sm:$0xf]  ;;  %v906_v18 = vld [vmem:[%s1029_s26 + $0x4] sm:$0xf] }
  0x12   : > { %v863_v14 = vld [vmem:[%s1029_s26 + $0x68] sm:$0xf0]  ;;  %v910_v17 = vld [vmem:[%s1029_s26 + $0x1c] sm:$0xf0]  ;;  %v823_v19 = vld [vmem:[%s1029_s26 + $0x20] sm:$0xf0] }
  0x13   : > { %397 = vmatpush.bf16.msra.mxu0 %v854_v7  ;;  %v866_v16 = vor.u32 %v915_v13, %v863_v14  ;;  %416 = vmatpush.bf16.msra.mxu1 %v858_v11  ;;  %v822_v20 = vor.u32 %v910_v17, %v821_v15  ;;  %v826_v21 = vor.u32 %v906_v18, %v823_v19  ;;  %v829_v22 = vld [vmem:[%s1029_s26 + $0x8] sm:$0xf]  ;;  %v907_v24 = vld [vmem:[%s1029_s26 + $0xc] sm:$0xf]  ;;  %v877_v28 = vld [vmem:[%s1029_s26 + $0x58] sm:$0xf] }
  0x14   : > { %435 = vmatpush.bf16.msra.mxu2 %v862_v12  ;;  %v911_v23 = vld [vmem:[%s1029_s26 + $0x24] sm:$0xf0]  ;;  %v831_v27 = vld [vmem:[%s1029_s26 + $0x28] sm:$0xf0]  ;;  %v921_v29 = vld [vmem:[%s1029_s26 + $0x74] sm:$0xf0] }
  0x15   : > { %454 = vmatpush.bf16.msra.mxu3 %v866_v16  ;;  %v830_v26 = vor.u32 %v911_v23, %v829_v22  ;;  %v834_v30 = vor.u32 %v907_v24, %v831_v27  ;;  %v878_v31 = vor.u32 %v921_v29, %v877_v28  ;;  %v917_v32 = vld [vmem:[%s1029_s26 + $0x5c] sm:$0xf]  ;;  %v869_v34 = vld [vmem:[%s1029_s26 + $0x50] sm:$0xf]  ;;  %v916_v37 = vld [vmem:[%s1029_s26 + $0x54] sm:$0xf] }
  0x16   : > { %618 = vperm.xlu0 %947, %v608_v6   ;;  %v879_v33 = vld [vmem:[%s1029_s26 + $0x78] sm:$0xf0]  ;;  %v920_v36 = vld [vmem:[%s1029_s26 + $0x6c] sm:$0xf0]  ;;  %v871_v38 = vld [vmem:[%s1029_s26 + $0x70] sm:$0xf0]  ;;  %628 = vperm.xlu1 %948, %v610_v52  }
  0x17   : > { %398 = vmatpush.bf16.msra.mxu0 %v822_v20  ;;  %v882_v35 = vor.u32 %v917_v32, %v879_v33  ;;  %417 = vmatpush.bf16.msra.mxu1 %v826_v21  ;;  %v870_v39 = vor.u32 %v920_v36, %v869_v34  ;;  %v845_v40 = vld [vmem:[%s1029_s26 + $0x18] sm:$0xf]  ;;  %v909_v42 = vld [vmem:[%s1029_s26 + $0x1c] sm:$0xf]  ;;  %v874_v43 = vor.u32 %v916_v37, %v871_v38  ;;  %v837_v46 = vld [vmem:[%s1029_s26 + $0x10] sm:$0xf] }
  0x18   : > { %436 = vmatpush.bf16.msra.mxu2 %v830_v26  ;;  %v913_v41 = vld [vmem:[%s1029_s26 + $0x34] sm:$0xf0]  ;;  %v847_v45 = vld [vmem:[%s1029_s26 + $0x38] sm:$0xf0]  ;;  %v912_v47 = vld [vmem:[%s1029_s26 + $0x2c] sm:$0xf0] }
  0x19   : > { %455 = vmatpush.bf16.msra.mxu3 %v834_v30  ;;  %v846_v44 = vor.u32 %v913_v41, %v845_v40  ;;  %v850_v48 = vor.u32 %v909_v42, %v847_v45  ;;  %v908_v49 = vld [vmem:[%s1029_s26 + $0x14] sm:$0xf]  ;;  %v838_v51 = vor.u32 %v912_v47, %v837_v46  ;;  %v543_v56 = vld [vmem:[%s1095_s12] sm:$0xff]  ;;  %v544_v57 = vld [vmem:[%s1095_s12 + $0x8] sm:$0xff] }
  0x1a   : > { %883 = vmatmul.msk.bf16.vlgmr.msra.gmra.mxu0 %vm384_vm0, %v904_v25  ;;  %v839_v50 = vld [vmem:[%s1029_s26 + $0x30] sm:$0xf0]  ;;  %885 = vmatmul.msk.bf16.vlgmr.msra.gmra.mxu1 %vm384_vm0, %v904_v25  ;;  %v546_v1 = vld [vmem:[%s1095_s12 + $0x18] sm:$0xff]  ;;  %v551_v2 = vld [vmem:[%s1095_s12 + $0x40] sm:$0xff] }
  0x1b   : > { %887 = vmatmul.msk.bf16.vlgmr.msra.gmra.mxu2 %vm384_vm0, %v904_v25  ;;  %473 = vmatpush.bf16.msrb.mxu0 %v870_v39  ;;  %v842_v53 = vor.u32 %v908_v49, %v839_v50  ;;  %v545_v0 = vld [vmem:[%s1095_s12 + $0x10] sm:$0xff]  ;;  %v552_v4 = vld [vmem:[%s1095_s12 + $0x48] sm:$0xff]  ;;  %v554_v19 = vld [vmem:[%s1095_s12 + $0x58] sm:$0xff] }
  0x1c   : > { %511 = vmatpush.bf16.msrb.mxu2 %v878_v31  ;;  %889 = vmatmul.msk.bf16.vlgmr.msra.gmra.mxu3 %vm384_vm0, %v904_v25  ;;  %v553_v17 = vld [vmem:[%s1095_s12 + $0x50] sm:$0xff]  ;;  %v559_v20 = vld [vmem:[%s1095_s12 + $0x80] sm:$0xff]  ;;  %v560_v22 = vld [vmem:[%s1095_s12 + $0x88] sm:$0xff] }
  0x1d   : > { %530 = vmatpush.bf16.msrb.mxu3 %v882_v35  ;;  %492 = vmatpush.bf16.msrb.mxu1 %v874_v43  ;;  %v561_v34 = vld [vmem:[%s1095_s12 + $0x90] sm:$0xff]  ;;  %v562_v35 = vld [vmem:[%s1095_s12 + $0x98] sm:$0xff]  ;;  %v567_v36 = vld [vmem:[%s1095_s12 + $0xc0] sm:$0xff] }
  0x1e   : > { %v568_v38 = vld [vmem:[%s1095_s12 + $0xc8] sm:$0xff]  ;;  %v570_v52 = vld [vmem:[%s1095_s12 + $0xd8] sm:$0xff] }
  0x1f   : > { %474 = vmatpush.bf16.msrb.mxu0 %v838_v51  ;;  %v569_v51 = vld [vmem:[%s1095_s12 + $0xd0] sm:$0xff] }
  0x20   : > { %512 = vmatpush.bf16.msrb.mxu2 %v846_v44 }
  0x21   : > { %531 = vmatpush.bf16.msrb.mxu3 %v850_v48  ;;  %493 = vmatpush.bf16.msrb.mxu1 %v842_v53  ;;  %v547_v53 = vld [vmem:[%s1095_s12 + $0x20] sm:$0xff] }
  0x2a   : > { %884 = vmatmul.msk.bf16.gmra.mxu0 %vm384_vm0, %v905_v54  ;;  %886 = vmatmul.msk.bf16.gmra.mxu1 %vm384_vm0, %v905_v54 }
  0x2b   : > { %888 = vmatmul.msk.bf16.gmra.mxu2 %vm384_vm0, %v905_v54 }
  0x2c   : > { %890 = vmatmul.msk.bf16.gmra.mxu3 %vm384_vm0, %v905_v54 }
  0x3a   : > { %891 = vmatmul.msk.bf16.vlgmr.msrb.gmra.mxu0 %vm384_vm0, %v904_v25  ;;  %893 = vmatmul.msk.bf16.vlgmr.msrb.gmra.mxu1 %vm384_vm0, %v904_v25 }
  0x3b   : > { %895 = vmatmul.msk.bf16.vlgmr.msrb.gmra.mxu2 %vm384_vm0, %v904_v25 }
  0x3c   : > { %897 = vmatmul.msk.bf16.vlgmr.msrb.gmra.mxu3 %vm384_vm0, %v904_v25 }
  0x4a   : > { %892 = vmatmul.msk.bf16.gmra.mxu0 %vm384_vm0, %v905_v54  ;;  %894 = vmatmul.msk.bf16.gmra.mxu1 %vm384_vm0, %v905_v54 }
  0x4b   : > { %896 = vmatmul.msk.bf16.gmra.mxu2 %vm384_vm0, %v905_v54 }
  0x4c   : > { %898 = vmatmul.msk.bf16.gmra.mxu3 %vm384_vm0, %v905_v54 }
  0x80   : > { %v1097_v55 = vpop.permute.xlu0 %613  ;;  %v1123_v18 = vpop.permute.xlu1 %623 }
  0x88   : > { %v1114_v5 = vpop.permute.xlu0 %618  ;;  %v1142_v39 = vpop.permute.xlu1 %628 }
  0x97   : > { %v400_v58 = vpop.f32.mrf.mxu0  ;;  %v419_v60 = vpop.f32.mrf.mxu1 }
  0x98   : > { %v575_v59 = vadd.f32 %v543_v56, %v400_v58  ;;  %v576_v61 = vadd.f32 %v544_v57, %v419_v60  ;;  %v548_v56 = vld [vmem:[%s1095_s12 + $0x28] sm:$0xff] }
  0x9a   : > { %v631_v62 = vadd.f32 %v1097_v55, %v575_v59  ;;  %v632_v63 = vadd.f32 %v1097_v55, %v576_v61 }
  0x9c   : > { %663 = vst [vmem:[%s1104_s15] sm:$0xff] %v631_v62 }
  0x9d   : > { %664 = vst [vmem:[%s1104_s15 + $0x8] sm:$0xff] %v632_v63 }
  0x9e   : > { %v438_v3 = vpop.f32.mrf.mxu2 }
  0x9f   : > { %v577_v6 = vadd.f32 %v545_v0, %v438_v3  ;;  %v457_v7 = vpop.f32.mrf.mxu3  ;;  %v402_v8 = vpop.f32.mrf.mxu0 }
  0xa0   : > { %v578_v9 = vadd.f32 %v546_v1, %v457_v7  ;;  %v583_v10 = vadd.f32 %v551_v2, %v402_v8  ;;  %v421_v11 = vpop.f32.mrf.mxu1  ;;  %v555_v7 = vld [vmem:[%s1095_s12 + $0x60] sm:$0xff] }
  0xa1   : > { %v633_v12 = vadd.f32 %v1097_v55, %v577_v6  ;;  %v584_v13 = vadd.f32 %v552_v4, %v421_v11  ;;  %v549_v4 = vld [vmem:[%s1095_s12 + $0x30] sm:$0xff]  ;;  %v550_v6 = vld [vmem:[%s1095_s12 + $0x38] sm:$0xff] }
  0xa2   : > { %v634_v14 = vadd.f32 %v1097_v55, %v578_v9  ;;  %v639_v15 = vadd.f32 %v1114_v5, %v583_v10  ;;  %v556_v9 = vld [vmem:[%s1095_s12 + $0x68] sm:$0xff] }
  0xa3   : > { %665 = vst [vmem:[%s1104_s15 + $0x10] sm:$0xff] %v633_v12  ;;  %v640_v16 = vadd.f32 %v1114_v5, %v584_v13 }
  0xa4   : > { %666 = vst [vmem:[%s1104_s15 + $0x18] sm:$0xff] %v634_v14 }
  0xa5   : > { %671 = vst [vmem:[%s1104_s15 + $0x40] sm:$0xff] %v639_v15 }
  0xa6   : > { %672 = vst [vmem:[%s1104_s15 + $0x48] sm:$0xff] %v640_v16  ;;  %v440_v21 = vpop.f32.mrf.mxu2 }
  0xa7   : > { %v585_v23 = vadd.f32 %v553_v17, %v440_v21  ;;  %v459_v24 = vpop.f32.mrf.mxu3  ;;  %v405_v25 = vpop.f32.mrf.mxu0 }
  0xa8   : > { %v586_v26 = vadd.f32 %v554_v19, %v459_v24  ;;  %v591_v27 = vadd.f32 %v559_v20, %v405_v25  ;;  %v424_v28 = vpop.f32.mrf.mxu1  ;;  %v563_v24 = vld [vmem:[%s1095_s12 + $0xa0] sm:$0xff] }
  0xa9   : > { %v641_v29 = vadd.f32 %v1114_v5, %v585_v23  ;;  %v592_v30 = vadd.f32 %v560_v22, %v424_v28  ;;  %v557_v22 = vld [vmem:[%s1095_s12 + $0x70] sm:$0xff]  ;;  %v558_v23 = vld [vmem:[%s1095_s12 + $0x78] sm:$0xff] }
  0xaa   : > { %v642_v31 = vadd.f32 %v1114_v5, %v586_v26  ;;  %v647_v32 = vadd.f32 %v1123_v18, %v591_v27  ;;  %v564_v26 = vld [vmem:[%s1095_s12 + $0xa8] sm:$0xff] }
  0xab   : > { %673 = vst [vmem:[%s1104_s15 + $0x50] sm:$0xff] %v641_v29  ;;  %v648_v33 = vadd.f32 %v1123_v18, %v592_v30 }
  0xac   : > { %674 = vst [vmem:[%s1104_s15 + $0x58] sm:$0xff] %v642_v31 }
  0xad   : > { %679 = vst [vmem:[%s1104_s15 + $0x80] sm:$0xff] %v647_v32 }
  0xae   : > { %680 = vst [vmem:[%s1104_s15 + $0x88] sm:$0xff] %v648_v33  ;;  %v443_v37 = vpop.f32.mrf.mxu2 }
  0xaf   : > { %v593_v40 = vadd.f32 %v561_v34, %v443_v37  ;;  %v462_v41 = vpop.f32.mrf.mxu3  ;;  %v407_v42 = vpop.f32.mrf.mxu0  ;;  %v565_v37 = vld [vmem:[%s1095_s12 + $0xb0] sm:$0xff] }
  0xb0   : > { %v594_v43 = vadd.f32 %v562_v35, %v462_v41  ;;  %v599_v44 = vadd.f32 %v567_v36, %v407_v42  ;;  %v426_v45 = vpop.f32.mrf.mxu1  ;;  %v572_v42 = vld [vmem:[%s1095_s12 + $0xe8] sm:$0xff] }
  0xb1   : > { %v649_v46 = vadd.f32 %v1123_v18, %v593_v40  ;;  %v600_v47 = vadd.f32 %v568_v38, %v426_v45  ;;  %v566_v38 = vld [vmem:[%s1095_s12 + $0xb8] sm:$0xff]  ;;  %v571_v40 = vld [vmem:[%s1095_s12 + $0xe0] sm:$0xff] }
  0xb2   : > { %v650_v48 = vadd.f32 %v1123_v18, %v594_v43  ;;  %v655_v49 = vadd.f32 %v1142_v39, %v599_v44 }
  0xb3   : > { %681 = vst [vmem:[%s1104_s15 + $0x90] sm:$0xff] %v649_v46  ;;  %v656_v50 = vadd.f32 %v1142_v39, %v600_v47 }
  0xb4   : > { %682 = vst [vmem:[%s1104_s15 + $0x98] sm:$0xff] %v650_v48 }
  0xb5   : > { %687 = vst [vmem:[%s1104_s15 + $0xc0] sm:$0xff] %v655_v49 }
  0xb6   : > { %688 = vst [vmem:[%s1104_s15 + $0xc8] sm:$0xff] %v656_v50  ;;  %v445_v54 = vpop.f32.mrf.mxu2 }
  0xb7   : > { %v601_v57 = vadd.f32 %v569_v51, %v445_v54  ;;  %v464_v58 = vpop.f32.mrf.mxu3  ;;  %v476_v59 = vpop.f32.mrf.mxu0  ;;  %v574_v54 = vld [vmem:[%s1095_s12 + $0xf8] sm:$0xff] }
  0xb8   : > { %v602_v60 = vadd.f32 %v570_v52, %v464_v58  ;;  %v579_v61 = vadd.f32 %v547_v53, %v476_v59  ;;  %v495_v62 = vpop.f32.mrf.mxu1  ;;  %v573_v53 = vld [vmem:[%s1095_s12 + $0xf0] sm:$0xff] }
  0xb9   : > { %v657_v63 = vadd.f32 %v1142_v39, %v601_v57  ;;  %v580_v0 = vadd.f32 %v548_v56, %v495_v62 }
  0xba   : > { %v658_v1 = vadd.f32 %v1142_v39, %v602_v60  ;;  %v635_v2 = vadd.f32 %v1097_v55, %v579_v61 }
  0xbb   : > { %689 = vst [vmem:[%s1104_s15 + $0xd0] sm:$0xff] %v657_v63  ;;  %v636_v3 = vadd.f32 %v1097_v55, %v580_v0 }
  0xbc   : > { %690 = vst [vmem:[%s1104_s15 + $0xd8] sm:$0xff] %v658_v1 }
  0xbd   : > { %667 = vst [vmem:[%s1104_s15 + $0x20] sm:$0xff] %v635_v2 }
  0xbe   : > { %668 = vst [vmem:[%s1104_s15 + $0x28] sm:$0xff] %v636_v3  ;;  %v514_v8 = vpop.f32.mrf.mxu2 }
  0xbf   : > { %v581_v10 = vadd.f32 %v549_v4, %v514_v8  ;;  %v533_v11 = vpop.f32.mrf.mxu3  ;;  %v478_v12 = vpop.f32.mrf.mxu0 }
  0xc0   : > { %v582_v13 = vadd.f32 %v550_v6, %v533_v11  ;;  %v587_v14 = vadd.f32 %v555_v7, %v478_v12  ;;  %v497_v15 = vpop.f32.mrf.mxu1 }
  0xc1   : > { %v637_v16 = vadd.f32 %v1097_v55, %v581_v10  ;;  %v588_v17 = vadd.f32 %v556_v9, %v497_v15 }
  0xc2   : > { %v638_v19 = vadd.f32 %v1097_v55, %v582_v13  ;;  %v643_v20 = vadd.f32 %v1114_v5, %v587_v14 }
  0xc3   : > { %669 = vst [vmem:[%s1104_s15 + $0x30] sm:$0xff] %v637_v16  ;;  %v644_v21 = vadd.f32 %v1114_v5, %v588_v17 }
  0xc4   : > { %670 = vst [vmem:[%s1104_s15 + $0x38] sm:$0xff] %v638_v19 }
  0xc5   : > { %675 = vst [vmem:[%s1104_s15 + $0x60] sm:$0xff] %v643_v20 }
  0xc6   : > { %676 = vst [vmem:[%s1104_s15 + $0x68] sm:$0xff] %v644_v21  ;;  %v516_v25 = vpop.f32.mrf.mxu2 }
  0xc7   : > { %v589_v27 = vadd.f32 %v557_v22, %v516_v25  ;;  %v535_v55 = vpop.f32.mrf.mxu3  ;;  %v481_v28 = vpop.f32.mrf.mxu0 }
  0xc8   : > { %v590_v29 = vadd.f32 %v558_v23, %v535_v55  ;;  %v595_v30 = vadd.f32 %v563_v24, %v481_v28  ;;  %v500_v31 = vpop.f32.mrf.mxu1 }
  0xc9   : > { %v645_v32 = vadd.f32 %v1114_v5, %v589_v27  ;;  %v596_v33 = vadd.f32 %v564_v26, %v500_v31 }
  0xca   : > { %v646_v34 = vadd.f32 %v1114_v5, %v590_v29  ;;  %v651_v35 = vadd.f32 %v1123_v18, %v595_v30 }
  0xcb   : > { %677 = vst [vmem:[%s1104_s15 + $0x70] sm:$0xff] %v645_v32  ;;  %v652_v36 = vadd.f32 %v1123_v18, %v596_v33 }
  0xcc   : > { %678 = vst [vmem:[%s1104_s15 + $0x78] sm:$0xff] %v646_v34 }
  0xcd   : > { %683 = vst [vmem:[%s1104_s15 + $0xa0] sm:$0xff] %v651_v35 }
  0xce   : > { %684 = vst [vmem:[%s1104_s15 + $0xa8] sm:$0xff] %v652_v36  ;;  %v519_v41 = vpop.f32.mrf.mxu2 }
  0xcf   : > { %v597_v43 = vadd.f32 %v565_v37, %v519_v41  ;;  %v538_v5 = vpop.f32.mrf.mxu3  ;;  %v483_v44 = vpop.f32.mrf.mxu0 }
  0xd0   : > { %v598_v45 = vadd.f32 %v566_v38, %v538_v5  ;;  %v603_v46 = vadd.f32 %v571_v40, %v483_v44  ;;  %v502_v47 = vpop.f32.mrf.mxu1 }
  0xd1   : > { %v653_v48 = vadd.f32 %v1123_v18, %v597_v43  ;;  %v604_v49 = vadd.f32 %v572_v42, %v502_v47 }
  0xd2   : > { %v654_v50 = vadd.f32 %v1123_v18, %v598_v45  ;;  %v659_v51 = vadd.f32 %v1142_v39, %v603_v46 }
  0xd3   : > { %685 = vst [vmem:[%s1104_s15 + $0xb0] sm:$0xff] %v653_v48  ;;  %v660_v52 = vadd.f32 %v1142_v39, %v604_v49 }
  0xd4   : > { %686 = vst [vmem:[%s1104_s15 + $0xb8] sm:$0xff] %v654_v50 }
  0xd5   : > { %691 = vst [vmem:[%s1104_s15 + $0xe0] sm:$0xff] %v659_v51 }
  0xd6   : > { %692 = vst [vmem:[%s1104_s15 + $0xe8] sm:$0xff] %v660_v52  ;;  %v521_v56 = vpop.f32.mrf.mxu2 }
  0xd7   : > { %v605_v57 = vadd.f32 %v573_v53, %v521_v56  ;;  %v540_v58 = vpop.f32.mrf.mxu3 }
  0xd8   : > { %v606_v59 = vadd.f32 %v574_v54, %v540_v58 }
  0xd9   : > { %v661_v60 = vadd.f32 %v1142_v39, %v605_v57 }
  0xda   : > { %v662_v61 = vadd.f32 %v1142_v39, %v606_v59 }
  0xdb   : > { %693 = vst [vmem:[%s1104_s15 + $0xf0] sm:$0xff] %v661_v60 }
  0xdc   : > { %694 = vst [vmem:[%s1104_s15 + $0xf8] sm:$0xff] %v662_v61 }
  0xdd PF: > { %s14_s17 = sadd.s32 1, %s971_s17   ;;  %s1220_s15 = smov %s967_s16 }
  0xde   : > { %p11_p5 = scmp.ge.s32.totalorder %s14_s17, 4   ;;  %s1221_s16 = smov %s1223_s18 }
  0xe0   :  { %13 = sbr.rel (!%p11_p5) target bundleno = 2 (0x2), region = 69 }

</bundles_post_ra>
